<compile_context>
chip_gen: v5e
topology: v5e:2x2
jax: 0.10.0
libtpu: 0.0.40
codegen_flags: <defaults>
</compile_context>

<pallas_src>
import functools

import numpy as np
import jax
import jax.numpy as jnp
from jax.experimental import pallas as pl
from jax.experimental.pallas import tpu as pltpu

R1, R2 = 0.1, 0.2
NSAMPLE1, NSAMPLE2 = 32, 64
USE_XYZ = True
BN_EPS = 1e-5

C_IN = 6 if USE_XYZ else 3     # per-branch grouped-feature channels
C_PAD = 16                     # fused (2*C_IN = 12) channels zero-padded to 16
S_FUSED = NSAMPLE2             # 64 samples after duplicating branch-1
S_CHUNK = 16                   # streaming-max chunk over sample axis (mult of 8)


def _round_up(x, m):
    return (x + m - 1) // m * m


# ---------------------------------------------------------------------------
# JAX glue: ball query + grouping (data-dependent gather, not a Pallas hot path)
# ---------------------------------------------------------------------------
def ball_query_and_group(xyz, new_xyz, radius, nsample):
    """Reproduces pointnet2 ball_query + grouping_operation + QueryAndGroup.

    xyz:     (B, N, 3)  points to be grouped (pts1)
    new_xyz: (B, M, 3)  query centers        (pts2)
    returns  (B, M, nsample, 6) = concat([grouped_xyz - center, grouped_xyz])
    """
    B, N, _ = xyz.shape
    diff = new_xyz[:, :, None, :] - xyz[:, None, :, :]            # (B, M, N, 3)
    dist2 = jnp.sum(diff * diff, axis=-1)                         # (B, M, N)
    within = dist2 < (radius * radius)

    order = jnp.arange(N, dtype=jnp.int32)
    keys = jnp.where(within, order, order + N)                    # valid first, in order
    sorted_idx = jnp.argsort(keys, axis=-1)[:, :, : min(nsample, N)].astype(jnp.int32)
    if sorted_idx.shape[-1] < nsample:
        pad = nsample - sorted_idx.shape[-1]
        B_, M_ = sorted_idx.shape[:2]
        sorted_idx = jnp.concatenate(
            [sorted_idx, jnp.broadcast_to(sorted_idx[..., :1], (B_, M_, pad))], axis=-1)
    valid_count = jnp.sum(within, axis=-1)                        # (B, M)
    first = sorted_idx[..., :1]                                   # first-in-ball fills tail
    slots = jnp.arange(nsample, dtype=jnp.int32)[None, None, :]
    idx = jnp.where(slots < valid_count[..., None], sorted_idx, first)

    grouped_xyz = xyz[jnp.arange(B)[:, None, None], idx]          # (B, M, nsample, 3)
    rel_xyz = grouped_xyz - new_xyz[:, :, None, :]
    if USE_XYZ:
        return jnp.concatenate([rel_xyz, grouped_xyz], axis=-1)   # (B, M, nsample, 6)
    return grouped_xyz


# ---------------------------------------------------------------------------
# Pallas kernel: fused (block-diagonal) SharedMLP with streaming max over the
# sample axis, then the final 1x1 Conv1d into a lane-dense (tm, 128) tile.
# ---------------------------------------------------------------------------
def _pe_kernel(g_ref, w1_ref, w2_ref, w3_ref, wo_ref, bias_ref, out_ref,
               *, s_chunk):
    tm, s_total, c = g_ref.shape
    n_chunks = s_total // s_chunk
    n3 = w3_ref.shape[1]                       # 256 = fused layer-3 width

    b1 = bias_ref[0:1, 0:w1_ref.shape[1]]      # (1, 64)
    b2 = bias_ref[1:2, 0:w2_ref.shape[1]]      # (1, 128)
    b3 = bias_ref[2:3, 0:n3]                   # (1, 256)
    bo = bias_ref[3:4, 0:wo_ref.shape[1]]      # (1, OUT_PAD)

    w1 = w1_ref[...]
    w2 = w2_ref[...]
    w3 = w3_ref[...]

    # Streaming max over the sample axis: process s_chunk samples per step and
    # fold into a (tm, 256) running max.  Post-ReLU features are >= 0, so a
    # zero init is exactly max-pooling over all samples.
    acc = jnp.zeros((tm, n3), jnp.float32)
    for ci in range(n_chunks):                 # static, small trip count (<=4)
        x = g_ref[:, ci * s_chunk:(ci + 1) * s_chunk, :]       # (tm, s_chunk, C) bf16
        h = x.reshape(tm * s_chunk, c)                         # layout-preserving
        h = jnp.dot(h, w1, preferred_element_type=jnp.float32)
        h = jnp.maximum(h + b1, 0.0).astype(jnp.bfloat16)
        h = jnp.dot(h, w2, preferred_element_type=jnp.float32)
        h = jnp.maximum(h + b2, 0.0).astype(jnp.bfloat16)
        h = jnp.dot(h, w3, preferred_element_type=jnp.float32)
        h = jnp.maximum(h + b3, 0.0)
        h = h.reshape(tm, s_chunk, n3)                         # layout-preserving
        acc = jnp.maximum(acc, jnp.max(h, axis=1))             # XLU, free vs MXU

    feat = acc.astype(jnp.bfloat16)                            # (tm, 256)
    out = jnp.dot(feat, wo_ref[...], preferred_element_type=jnp.float32) + bo
    out_ref[...] = out.astype(out_ref.dtype)                   # lane-dense (tm, 128k)


def pe_pallas(g_fused, kparams, out_dim, tm=256):
    """g_fused: (B, M, S_FUSED, C_PAD) bf16; returns (B, M, out_dim) f32."""
    B, M, S, C = g_fused.shape
    w1, w2, w3, wo, bias_pack = kparams
    out_pad = wo.shape[1]

    s_chunk = min(S_CHUNK, S)
    assert S % s_chunk == 0

    # Large M tile (amortizes per-grid-step overhead); adapt for small M.
    tm_eff = min(tm, _round_up(M, 8))
    m_pad = _round_up(M, tm_eff)
    if m_pad != M:
        g_fused = jnp.pad(g_fused, ((0, 0), (0, m_pad - M), (0, 0), (0, 0)))

    out = pl.pallas_call(
        functools.partial(_pe_kernel, s_chunk=s_chunk),
        out_shape=jax.ShapeDtypeStruct((B, m_pad, out_pad), jnp.float32),
        grid_spec=pltpu.PrefetchScalarGridSpec(
            num_scalar_prefetch=0,
            grid=(B, m_pad // tm_eff),
            in_specs=[
                pl.BlockSpec((None, tm_eff, S, C), lambda b, i: (b, i, 0, 0)),
                pl.BlockSpec(w1.shape, lambda b, i: (0, 0)),
                pl.BlockSpec(w2.shape, lambda b, i: (0, 0)),
                pl.BlockSpec(w3.shape, lambda b, i: (0, 0)),
                pl.BlockSpec(wo.shape, lambda b, i: (0, 0)),
                pl.BlockSpec(bias_pack.shape, lambda b, i: (0, 0)),
            ],
            out_specs=pl.BlockSpec((None, tm_eff, out_pad), lambda b, i: (b, i, 0)),
        ),
        compiler_params=pltpu.CompilerParams(
            dimension_semantics=("parallel", "parallel"),
            vmem_limit_bytes=48 * 1024 * 1024,
        ),
    )(g_fused, w1, w2, w3, wo, bias_pack)
    return out[:, :M, :out_dim]


# ---------------------------------------------------------------------------
# Parameters: deterministic init (BN folded, eval mode) + kernel-side packing
# ---------------------------------------------------------------------------
def init_params(key, out_dim):
    def fused_conv_bn(k, cin, cout):
        kw, kg, kb, km = jax.random.split(k, 4)
        w = jax.random.normal(kw, (cin, cout), jnp.float32) / np.sqrt(cin)
        gamma = 1.0 + 0.1 * jax.random.normal(kg, (cout,), jnp.float32)
        beta = 0.1 * jax.random.normal(kb, (cout,), jnp.float32)
        rmean = 0.1 * jax.random.normal(km, (cout,), jnp.float32)
        rvar = jnp.ones((cout,), jnp.float32)
        scale = gamma / jnp.sqrt(rvar + BN_EPS)
        return w * scale[None, :], (beta - rmean * scale)[None, :]  # (cin,cout), (1,cout)

    dims = [C_IN, 32, 64, 128]
    keys = jax.random.split(key, 8)
    mlp1 = [fused_conv_bn(keys[i], dims[i], dims[i + 1]) for i in range(3)]
    mlp2 = [fused_conv_bn(keys[3 + i], dims[i], dims[i + 1]) for i in range(3)]
    w3 = jax.random.normal(keys[6], (256, out_dim), jnp.float32) / np.sqrt(256)
    b3 = 0.1 * jax.random.normal(keys[7], (1, out_dim), jnp.float32)
    return mlp1, mlp2, (w3, b3)


def pack_params_for_kernel(params, out_dim):
    """Block-diagonal branch fusion, lane-dense output padding, bf16 weights,
    and a single packed (4, 256) f32 bias buffer."""
    mlp1, mlp2, (w3, b3) = params

    def blockdiag(wa, wb):
        ka, na = wa.shape
        kb, nb = wb.shape
        top = jnp.concatenate([wa, jnp.zeros((ka, nb), wa.dtype)], axis=1)
        bot = jnp.concatenate([jnp.zeros((kb, na), wb.dtype), wb], axis=0 + 1)
        return jnp.concatenate([top, bot], axis=0)

    fused_w, fused_b = [], []
    for (wa, ba), (wb, bb) in zip(mlp1, mlp2):
        fused_w.append(blockdiag(wa, wb))                     # (2cin, 2cout)
        fused_b.append(jnp.concatenate([ba, bb], axis=-1))    # (1, 2cout)

    # First fused layer: zero rows for the channel padding 12 -> C_PAD.
    w1 = fused_w[0]
    if w1.shape[0] < C_PAD:
        w1 = jnp.pad(w1, ((0, C_PAD - w1.shape[0]), (0, 0)))
    fused_w[0] = w1

    # Final Conv1d output padded to a multiple of 128 lanes.
    out_pad = max(128, _round_up(out_dim, 128))
    wo = jnp.pad(w3, ((0, 0), (0, out_pad - out_dim)))
    bo = jnp.pad(b3, ((0, 0), (0, out_pad - out_dim)))

    bias_pack = jnp.zeros((4, 256), jnp.float32)
    for i, b in enumerate(fused_b + [bo]):
        bias_pack = bias_pack.at[i, : b.shape[-1]].set(b[0])

    bf16 = lambda a: a.astype(jnp.bfloat16)
    return bf16(fused_w[0]), bf16(fused_w[1]), bf16(fused_w[2]), bf16(wo), bias_pack


# ---------------------------------------------------------------------------
# Module forward + pure-JAX reference
# ---------------------------------------------------------------------------
def positional_encoding_forward(pts1, pts2, params, out_dim, tm=256):
    if pts2 is None:
        pts2 = pts1
    g1 = ball_query_and_group(pts1, pts2, R1, NSAMPLE1)   # (B, M, 32, 6)
    g2 = ball_query_and_group(pts1, pts2, R2, NSAMPLE2)   # (B, M, 64, 6)

    # Branch fusion: duplicate branch-1 samples to NSAMPLE2 (max-pool is
    # unaffected by duplicates), stack branch channels, zero-pad to C_PAD.
    assert NSAMPLE2 % NSAMPLE1 == 0
    rep = NSAMPLE2 // NSAMPLE1
    g1p = jnp.tile(g1, (1, 1, rep, 1))                    # (B, M, 64, 6)
    g = jnp.concatenate([g1p, g2], axis=-1)               # (B, M, 64, 12)
    if g.shape[-1] < C_PAD:
        g = jnp.pad(g, ((0, 0), (0, 0), (0, 0), (0, C_PAD - g.shape[-1])))
    g = g.astype(jnp.bfloat16)

    kparams = pack_params_for_kernel(params, out_dim)
    return pe_pallas(g, kparams, out_dim, tm=tm)          # (B, M, out_dim)


def reference_forward(pts1, pts2, params, out_dim):
    if pts2 is None:
        pts2 = pts1
    g1 = ball_query_and_group(pts1, pts2, R1, NSAMPLE1)
    g2 = ball_query_and_group(pts1, pts2, R2, NSAMPLE2)

    def branch(g, layers):
        h = g
        for w, b in layers:
            h = jnp.maximum(jnp.einsum('bmsc,cd->bmsd', h, w) + b, 0.0)
        return jnp.max(h, axis=2)

    mlp1, mlp2, (w3, b3) = params
    feat = jnp.concatenate([branch(g1, mlp1), branch(g2, mlp2)], axis=-1)
    return jnp.einsum('bmc,cd->bmd', feat, w3) + b3


if __name__ == "__main__":
    key = jax.random.PRNGKey(0)
    kpts, kp = jax.random.split(key)

    B, N, out_dim = 2, 16, 32
    pts1 = jax.random.uniform(kpts, (B, N, 3), jnp.float32) * 0.3  # pts2 defaults to pts1
    params = init_params(kp, out_dim)

    out = positional_encoding_forward(pts1, None, params, out_dim)
    out = jax.block_until_ready(out)

    ref = reference_forward(pts1, None, params, out_dim)
    assert out.shape == (B, N, out_dim)
    assert bool(jnp.all(jnp.isfinite(out)))
    # bf16 compute vs f32 reference: compare against the output scale.
    scale = float(jnp.max(jnp.abs(ref))) + 1e-6
    err = float(jnp.max(jnp.abs(out - ref)))
    assert err <= 0.03 * scale, f"max abs err {err:.4g} vs scale {scale:.4g}"
    print("KERNEL_OK")
</pallas_src>

<mosaic_0001>
module attributes {stable_mosaic.version = 11 : i64} {
  func.func @_pe_kernel(%arg0: i32, %arg1: i32, %arg2: memref<1x16x64x16xbf16, #tpu.memory_space<vmem>>, %arg3: memref<16x64xbf16, #tpu.memory_space<vmem>>, %arg4: memref<64x128xbf16, #tpu.memory_space<vmem>>, %arg5: memref<128x256xbf16, #tpu.memory_space<vmem>>, %arg6: memref<256x128xbf16, #tpu.memory_space<vmem>>, %arg7: memref<4x256xf32, #tpu.memory_space<vmem>>, %arg8: memref<1x16x128xf32, #tpu.memory_space<vmem>>) attributes {dimension_semantics = [#tpu.dimension_semantics<parallel>, #tpu.dimension_semantics<parallel>], iteration_bounds = array<i64: 2, 1>, scalar_prefetch = 0 : i64, scratch_operands = 0 : i64, tpu.core_type = #tpu.core_type<tc>, window_params = [{transform_indices = @transform_0, window_bounds = array<i64: 1, 16, 64, 16>}, {pipeline_mode = #tpu.pipeline_mode<synchronous>, transform_indices = @transform_1, window_bounds = array<i64: 16, 64>}, {pipeline_mode = #tpu.pipeline_mode<synchronous>, transform_indices = @transform_2, window_bounds = array<i64: 64, 128>}, {pipeline_mode = #tpu.pipeline_mode<synchronous>, transform_indices = @transform_3, window_bounds = array<i64: 128, 256>}, {pipeline_mode = #tpu.pipeline_mode<synchronous>, transform_indices = @transform_4, window_bounds = array<i64: 256, 128>}, {pipeline_mode = #tpu.pipeline_mode<synchronous>, transform_indices = @transform_5, window_bounds = array<i64: 4, 256>}, {transform_indices = @transform_6, window_bounds = array<i64: 1, 16, 128>}]} {
    %c0 = arith.constant 0 : index
    %c0_0 = arith.constant 0 : index
    %0 = vector.load %arg7[%c0, %c0_0] : memref<4x256xf32, #tpu.memory_space<vmem>>, vector<1x64xf32>
    %c1 = arith.constant 1 : index
    %c0_1 = arith.constant 0 : index
    %1 = vector.load %arg7[%c1, %c0_1] : memref<4x256xf32, #tpu.memory_space<vmem>>, vector<1x128xf32>
    %c2 = arith.constant 2 : index
    %c0_2 = arith.constant 0 : index
    %2 = vector.load %arg7[%c2, %c0_2] : memref<4x256xf32, #tpu.memory_space<vmem>>, vector<1x256xf32>
    %c3 = arith.constant 3 : index
    %c0_3 = arith.constant 0 : index
    %3 = vector.load %arg7[%c3, %c0_3] : memref<4x256xf32, #tpu.memory_space<vmem>>, vector<1x128xf32>
    %c0_4 = arith.constant 0 : index
    %c0_5 = arith.constant 0 : index
    %4 = vector.load %arg3[%c0_4, %c0_5] : memref<16x64xbf16, #tpu.memory_space<vmem>>, vector<16x64xbf16>
    %c0_6 = arith.constant 0 : index
    %c0_7 = arith.constant 0 : index
    %5 = vector.load %arg4[%c0_6, %c0_7] : memref<64x128xbf16, #tpu.memory_space<vmem>>, vector<64x128xbf16>
    %c0_8 = arith.constant 0 : index
    %c0_9 = arith.constant 0 : index
    %6 = vector.load %arg5[%c0_8, %c0_9] : memref<128x256xbf16, #tpu.memory_space<vmem>>, vector<128x256xbf16>
    %cst = arith.constant 0.000000e+00 : f32
    %7 = vector.broadcast %cst : f32 to vector<16x256xf32>
    %c0_10 = arith.constant 0 : index
    %c0_11 = arith.constant 0 : index
    %c0_12 = arith.constant 0 : index
    %c0_13 = arith.constant 0 : index
    %8 = vector.load %arg2[%c0_10, %c0_11, %c0_12, %c0_13] : memref<1x16x64x16xbf16, #tpu.memory_space<vmem>>, vector<1x16x16x16xbf16>
    %9 = vector.shape_cast %8 : vector<1x16x16x16xbf16> to vector<16x16x16xbf16>
    %10 = vector.shape_cast %9 : vector<16x16x16xbf16> to vector<256x16xbf16>
    %cst_14 = arith.constant dense<0.000000e+00> : vector<256x64xf32>
    %11 = tpu.matmul %10, %4, %cst_14 {dimension_numbers = #tpu.dot_dimension_numbers<[1], [0], [0], [1], [0, 0, 1, 1], [], []>} : vector<256x16xbf16>, vector<16x64xbf16>, vector<256x64xf32> -> vector<256x64xf32>
    %12 = vector.broadcast %0 : vector<1x64xf32> to vector<256x64xf32>
    %13 = arith.addf %11, %12 : vector<256x64xf32>
    %cst_15 = arith.constant 0.000000e+00 : f32
    %14 = vector.broadcast %cst_15 : f32 to vector<256x64xf32>
    %15 = arith.maximumf %13, %14 : vector<256x64xf32>
    %16 = arith.truncf %15 : vector<256x64xf32> to vector<256x64xbf16>
    %cst_16 = arith.constant dense<0.000000e+00> : vector<256x128xf32>
    %17 = tpu.matmul %16, %5, %cst_16 {dimension_numbers = #tpu.dot_dimension_numbers<[1], [0], [0], [1], [0, 0, 1, 1], [], []>} : vector<256x64xbf16>, vector<64x128xbf16>, vector<256x128xf32> -> vector<256x128xf32>
    %18 = vector.broadcast %1 : vector<1x128xf32> to vector<256x128xf32>
    %19 = arith.addf %17, %18 : vector<256x128xf32>
    %cst_17 = arith.constant 0.000000e+00 : f32
    %20 = vector.broadcast %cst_17 : f32 to vector<256x128xf32>
    %21 = arith.maximumf %19, %20 : vector<256x128xf32>
    %22 = arith.truncf %21 : vector<256x128xf32> to vector<256x128xbf16>
    %cst_18 = arith.constant dense<0.000000e+00> : vector<256x256xf32>
    %23 = tpu.matmul %22, %6, %cst_18 {dimension_numbers = #tpu.dot_dimension_numbers<[1], [0], [0], [1], [0, 0, 1, 1], [], []>} : vector<256x128xbf16>, vector<128x256xbf16>, vector<256x256xf32> -> vector<256x256xf32>
    %24 = vector.broadcast %2 : vector<1x256xf32> to vector<256x256xf32>
    %25 = arith.addf %23, %24 : vector<256x256xf32>
    %cst_19 = arith.constant 0.000000e+00 : f32
    %26 = vector.broadcast %cst_19 : f32 to vector<256x256xf32>
    %27 = arith.maximumf %25, %26 : vector<256x256xf32>
    %28 = vector.shape_cast %27 : vector<256x256xf32> to vector<16x16x256xf32>
    %cst_20 = arith.constant dense<0xFF800000> : vector<16x256xf32>
    %29 = vector.multi_reduction <maximumf>, %28, %cst_20 [1] : vector<16x16x256xf32> to vector<16x256xf32>
    %30 = arith.maximumf %7, %29 : vector<16x256xf32>
    %c0_21 = arith.constant 0 : index
    %c0_22 = arith.constant 0 : index
    %c16 = arith.constant 16 : index
    %c0_23 = arith.constant 0 : index
    %31 = vector.load %arg2[%c0_21, %c0_22, %c16, %c0_23] : memref<1x16x64x16xbf16, #tpu.memory_space<vmem>>, vector<1x16x16x16xbf16>
    %32 = vector.shape_cast %31 : vector<1x16x16x16xbf16> to vector<16x16x16xbf16>
    %33 = vector.shape_cast %32 : vector<16x16x16xbf16> to vector<256x16xbf16>
    %cst_24 = arith.constant dense<0.000000e+00> : vector<256x64xf32>
    %34 = tpu.matmul %33, %4, %cst_24 {dimension_numbers = #tpu.dot_dimension_numbers<[1], [0], [0], [1], [0, 0, 1, 1], [], []>} : vector<256x16xbf16>, vector<16x64xbf16>, vector<256x64xf32> -> vector<256x64xf32>
    %35 = vector.broadcast %0 : vector<1x64xf32> to vector<256x64xf32>
    %36 = arith.addf %34, %35 : vector<256x64xf32>
    %cst_25 = arith.constant 0.000000e+00 : f32
    %37 = vector.broadcast %cst_25 : f32 to vector<256x64xf32>
    %38 = arith.maximumf %36, %37 : vector<256x64xf32>
    %39 = arith.truncf %38 : vector<256x64xf32> to vector<256x64xbf16>
    %cst_26 = arith.constant dense<0.000000e+00> : vector<256x128xf32>
    %40 = tpu.matmul %39, %5, %cst_26 {dimension_numbers = #tpu.dot_dimension_numbers<[1], [0], [0], [1], [0, 0, 1, 1], [], []>} : vector<256x64xbf16>, vector<64x128xbf16>, vector<256x128xf32> -> vector<256x128xf32>
    %41 = vector.broadcast %1 : vector<1x128xf32> to vector<256x128xf32>
    %42 = arith.addf %40, %41 : vector<256x128xf32>
    %cst_27 = arith.constant 0.000000e+00 : f32
    %43 = vector.broadcast %cst_27 : f32 to vector<256x128xf32>
    %44 = arith.maximumf %42, %43 : vector<256x128xf32>
    %45 = arith.truncf %44 : vector<256x128xf32> to vector<256x128xbf16>
    %cst_28 = arith.constant dense<0.000000e+00> : vector<256x256xf32>
    %46 = tpu.matmul %45, %6, %cst_28 {dimension_numbers = #tpu.dot_dimension_numbers<[1], [0], [0], [1], [0, 0, 1, 1], [], []>} : vector<256x128xbf16>, vector<128x256xbf16>, vector<256x256xf32> -> vector<256x256xf32>
    %47 = vector.broadcast %2 : vector<1x256xf32> to vector<256x256xf32>
    %48 = arith.addf %46, %47 : vector<256x256xf32>
    %cst_29 = arith.constant 0.000000e+00 : f32
    %49 = vector.broadcast %cst_29 : f32 to vector<256x256xf32>
    %50 = arith.maximumf %48, %49 : vector<256x256xf32>
    %51 = vector.shape_cast %50 : vector<256x256xf32> to vector<16x16x256xf32>
    %cst_30 = arith.constant dense<0xFF800000> : vector<16x256xf32>
    %52 = vector.multi_reduction <maximumf>, %51, %cst_30 [1] : vector<16x16x256xf32> to vector<16x256xf32>
    %53 = arith.maximumf %30, %52 : vector<16x256xf32>
    %c0_31 = arith.constant 0 : index
    %c0_32 = arith.constant 0 : index
    %c32 = arith.constant 32 : index
    %c0_33 = arith.constant 0 : index
    %54 = vector.load %arg2[%c0_31, %c0_32, %c32, %c0_33] : memref<1x16x64x16xbf16, #tpu.memory_space<vmem>>, vector<1x16x16x16xbf16>
    %55 = vector.shape_cast %54 : vector<1x16x16x16xbf16> to vector<16x16x16xbf16>
    %56 = vector.shape_cast %55 : vector<16x16x16xbf16> to vector<256x16xbf16>
    %cst_34 = arith.constant dense<0.000000e+00> : vector<256x64xf32>
    %57 = tpu.matmul %56, %4, %cst_34 {dimension_numbers = #tpu.dot_dimension_numbers<[1], [0], [0], [1], [0, 0, 1, 1], [], []>} : vector<256x16xbf16>, vector<16x64xbf16>, vector<256x64xf32> -> vector<256x64xf32>
    %58 = vector.broadcast %0 : vector<1x64xf32> to vector<256x64xf32>
    %59 = arith.addf %57, %58 : vector<256x64xf32>
    %cst_35 = arith.constant 0.000000e+00 : f32
    %60 = vector.broadcast %cst_35 : f32 to vector<256x64xf32>
    %61 = arith.maximumf %59, %60 : vector<256x64xf32>
    %62 = arith.truncf %61 : vector<256x64xf32> to vector<256x64xbf16>
    %cst_36 = arith.constant dense<0.000000e+00> : vector<256x128xf32>
    %63 = tpu.matmul %62, %5, %cst_36 {dimension_numbers = #tpu.dot_dimension_numbers<[1], [0], [0], [1], [0, 0, 1, 1], [], []>} : vector<256x64xbf16>, vector<64x128xbf16>, vector<256x128xf32> -> vector<256x128xf32>
    %64 = vector.broadcast %1 : vector<1x128xf32> to vector<256x128xf32>
    %65 = arith.addf %63, %64 : vector<256x128xf32>
    %cst_37 = arith.constant 0.000000e+00 : f32
    %66 = vector.broadcast %cst_37 : f32 to vector<256x128xf32>
    %67 = arith.maximumf %65, %66 : vector<256x128xf32>
    %68 = arith.truncf %67 : vector<256x128xf32> to vector<256x128xbf16>
    %cst_38 = arith.constant dense<0.000000e+00> : vector<256x256xf32>
    %69 = tpu.matmul %68, %6, %cst_38 {dimension_numbers = #tpu.dot_dimension_numbers<[1], [0], [0], [1], [0, 0, 1, 1], [], []>} : vector<256x128xbf16>, vector<128x256xbf16>, vector<256x256xf32> -> vector<256x256xf32>
    %70 = vector.broadcast %2 : vector<1x256xf32> to vector<256x256xf32>
    %71 = arith.addf %69, %70 : vector<256x256xf32>
    %cst_39 = arith.constant 0.000000e+00 : f32
    %72 = vector.broadcast %cst_39 : f32 to vector<256x256xf32>
    %73 = arith.maximumf %71, %72 : vector<256x256xf32>
    %74 = vector.shape_cast %73 : vector<256x256xf32> to vector<16x16x256xf32>
    %cst_40 = arith.constant dense<0xFF800000> : vector<16x256xf32>
    %75 = vector.multi_reduction <maximumf>, %74, %cst_40 [1] : vector<16x16x256xf32> to vector<16x256xf32>
    %76 = arith.maximumf %53, %75 : vector<16x256xf32>
    %c0_41 = arith.constant 0 : index
    %c0_42 = arith.constant 0 : index
    %c48 = arith.constant 48 : index
    %c0_43 = arith.constant 0 : index
    %77 = vector.load %arg2[%c0_41, %c0_42, %c48, %c0_43] : memref<1x16x64x16xbf16, #tpu.memory_space<vmem>>, vector<1x16x16x16xbf16>
    %78 = vector.shape_cast %77 : vector<1x16x16x16xbf16> to vector<16x16x16xbf16>
    %79 = vector.shape_cast %78 : vector<16x16x16xbf16> to vector<256x16xbf16>
    %cst_44 = arith.constant dense<0.000000e+00> : vector<256x64xf32>
    %80 = tpu.matmul %79, %4, %cst_44 {dimension_numbers = #tpu.dot_dimension_numbers<[1], [0], [0], [1], [0, 0, 1, 1], [], []>} : vector<256x16xbf16>, vector<16x64xbf16>, vector<256x64xf32> -> vector<256x64xf32>
    %81 = vector.broadcast %0 : vector<1x64xf32> to vector<256x64xf32>
    %82 = arith.addf %80, %81 : vector<256x64xf32>
    %cst_45 = arith.constant 0.000000e+00 : f32
    %83 = vector.broadcast %cst_45 : f32 to vector<256x64xf32>
    %84 = arith.maximumf %82, %83 : vector<256x64xf32>
    %85 = arith.truncf %84 : vector<256x64xf32> to vector<256x64xbf16>
    %cst_46 = arith.constant dense<0.000000e+00> : vector<256x128xf32>
    %86 = tpu.matmul %85, %5, %cst_46 {dimension_numbers = #tpu.dot_dimension_numbers<[1], [0], [0], [1], [0, 0, 1, 1], [], []>} : vector<256x64xbf16>, vector<64x128xbf16>, vector<256x128xf32> -> vector<256x128xf32>
    %87 = vector.broadcast %1 : vector<1x128xf32> to vector<256x128xf32>
    %88 = arith.addf %86, %87 : vector<256x128xf32>
    %cst_47 = arith.constant 0.000000e+00 : f32
    %89 = vector.broadcast %cst_47 : f32 to vector<256x128xf32>
    %90 = arith.maximumf %88, %89 : vector<256x128xf32>
    %91 = arith.truncf %90 : vector<256x128xf32> to vector<256x128xbf16>
    %cst_48 = arith.constant dense<0.000000e+00> : vector<256x256xf32>
    %92 = tpu.matmul %91, %6, %cst_48 {dimension_numbers = #tpu.dot_dimension_numbers<[1], [0], [0], [1], [0, 0, 1, 1], [], []>} : vector<256x128xbf16>, vector<128x256xbf16>, vector<256x256xf32> -> vector<256x256xf32>
    %93 = vector.broadcast %2 : vector<1x256xf32> to vector<256x256xf32>
    %94 = arith.addf %92, %93 : vector<256x256xf32>
    %cst_49 = arith.constant 0.000000e+00 : f32
    %95 = vector.broadcast %cst_49 : f32 to vector<256x256xf32>
    %96 = arith.maximumf %94, %95 : vector<256x256xf32>
    %97 = vector.shape_cast %96 : vector<256x256xf32> to vector<16x16x256xf32>
    %cst_50 = arith.constant dense<0xFF800000> : vector<16x256xf32>
    %98 = vector.multi_reduction <maximumf>, %97, %cst_50 [1] : vector<16x16x256xf32> to vector<16x256xf32>
    %99 = arith.maximumf %76, %98 : vector<16x256xf32>
    %100 = arith.truncf %99 : vector<16x256xf32> to vector<16x256xbf16>
    %c0_51 = arith.constant 0 : index
    %c0_52 = arith.constant 0 : index
    %101 = vector.load %arg6[%c0_51, %c0_52] : memref<256x128xbf16, #tpu.memory_space<vmem>>, vector<256x128xbf16>
    %cst_53 = arith.constant dense<0.000000e+00> : vector<16x128xf32>
    %102 = tpu.matmul %100, %101, %cst_53 {dimension_numbers = #tpu.dot_dimension_numbers<[1], [0], [0], [1], [0, 0, 1, 1], [], []>} : vector<16x256xbf16>, vector<256x128xbf16>, vector<16x128xf32> -> vector<16x128xf32>
    %103 = vector.broadcast %3 : vector<1x128xf32> to vector<16x128xf32>
    %104 = arith.addf %102, %103 : vector<16x128xf32>
    %c0_54 = arith.constant 0 : index
    %c0_55 = arith.constant 0 : index
    %c0_56 = arith.constant 0 : index
    %105 = vector.load %arg8[%c0_54, %c0_55, %c0_56] : memref<1x16x128xf32, #tpu.memory_space<vmem>>, vector<1x16x128xf32>
    %106 = vector.shape_cast %105 : vector<1x16x128xf32> to vector<16x128xf32>
    %107 = vector.shape_cast %104 : vector<16x128xf32> to vector<1x16x128xf32>
    tpu.vector_store %arg8[%c0_54, %c0_55, %c0_56], %107 {strides = array<i32>} : memref<1x16x128xf32, #tpu.memory_space<vmem>>, vector<1x16x128xf32>,
    return
  }
  func.func @transform_0(%arg0: i32, %arg1: i32) -> (i32, i32, i32, i32) {
    %c0_i32 = arith.constant 0 : i32
    %c0_i32_0 = arith.constant 0 : i32
    %c0_i32_1 = arith.constant 0 : i32
    return %arg0, %arg1, %c0_i32, %c0_i32_0 : i32, i32, i32, i32
  }
  func.func @transform_1(%arg0: i32, %arg1: i32) -> (i32, i32) {
    %c0_i32 = arith.constant 0 : i32
    %c0_i32_0 = arith.constant 0 : i32
    %c0_i32_1 = arith.constant 0 : i32
    return %c0_i32, %c0_i32_0 : i32, i32
  }
  func.func @transform_2(%arg0: i32, %arg1: i32) -> (i32, i32) {
    %c0_i32 = arith.constant 0 : i32
    %c0_i32_0 = arith.constant 0 : i32
    %c0_i32_1 = arith.constant 0 : i32
    return %c0_i32, %c0_i32_0 : i32, i32
  }
  func.func @transform_3(%arg0: i32, %arg1: i32) -> (i32, i32) {
    %c0_i32 = arith.constant 0 : i32
    %c0_i32_0 = arith.constant 0 : i32
    %c0_i32_1 = arith.constant 0 : i32
    return %c0_i32, %c0_i32_0 : i32, i32
  }
  func.func @transform_4(%arg0: i32, %arg1: i32) -> (i32, i32) {
    %c0_i32 = arith.constant 0 : i32
    %c0_i32_0 = arith.constant 0 : i32
    %c0_i32_1 = arith.constant 0 : i32
    return %c0_i32, %c0_i32_0 : i32, i32
  }
  func.func @transform_5(%arg0: i32, %arg1: i32) -> (i32, i32) {
    %c0_i32 = arith.constant 0 : i32
    %c0_i32_0 = arith.constant 0 : i32
    %c0_i32_1 = arith.constant 0 : i32
    return %c0_i32, %c0_i32_0 : i32, i32
  }
  func.func @transform_6(%arg0: i32, %arg1: i32) -> (i32, i32, i32) {
    %c0_i32 = arith.constant 0 : i32
    %c0_i32_0 = arith.constant 0 : i32
    return %arg0, %arg1, %c0_i32 : i32, i32, i32
  }
}

</mosaic_0001>

<bundles_post_ra>
// kernel: tpu_custom_call.1
= control target key start
LH: loop header
LB: loop body
LE: loop exit
PB: predicated region body
PF: predicated region fallthrough
CT: control target
= control target key end

     0   :  { %11 = vsyncpa [#allocation3], 0  ;;  %s7181_s0 = inlined_call_operand.vmem [shape: bf16[2,16,64,16], index: 0, kind: input, shape index: {}]   ;;  %s7182_s1 = inlined_call_operand.vmem [shape: bf16[16,64], index: 1, kind: input, shape index: {}]   ;;  %s7183_s2 = inlined_call_operand.vmem [shape: bf16[64,128], index: 2, kind: input, shape index: {}]   ;;  %s7184_s3 = inlined_call_operand.vmem [shape: bf16[128,256], index: 3, kind: input, shape index: {}]   ;;  %s7185_s4 = inlined_call_operand.vmem [shape: bf16[256,128], index: 4, kind: input, shape index: {}]   ;;  %s7186_s5 = inlined_call_operand.vmem [shape: f32[4,256], index: 5, kind: input, shape index: {}]   ;;  %s7187_s6 = inlined_call_operand.hbm [shape: f32[2,16,128], index: 6, kind: output, shape index: {}]  }
   0x1   :  { %13 = vsyncpa [#allocation3 + $0x1], 0  ;;  %s5584_s21 = smov 0   ;;  %s5586_s22 = smov 0  }
   0x2   :  { %s5588_s23 = smov 0   ;;  %s5590_s24 = smov 0  }
   0x3   :  { %s5592_s25 = smov 0   ;;  %s5594_s26 = smov 0  }
   0x4 LB: > { %s4749_s27 = sadd.s32 4294967295, %s5545_s26   ;;  %s4750_s28 = sadd.s32 4294967294, %s5545_s26   ;;  %s5545_s26 = sphi %s5594_s26, %s19_s26   ;;  %s5541_s25 = sphi %s5592_s25, %s7307_s25   ;;  %s5537_s24 = sphi %s5590_s24, %s7306_s24   ;;  %s5533_s23 = sphi %s5588_s23, %s7305_s23   ;;  %s5529_s22 = sphi %s5586_s22, %s7304_s22   ;;  %s5525_s21 = sphi %s5584_s21, %s7303_s21  }
   0x5   : > { %s31_s29 = sadd.s32 1, %s5541_s25  ;;  %s173_s30 = sadd.s32 1, %s5533_s23 }
   0x6   : > { %p33_p0 = scmp.ge.s32.totalorder %s31_s29, 2  ;;  %p183_p1 = scmp.ne.s32.totalorder %s5533_s23, %s5529_s22 }
   0x7   : > { %p184_p2 = scmp.eq.s32.totalorder %s4749_s27, 1  ;;  %p189_p3 = scmp.ne.s32.totalorder %s5529_s22, %s5525_s21 }
   0x8   : > { %s7309_s29 = smov (%p33_p0, %s31_s29), 0  ;;  %p190_p5 = scmp.eq.s32.totalorder %s4750_s28, 1 }
   0x9   : > { %p5624_p4 = por %p184_p2, %p183_p1  ;;  %s168_s8 = ssub.s32 %s5541_s25, %s7309_s29 }
   0xa   : > { %p4753_p6 = scmp.ge.s32.totalorder %s5545_s26, 1  ;;  %p171_p7 = scmp.eq.s32.totalorder %s168_s8, 0 }
   0xb   : > { %p5631_p8 = por %p190_p5, %p189_p3  ;;  %p237_p9 = scmp.lt.s32.totalorder %s5545_s26, 3 }
   0xc   : > { %s5637_s10 = scalar_select %p171_p7, %s5533_s23, %s173_s30  }
   0xd   : > { %p238_p10 = pnand %p4753_p6, %p237_p9 }
   0xf   : > { %241 = sbr.rel (%p238_p10) target bundleno = 1625 (0x659), region = 44 }
  0x14   : > { %v5642_v0 = vld [vmem:[%s7182_s1] sm:$0xff]  ;;  %p273_p11 = scmp.lt.s32.totalorder %s5537_s24, 1  ;;  %vm435_vm0 = vcmask 130048   ;;  %v5669_v7 = vld [vmem:[%s7183_s2 + $0x18] sm:$0xff]  ;;  %v5676_v9 = vld [vmem:[%s7183_s2 + $0x10] sm:$0xff]  ;;  %vm646_vm1 = vcmask 523264  }
  0x15   : > { %491 = vmatpush.bf16.msra.mxu0 %v5642_v0  ;;  %699 = vmatpush.bf16.msra.mxu1 %v5669_v7  ;;  %v5683_v10 = vld [vmem:[%s7183_s2 + $0x8] sm:$0xff]  ;;  %v5689_v11 = vld [vmem:[%s7183_s2] sm:$0xff]  ;;  %v4932_v59 = vld [vmem:[%s7184_s3 + $0x70] sm:$0xf]  ;;  %vm4484_vm2 = vcmask 1041409   ;;  %vm4486_vm3 = vcmask 1042434  }
  0x16   : > { %s274_s13 = scalar_select %p273_p11, %s5537_s24, 1  ;;  %v5702_v15 = vld [vmem:[%s7186_s5] ss:$0 sm:$0xff]  ;;  %v5316_v60 = vld [vmem:[%s7184_s3 + $0x74] sm:$0xf0]  ;;  %vm4488_vm4 = vcmask 1043459  }
  0x17   : > { %v5315_v61 = vld [vmem:[%s7184_s3 + $0x74] sm:$0xf]  ;;  %v5745_v62 = vor.u32 %v5316_v60, %v4932_v59  ;;  %v4934_v63 = vld [vmem:[%s7184_s3 + $0x78] sm:$0xf0]  ;;  %v4878_v60 = vld [vmem:[%s7184_s3 + $0x8] sm:$0xf0] }
  0x18   : > { %s5295_s14 = sshll.u32 %s274_s13, 9  ;;  %vm4490_vm5 = vcmask 1044484   ;;  %vm4492_vm6 = vcmask 1045509   ;;  %vm4494_vm7 = vcmask 1046534   ;;  %vm4496_vm8 = vcmask 1047559   ;;  %s269_s12 = sand.u32 1, %s5529_s22  }
  0x19   : > { %1582 = vmatpush.bf16.msrb.mxu0 %v5642_v0  ;;  %s5651_s17 = scalar_lea.vmem %s7181_s0, %s5295_s14  ;;  %700 = vmatpush.bf16.msra.mxu1 %v5676_v9  ;;  %s4754_s15 = sshll.u32 %s269_s12, 4 }
  0x1a   : > { %v5317_v1 = vld [vmem:[%s5651_s17] sm:$0xff]  ;;  %917 = vmatpush.bf16.msra.mxu2 %v5745_v62  ;;  %s271_s16 = scalar_lea.vmem [#allocation2], %s4754_s15  ;;  %s4650_s30 = scalar_lea.sflag [#allocation3], %s269_s12 }
  0x1b   : > { %4826 = vmatmul.msk.bf16.vlgmr.msra.gmra.mxu0 %vm435_vm0, %v5317_v1  ;;  %v5318_v2 = vld [vmem:[%s5651_s17 + $0x20] sm:$0xff]  ;;  %s4664_s27 = sshll.u32 %s271_s16, 4  ;;  %s5487_s14 = scalar_lea.hbm %s7187_s6, 32  ;;  %s4665_s27 = int_to_ptr.vmem [resolvable:$true] %s4664_s27 }
  0x1c   : > { %v5319_v3 = vld [vmem:[%s5651_s17 + $0x40] sm:$0xff] }
  0x1d   : > { %2562 = vmatpush.bf16.msra.mxu0 %v5642_v0  ;;  %v5320_v4 = vld [vmem:[%s5651_s17 + $0x60] sm:$0xff]  ;;  %701 = vmatpush.bf16.msra.mxu1 %v5683_v10 }
  0x1e   : > { %v5321_v5 = vld [vmem:[%s5651_s17 + $0x80] sm:$0xff] }
  0x1f   : > { %v5322_v6 = vld [vmem:[%s5651_s17 + $0xa0] sm:$0xff] }
  0x20   : > { %v5323_v8 = vld [vmem:[%s5651_s17 + $0xc0] sm:$0xff] }
  0x21   : > { %702 = vmatpush.bf16.msra.mxu1 %v5689_v11  ;;  %v5324_v12 = vld [vmem:[%s5651_s17 + $0xe0] sm:$0xff] }
  0x22   : > { %v5325_v13 = vld [vmem:[%s5651_s17 + $0x100] sm:$0xff] }
  0x23   : > { %v5326_v22 = vld [vmem:[%s5651_s17 + $0x120] sm:$0xff] }
  0x24   : > { %v5327_v30 = vld [vmem:[%s5651_s17 + $0x140] sm:$0xff] }
  0x25   : > { %1764 = vmatpush.bf16.msrb.mxu1 %v5669_v7  ;;  %v5328_v38 = vld [vmem:[%s5651_s17 + $0x160] sm:$0xff] }
  0x26   : > { %v5329_v46 = vld [vmem:[%s5651_s17 + $0x180] sm:$0xff] }
  0x27   : > { %v5330_v54 = vld [vmem:[%s5651_s17 + $0x1a0] sm:$0xff] }
  0x29   : > { %1765 = vmatpush.bf16.msrb.mxu1 %v5676_v9 }
  0x2b   : > { %4827 = vmatmul.msk.bf16.gmra.mxu0 %vm435_vm0, %v5318_v2 }
  0x2d   : > { %1766 = vmatpush.bf16.msrb.mxu1 %v5683_v10 }
  0x31   : > { %1767 = vmatpush.bf16.msrb.mxu1 %v5689_v11 }
  0x3b   : > { %4828 = vmatmul.msk.bf16.gmra.mxu0 %vm435_vm0, %v5319_v3  ;;  %v5750_v3 = vor.u32 %v5315_v61, %v4934_v63 }
  0x3d   : > { %1006 = vmatpush.bf16.msra.mxu3 %v5750_v3 }
  0x4b   : > { %4829 = vmatmul.msk.bf16.gmra.mxu0 %vm435_vm0, %v5320_v4 }
  0x5b   : > { %4830 = vmatmul.msk.bf16.gmra.mxu0 %vm435_vm0, %v5321_v5  ;;  %v4924_v5 = vld [vmem:[%s7184_s3 + $0x60] sm:$0xf] }
  0x6b   : > { %4831 = vmatmul.msk.bf16.gmra.mxu0 %vm435_vm0, %v5322_v6  ;;  %v5314_v6 = vld [vmem:[%s7184_s3 + $0x64] sm:$0xf0] }
  0x7b   : > { %4832 = vmatmul.msk.bf16.gmra.mxu0 %vm435_vm0, %v5323_v8  ;;  %v5313_v8 = vld [vmem:[%s7184_s3 + $0x64] sm:$0xf] }
  0x8b   : > { %4833 = vmatmul.msk.bf16.gmra.mxu0 %vm435_vm0, %v5324_v12  ;;  %v5763_v12 = vor.u32 %v5314_v6, %v4924_v5 }
  0x8d   : > { %918 = vmatpush.bf16.msra.mxu2 %v5763_v12 }
  0x98   : > { %v493_v14 = vpop.f32.mrf.mxu0 }
  0x99   : > { %v494_v16 = vadd.f32 %v5702_v15, %v493_v14  ;;  %v5331_v14 = vld [vmem:[%s5651_s17 + $0x1c0] sm:$0xff] }
  0x9b   : > { %4834 = vmatmul.msk.bf16.gmra.mxu0 %vm435_vm0, %v5325_v13  ;;  %v573_v19 = vmax.f32 %v494_v16, 0.0  ;;  %v4926_v13 = vld [vmem:[%s7184_s3 + $0x68] sm:$0xf0] }
  0x9c   : > { %v5770_v16 = vor.u32 %v5313_v8, %v4926_v13  ;;  %v5333_v8 = vld [vmem:[%s5651_s17 + $0x8] sm:$0xff] }
  0x9e   : > { %1007 = vmatpush.bf16.msra.mxu3 %v5770_v16 }
  0xa0   : > { %v495_v17 = vpop.f32.mrf.mxu0 }
  0xa1   : > { %v496_v18 = vadd.f32 %v5702_v15, %v495_v17 }
  0xa3   : > { %v574_v20 = vmax.f32 %v496_v18, 0.0  ;;  %v4916_v18 = vld [vmem:[%s7184_s3 + $0x50] sm:$0xf] }
  0xa5   : > { %v605_v21 = vpack.c.bf16 %v574_v20, %v573_v19  ;;  %v5312_v19 = vld [vmem:[%s7184_s3 + $0x54] sm:$0xf0] }
  0xa6   : > { %v5780_v20 = vor.u32 %v5312_v19, %v4916_v18 }
  0xa7   : > { %4858 = vmatmul.msk.bf16.vlgmr.msra.gmra.mxu1 %vm646_vm1, %v605_v21  ;;  %v5311_v21 = vld [vmem:[%s7184_s3 + $0x54] sm:$0xf] }
  0xa8   : > { %v498_v23 = vpop.f32.mrf.mxu0  ;;  %2744 = vmatpush.bf16.msra.mxu1 %v5669_v7  ;;  %919 = vmatpush.bf16.msra.mxu2 %v5780_v20 }
  0xa9   : > { %v499_v24 = vadd.f32 %v5702_v15, %v498_v23 }
  0xab   : > { %4835 = vmatmul.msk.bf16.gmra.mxu0 %vm435_vm0, %v5326_v22  ;;  %v575_v27 = vmax.f32 %v499_v24, 0.0  ;;  %v4918_v22 = vld [vmem:[%s7184_s3 + $0x58] sm:$0xf0]  ;;  %v4908_v24 = vld [vmem:[%s7184_s3 + $0x40] sm:$0xf] }
  0xac   : > { %2745 = vmatpush.bf16.msra.mxu1 %v5676_v9  ;;  %v5789_v23 = vor.u32 %v5311_v21, %v4918_v22 }
  0xae   : > { %1008 = vmatpush.bf16.msra.mxu3 %v5789_v23 }
  0xb0   : > { %v500_v25 = vpop.f32.mrf.mxu0  ;;  %2746 = vmatpush.bf16.msra.mxu1 %v5683_v10 }
  0xb1   : > { %v501_v26 = vadd.f32 %v5702_v15, %v500_v25  ;;  %v5310_v25 = vld [vmem:[%s7184_s3 + $0x44] sm:$0xf0] }
  0xb3   : > { %v576_v28 = vmax.f32 %v501_v26, 0.0  ;;  %v5309_v26 = vld [vmem:[%s7184_s3 + $0x44] sm:$0xf] }
  0xb4   : > { %2747 = vmatpush.bf16.msra.mxu1 %v5689_v11 }
  0xb5   : > { %v606_v29 = vpack.c.bf16 %v576_v28, %v575_v27  ;;  %v5802_v27 = vor.u32 %v5310_v25, %v4908_v24  ;;  %v4910_v28 = vld [vmem:[%s7184_s3 + $0x48] sm:$0xf0] }
  0xb6   : > { %v5334_v25 = vld [vmem:[%s5651_s17 + $0x28] sm:$0xff] }
  0xb7   : > { %4859 = vmatmul.msk.bf16.gmra.mxu1 %vm646_vm1, %v606_v29  ;;  %920 = vmatpush.bf16.msra.mxu2 %v5802_v27 }
  0xb8   : > { %v503_v31 = vpop.f32.mrf.mxu0 }
  0xb9   : > { %v504_v32 = vadd.f32 %v5702_v15, %v503_v31 }
  0xbb   : > { %4836 = vmatmul.msk.bf16.gmra.mxu0 %vm435_vm0, %v5327_v30  ;;  %v577_v35 = vmax.f32 %v504_v32, 0.0  ;;  %v5808_v30 = vor.u32 %v5309_v26, %v4910_v28 }
  0xbd   : > { %1009 = vmatpush.bf16.msra.mxu3 %v5808_v30 }
  0xc0   : > { %v505_v33 = vpop.f32.mrf.mxu0 }
  0xc1   : > { %v506_v34 = vadd.f32 %v5702_v15, %v505_v33  ;;  %v4900_v33 = vld [vmem:[%s7184_s3 + $0x30] sm:$0xf] }
  0xc3   : > { %v578_v36 = vmax.f32 %v506_v34, 0.0  ;;  %v5308_v34 = vld [vmem:[%s7184_s3 + $0x34] sm:$0xf0] }
  0xc5   : > { %v607_v37 = vpack.c.bf16 %v578_v36, %v577_v35  ;;  %v5307_v35 = vld [vmem:[%s7184_s3 + $0x34] sm:$0xf]  ;;  %v5822_v36 = vor.u32 %v5308_v34, %v4900_v33 }
  0xc7   : > { %4860 = vmatmul.msk.bf16.gmra.mxu1 %vm646_vm1, %v607_v37  ;;  %v4902_v37 = vld [vmem:[%s7184_s3 + $0x38] sm:$0xf0]  ;;  %921 = vmatpush.bf16.msra.mxu2 %v5822_v36 }
  0xc8   : > { %v508_v39 = vpop.f32.mrf.mxu0 }
  0xc9   : > { %v509_v40 = vadd.f32 %v5702_v15, %v508_v39 }
  0xcb   : > { %4837 = vmatmul.msk.bf16.gmra.mxu0 %vm435_vm0, %v5328_v38  ;;  %v579_v43 = vmax.f32 %v509_v40, 0.0  ;;  %v5827_v40 = vor.u32 %v5307_v35, %v4902_v37 }
  0xcd   : > { %1010 = vmatpush.bf16.msra.mxu3 %v5827_v40 }
  0xd0   : > { %v510_v41 = vpop.f32.mrf.mxu0 }
  0xd1   : > { %v511_v42 = vadd.f32 %v5702_v15, %v510_v41 }
  0xd3   : > { %v580_v44 = vmax.f32 %v511_v42, 0.0  ;;  %v4892_v42 = vld [vmem:[%s7184_s3 + $0x20] sm:$0xf] }
  0xd5   : > { %v608_v45 = vpack.c.bf16 %v580_v44, %v579_v43  ;;  %v5306_v43 = vld [vmem:[%s7184_s3 + $0x24] sm:$0xf0]  ;;  %v5305_v44 = vld [vmem:[%s7184_s3 + $0x24] sm:$0xf] }
  0xd7   : > { %4861 = vmatmul.msk.bf16.gmra.mxu1 %vm646_vm1, %v608_v45  ;;  %v5840_v45 = vor.u32 %v5306_v43, %v4892_v42 }
  0xd8   : > { %v513_v47 = vpop.f32.mrf.mxu0 }
  0xd9   : > { %v514_v48 = vadd.f32 %v5702_v15, %v513_v47  ;;  %v5332_v47 = vld [vmem:[%s5651_s17 + $0x1e0] sm:$0xff]  ;;  %922 = vmatpush.bf16.msra.mxu2 %v5840_v45 }
  0xdb   : > { %4838 = vmatmul.msk.bf16.gmra.mxu0 %vm435_vm0, %v5329_v46  ;;  %v581_v51 = vmax.f32 %v514_v48, 0.0  ;;  %v4894_v46 = vld [vmem:[%s7184_s3 + $0x28] sm:$0xf0] }
  0xdc   : > { %v5847_v48 = vor.u32 %v5305_v44, %v4894_v46  ;;  %v5335_v44 = vld [vmem:[%s5651_s17 + $0x48] sm:$0xff] }
  0xde   : > { %1011 = vmatpush.bf16.msra.mxu3 %v5847_v48 }
  0xe0   : > { %v515_v49 = vpop.f32.mrf.mxu0 }
  0xe1   : > { %v516_v50 = vadd.f32 %v5702_v15, %v515_v49 }
  0xe3   : > { %v582_v52 = vmax.f32 %v516_v50, 0.0  ;;  %v4884_v50 = vld [vmem:[%s7184_s3 + $0x10] sm:$0xf] }
  0xe5   : > { %v609_v53 = vpack.c.bf16 %v582_v52, %v581_v51  ;;  %v5304_v51 = vld [vmem:[%s7184_s3 + $0x14] sm:$0xf0] }
  0xe6   : > { %v5857_v52 = vor.u32 %v5304_v51, %v4884_v50 }
  0xe7   : > { %4862 = vmatmul.msk.bf16.gmra.mxu1 %vm646_vm1, %v609_v53  ;;  %v5303_v53 = vld [vmem:[%s7184_s3 + $0x14] sm:$0xf] }
  0xe8   : > { %v518_v55 = vpop.f32.mrf.mxu0  ;;  %923 = vmatpush.bf16.msra.mxu2 %v5857_v52 }
  0xe9   : > { %v519_v56 = vadd.f32 %v5702_v15, %v518_v55 }
  0xeb   : > { %4839 = vmatmul.msk.bf16.gmra.mxu0 %vm435_vm0, %v5330_v54  ;;  %v583_v1 = vmax.f32 %v519_v56, 0.0  ;;  %v4886_v54 = vld [vmem:[%s7184_s3 + $0x18] sm:$0xf0]  ;;  %v4876_v56 = vld [vmem:[%s7184_s3] sm:$0xf] }
  0xec   : > { %v5866_v55 = vor.u32 %v5303_v53, %v4886_v54 }
  0xee   : > { %1012 = vmatpush.bf16.msra.mxu3 %v5866_v55 }
  0xf0   : > { %v520_v57 = vpop.f32.mrf.mxu0 }
  0xf1   : > { %v521_v58 = vadd.f32 %v5702_v15, %v520_v57  ;;  %v5302_v57 = vld [vmem:[%s7184_s3 + $0x4] sm:$0xf0] }
  0xf2   : > { %v5879_v59 = vor.u32 %v5302_v57, %v4876_v56 }
  0xf3   : > { %v584_v2 = vmax.f32 %v521_v58, 0.0  ;;  %v5301_v58 = vld [vmem:[%s7184_s3 + $0x4] sm:$0xf] }
  0xf4   : > { %v5885_v63 = vor.u32 %v5301_v58, %v4878_v60  ;;  %924 = vmatpush.bf16.msra.mxu2 %v5879_v59 }
  0xf5   : > { %v610_v4 = vpack.c.bf16 %v584_v2, %v583_v1 }
  0xf6   : > { %1013 = vmatpush.bf16.msra.mxu3 %v5885_v63 }
  0xf7   : > { %4863 = vmatmul.msk.bf16.gmra.mxu1 %vm646_vm1, %v610_v4 }
  0xf8   : > { %v523_v17 = vpop.f32.mrf.mxu0  ;;  %1897 = vmatpush.bf16.msrb.mxu2 %v5745_v62 }
  0xf9   : > { %v524_v29 = vadd.f32 %v5702_v15, %v523_v17 }
  0xfa   : > { %1986 = vmatpush.bf16.msrb.mxu3 %v5750_v3 }
  0xfb   : > { %4840 = vmatmul.msk.bf16.gmra.mxu0 %vm435_vm0, %v5331_v14  ;;  %v585_v38 = vmax.f32 %v524_v29, 0.0 }
  0xfc   : > { %1898 = vmatpush.bf16.msrb.mxu2 %v5763_v12 }
  0xfe   : > { %1987 = vmatpush.bf16.msrb.mxu3 %v5770_v16 }
 0x100   : > { %v525_v31 = vpop.f32.mrf.mxu0  ;;  %1899 = vmatpush.bf16.msrb.mxu2 %v5780_v20 }
 0x101   : > { %v526_v32 = vadd.f32 %v5702_v15, %v525_v31 }
 0x102   : > { %1988 = vmatpush.bf16.msrb.mxu3 %v5789_v23 }
 0x103   : > { %v586_v39 = vmax.f32 %v526_v32, 0.0 }
 0x104   : > { %1900 = vmatpush.bf16.msrb.mxu2 %v5802_v27 }
 0x105   : > { %v611_v41 = vpack.c.bf16 %v586_v39, %v585_v38 }
 0x106   : > { %1989 = vmatpush.bf16.msrb.mxu3 %v5808_v30 }
 0x107   : > { %4864 = vmatmul.msk.bf16.gmra.mxu1 %vm646_vm1, %v611_v41 }
 0x108   : > { %v528_v49 = vpop.f32.mrf.mxu0  ;;  %1901 = vmatpush.bf16.msrb.mxu2 %v5822_v36 }
 0x109   : > { %v529_v61 = vadd.f32 %v5702_v15, %v528_v49 }
 0x10a   : > { %1990 = vmatpush.bf16.msrb.mxu3 %v5827_v40 }
 0x10b   : > { %4841 = vmatmul.msk.bf16.gmra.mxu0 %vm435_vm0, %v5332_v47  ;;  %v587_v4 = vmax.f32 %v529_v61, 0.0 }
 0x10c   : > { %1902 = vmatpush.bf16.msrb.mxu2 %v5840_v45 }
 0x10e   : > { %1991 = vmatpush.bf16.msrb.mxu3 %v5847_v48 }
 0x110   : > { %v530_v1 = vpop.f32.mrf.mxu0  ;;  %1903 = vmatpush.bf16.msrb.mxu2 %v5857_v52 }
 0x111   : > { %v531_v2 = vadd.f32 %v5702_v15, %v530_v1 }
 0x112   : > { %1992 = vmatpush.bf16.msrb.mxu3 %v5866_v55 }
 0x113   : > { %v588_v5 = vmax.f32 %v531_v2, 0.0 }
 0x114   : > { %1904 = vmatpush.bf16.msrb.mxu2 %v5879_v59 }
 0x115   : > { %v612_v6 = vpack.c.bf16 %v588_v5, %v587_v4  ;;  %v5336_v4 = vld [vmem:[%s5651_s17 + $0x68] sm:$0xff] }
 0x116   : > { %1993 = vmatpush.bf16.msrb.mxu3 %v5885_v63 }
 0x117   : > { %4865 = vmatmul.msk.bf16.gmra.mxu1 %vm646_vm1, %v612_v6 }
 0x118   : > { %v533_v13 = vpop.f32.mrf.mxu0 }
 0x119   : > { %v534_v14 = vadd.f32 %v5702_v15, %v533_v13 }
 0x11b   : > { %5002 = vmatmul.msk.bf16.vlgmr.msrb.gmra.mxu0 %vm435_vm0, %v5333_v8  ;;  %v589_v19 = vmax.f32 %v534_v14, 0.0 }
 0x11c   : > { %3542 = vmatpush.bf16.msrb.mxu0 %v5642_v0  ;;  %v5911_v0 = vld [vmem:[%s7186_s5 + $0x1] ss:$0 sm:$0xff] }
 0x120   : > { %v535_v17 = vpop.f32.mrf.mxu0 }
 0x121   : > { %v536_v18 = vadd.f32 %v5702_v15, %v535_v17 }
 0x123   : > { %v590_v21 = vmax.f32 %v536_v18, 0.0 }
 0x124   : > { %v704_v22 = vpop.f32.mrf.mxu1 }
 0x125   : > { %v613_v24 = vpack.c.bf16 %v590_v21, %v589_v19  ;;  %v705_v28 = vadd.f32 %v5911_v0, %v704_v22 }
 0x127   : > { %4866 = vmatmul.msk.bf16.gmra.mxu1 %vm646_vm1, %v613_v24  ;;  %v784_v32 = vmax.f32 %v705_v28, 0.0 }
 0x128   : > { %v538_v26 = vpop.f32.mrf.mxu0 }
 0x129   : > { %v539_v33 = vadd.f32 %v5702_v15, %v538_v26 }
 0x12b   : > { %5003 = vmatmul.msk.bf16.gmra.mxu0 %vm435_vm0, %v5334_v25  ;;  %v591_v39 = vmax.f32 %v539_v33, 0.0 }
 0x12c   : > { %v706_v29 = vpop.f32.mrf.mxu1 }
 0x12d   : > { %v707_v31 = vadd.f32 %v5911_v0, %v706_v29  ;;  %v5337_v29 = vld [vmem:[%s5651_s17 + $0x88] sm:$0xff] }
 0x12f   : > { %v785_v34 = vmax.f32 %v707_v31, 0.0 }
 0x130   : > { %v540_v35 = vpop.f32.mrf.mxu0 }
 0x131   : > { %v541_v37 = vadd.f32 %v5702_v15, %v540_v35  ;;  %v816_v38 = vpack.c.bf16 %v785_v34, %v784_v32 }
 0x133   : > { %v592_v41 = vmax.f32 %v541_v37, 0.0  ;;  %925 = vmatmul.bf16.vlgmr.msra.gmra.mxu2 %v816_v38  ;;  %1014 = vmatmul.bf16.vlgmr.msra.gmra.mxu3 %v816_v38 }
 0x134   : > { %v709_v42 = vpop.f32.mrf.mxu1  ;;  %2877 = vmatpush.bf16.msra.mxu2 %v5745_v62  ;;  %2966 = vmatpush.bf16.msra.mxu3 %v5750_v3 }
 0x135   : > { %v614_v43 = vpack.c.bf16 %v592_v41, %v591_v39  ;;  %v710_v47 = vadd.f32 %v5911_v0, %v709_v42 }
 0x137   : > { %4867 = vmatmul.msk.bf16.gmra.mxu1 %vm646_vm1, %v614_v43  ;;  %v786_v51 = vmax.f32 %v710_v47, 0.0 }
 0x138   : > { %v543_v46 = vpop.f32.mrf.mxu0  ;;  %2878 = vmatpush.bf16.msra.mxu2 %v5763_v12  ;;  %2967 = vmatpush.bf16.msra.mxu3 %v5770_v16 }
 0x139   : > { %v544_v53 = vadd.f32 %v5702_v15, %v543_v46 }
 0x13b   : > { %5004 = vmatmul.msk.bf16.gmra.mxu0 %vm435_vm0, %v5335_v44  ;;  %v593_v60 = vmax.f32 %v544_v53, 0.0 }
 0x13c   : > { %v711_v49 = vpop.f32.mrf.mxu1  ;;  %2879 = vmatpush.bf16.msra.mxu2 %v5780_v20  ;;  %2968 = vmatpush.bf16.msra.mxu3 %v5789_v23 }
 0x13d   : > { %v712_v50 = vadd.f32 %v5911_v0, %v711_v49  ;;  %v5338_v49 = vld [vmem:[%s5651_s17 + $0xa8] sm:$0xff] }
 0x13f   : > { %v787_v54 = vmax.f32 %v712_v50, 0.0 }
 0x140   : > { %v545_v56 = vpop.f32.mrf.mxu0  ;;  %2880 = vmatpush.bf16.msra.mxu2 %v5802_v27  ;;  %2969 = vmatpush.bf16.msra.mxu3 %v5808_v30 }
 0x141   : > { %v546_v57 = vadd.f32 %v5702_v15, %v545_v56  ;;  %v817_v58 = vpack.c.bf16 %v787_v54, %v786_v51 }
 0x143   : > { %v594_v61 = vmax.f32 %v546_v57, 0.0  ;;  %930 = vmatmul.bf16.gmra.mxu2 %v817_v58  ;;  %1019 = vmatmul.bf16.gmra.mxu3 %v817_v58 }
 0x144   : > { %v714_v1 = vpop.f32.mrf.mxu1  ;;  %2881 = vmatpush.bf16.msra.mxu2 %v5822_v36  ;;  %2970 = vmatpush.bf16.msra.mxu3 %v5827_v40 }
 0x145   : > { %v615_v2 = vpack.c.bf16 %v594_v61, %v593_v60  ;;  %v715_v6 = vadd.f32 %v5911_v0, %v714_v1 }
 0x147   : > { %4868 = vmatmul.msk.bf16.gmra.mxu1 %vm646_vm1, %v615_v2  ;;  %v788_v14 = vmax.f32 %v715_v6, 0.0 }
 0x148   : > { %v548_v5 = vpop.f32.mrf.mxu0  ;;  %2882 = vmatpush.bf16.msra.mxu2 %v5840_v45  ;;  %2971 = vmatpush.bf16.msra.mxu3 %v5847_v48 }
 0x149   : > { %v549_v17 = vadd.f32 %v5702_v15, %v548_v5 }
 0x14b   : > { %5005 = vmatmul.msk.bf16.gmra.mxu0 %vm435_vm0, %v5336_v4  ;;  %v595_v24 = vmax.f32 %v549_v17, 0.0 }
 0x14c   : > { %v716_v8 = vpop.f32.mrf.mxu1  ;;  %2883 = vmatpush.bf16.msra.mxu2 %v5857_v52  ;;  %2972 = vmatpush.bf16.msra.mxu3 %v5866_v55 }
 0x14d   : > { %v717_v13 = vadd.f32 %v5911_v0, %v716_v8  ;;  %v5339_v8 = vld [vmem:[%s5651_s17 + $0xc8] sm:$0xff] }
 0x14f   : > { %v789_v18 = vmax.f32 %v717_v13, 0.0 }
 0x150   : > { %v550_v19 = vpop.f32.mrf.mxu0  ;;  %2884 = vmatpush.bf16.msra.mxu2 %v5879_v59  ;;  %2973 = vmatpush.bf16.msra.mxu3 %v5885_v63 }
 0x151   : > { %v551_v21 = vadd.f32 %v5702_v15, %v550_v19  ;;  %v818_v22 = vpack.c.bf16 %v789_v18, %v788_v14 }
 0x153   : > { %v596_v25 = vmax.f32 %v551_v21, 0.0  ;;  %935 = vmatmul.bf16.gmra.mxu2 %v818_v22  ;;  %1024 = vmatmul.bf16.gmra.mxu3 %v818_v22 }
 0x154   : > { %v719_v26 = vpop.f32.mrf.mxu1 }
 0x155   : > { %v616_v28 = vpack.c.bf16 %v596_v25, %v595_v24  ;;  %v720_v32 = vadd.f32 %v5911_v0, %v719_v26 }
 0x157   : > { %4869 = vmatmul.msk.bf16.gmra.mxu1 %vm646_vm1, %v616_v28  ;;  %v790_v35 = vmax.f32 %v720_v32, 0.0 }
 0x158   : > { %v553_v31 = vpop.f32.mrf.mxu0 }
 0x159   : > { %v554_v37 = vadd.f32 %v5702_v15, %v553_v31 }
 0x15b   : > { %5006 = vmatmul.msk.bf16.gmra.mxu0 %vm435_vm0, %v5337_v29  ;;  %v597_v43 = vmax.f32 %v554_v37, 0.0 }
 0x15c   : > { %v721_v33 = vpop.f32.mrf.mxu1 }
 0x15d   : > { %v722_v34 = vadd.f32 %v5911_v0, %v721_v33  ;;  %v5340_v33 = vld [vmem:[%s5651_s17 + $0xe8] sm:$0xff] }
 0x15f   : > { %v791_v38 = vmax.f32 %v722_v34, 0.0 }
 0x160   : > { %v555_v39 = vpop.f32.mrf.mxu0 }
 0x161   : > { %v556_v41 = vadd.f32 %v5702_v15, %v555_v39  ;;  %v819_v42 = vpack.c.bf16 %v791_v38, %v790_v35 }
 0x163   : > { %v598_v44 = vmax.f32 %v556_v41, 0.0  ;;  %940 = vmatmul.bf16.gmra.mxu2 %v819_v42  ;;  %1029 = vmatmul.bf16.gmra.mxu3 %v819_v42 }
 0x164   : > { %v724_v46 = vpop.f32.mrf.mxu1 }
 0x165   : > { %v617_v47 = vpack.c.bf16 %v598_v44, %v597_v43  ;;  %v725_v51 = vadd.f32 %v5911_v0, %v724_v46 }
 0x167   : > { %4870 = vmatmul.msk.bf16.gmra.mxu1 %vm646_vm1, %v617_v47  ;;  %v792_v56 = vmax.f32 %v725_v51, 0.0 }
 0x168   : > { %v558_v50 = vpop.f32.mrf.mxu0 }
 0x169   : > { %v559_v57 = vadd.f32 %v5702_v15, %v558_v50 }
 0x16b   : > { %5007 = vmatmul.msk.bf16.gmra.mxu0 %vm435_vm0, %v5338_v49  ;;  %v599_v2 = vmax.f32 %v559_v57, 0.0 }
 0x16c   : > { %v726_v53 = vpop.f32.mrf.mxu1 }
 0x16d   : > { %v727_v54 = vadd.f32 %v5911_v0, %v726_v53  ;;  %v5341_v53 = vld [vmem:[%s5651_s17 + $0x108] sm:$0xff] }
 0x16f   : > { %v793_v58 = vmax.f32 %v727_v54, 0.0 }
 0x170   : > { %v560_v60 = vpop.f32.mrf.mxu0 }
 0x171   : > { %v561_v61 = vadd.f32 %v5702_v15, %v560_v60  ;;  %v820_v1 = vpack.c.bf16 %v793_v58, %v792_v56 }
 0x173   : > { %v600_v4 = vmax.f32 %v561_v61, 0.0  ;;  %945 = vmatmul.bf16.gmra.mxu2 %v820_v1  ;;  %1034 = vmatmul.bf16.gmra.mxu3 %v820_v1 }
 0x174   : > { %v729_v5 = vpop.f32.mrf.mxu1 }
 0x175   : > { %v618_v6 = vpack.c.bf16 %v600_v4, %v599_v2  ;;  %v730_v14 = vadd.f32 %v5911_v0, %v729_v5 }
 0x177   : > { %4871 = vmatmul.msk.bf16.gmra.mxu1 %vm646_vm1, %v618_v6  ;;  %v794_v19 = vmax.f32 %v730_v14, 0.0 }
 0x178   : > { %v563_v13 = vpop.f32.mrf.mxu0 }
 0x179   : > { %v564_v21 = vadd.f32 %v5702_v15, %v563_v13 }
 0x17b   : > { %5008 = vmatmul.msk.bf16.gmra.mxu0 %vm435_vm0, %v5339_v8  ;;  %v601_v28 = vmax.f32 %v564_v21, 0.0 }
 0x17c   : > { %v731_v17 = vpop.f32.mrf.mxu1 }
 0x17d   : > { %v732_v18 = vadd.f32 %v5911_v0, %v731_v17  ;;  %v5342_v17 = vld [vmem:[%s5651_s17 + $0x128] sm:$0xff] }
 0x17f   : > { %v795_v22 = vmax.f32 %v732_v18, 0.0 }
 0x180   : > { %v565_v24 = vpop.f32.mrf.mxu0 }
 0x181   : > { %v566_v25 = vadd.f32 %v5702_v15, %v565_v24  ;;  %v821_v26 = vpack.c.bf16 %v795_v22, %v794_v19 }
 0x183   : > { %v602_v29 = vmax.f32 %v566_v25, 0.0  ;;  %950 = vmatmul.bf16.gmra.mxu2 %v821_v26  ;;  %1039 = vmatmul.bf16.gmra.mxu3 %v821_v26 }
 0x184   : > { %v734_v31 = vpop.f32.mrf.mxu1 }
 0x185   : > { %v619_v32 = vpack.c.bf16 %v602_v29, %v601_v28  ;;  %v735_v35 = vadd.f32 %v5911_v0, %v734_v31 }
 0x187   : > { %4872 = vmatmul.msk.bf16.gmra.mxu1 %vm646_vm1, %v619_v32  ;;  %v796_v39 = vmax.f32 %v735_v35, 0.0 }
 0x188   : > { %v568_v34 = vpop.f32.mrf.mxu0 }
 0x189   : > { %v569_v41 = vadd.f32 %v5702_v15, %v568_v34  ;;  %v4757_v34 = vld [vmem:[%s7186_s5 + $0x2] ss:$4 sm:$0x3] }
 0x18b   : > { %5009 = vmatmul.msk.bf16.gmra.mxu0 %vm435_vm0, %v5340_v33  ;;  %v603_v47 = vmax.f32 %v569_v41, 0.0 }
 0x18c   : > { %v736_v37 = vpop.f32.mrf.mxu1 }
 0x18d   : > { %v737_v38 = vadd.f32 %v5911_v0, %v736_v37 }
 0x18f   : > { %v797_v42 = vmax.f32 %v737_v38, 0.0  ;;  %v6005_v38 = vperm.slane %v4757_v34, 0 }
 0x190   : > { %v570_v43 = vpop.f32.mrf.mxu0 }
 0x191   : > { %v571_v44 = vadd.f32 %v5702_v15, %v570_v43  ;;  %v822_v46 = vpack.c.bf16 %v797_v42, %v796_v39  ;;  %v6007_v39 = vperm.slane %v4757_v34, 1 }
 0x193   : > { %v604_v49 = vmax.f32 %v571_v44, 0.0  ;;  %955 = vmatmul.bf16.gmra.mxu2 %v822_v46  ;;  %1044 = vmatmul.bf16.gmra.mxu3 %v822_v46 }
 0x194   : > { %v739_v50 = vpop.f32.mrf.mxu1 }
 0x195   : > { %v620_v51 = vpack.c.bf16 %v604_v49, %v603_v47  ;;  %v740_v56 = vadd.f32 %v5911_v0, %v739_v50 }
 0x197   : > { %4873 = vmatmul.msk.bf16.gmra.mxu1 %vm646_vm1, %v620_v51  ;;  %v798_v60 = vmax.f32 %v740_v56, 0.0 }
 0x198   : > { %v1584_v54 = vpop.f32.mrf.mxu0 }
 0x199   : > { %v1585_v61 = vadd.f32 %v5702_v15, %v1584_v54 }
 0x19b   : > { %5010 = vmatmul.msk.bf16.gmra.mxu0 %vm435_vm0, %v5341_v53  ;;  %v1664_v6 = vmax.f32 %v1585_v61, 0.0 }
 0x19c   : > { %v741_v57 = vpop.f32.mrf.mxu1 }
 0x19d   : > { %v742_v58 = vadd.f32 %v5911_v0, %v741_v57 }
 0x19f   : > { %v799_v1 = vmax.f32 %v742_v58, 0.0 }
 0x1a0   : > { %v1586_v2 = vpop.f32.mrf.mxu0 }
 0x1a1   : > { %v1587_v4 = vadd.f32 %v5702_v15, %v1586_v2  ;;  %v823_v5 = vpack.c.bf16 %v799_v1, %v798_v60 }
 0x1a3   : > { %v1665_v8 = vmax.f32 %v1587_v4, 0.0  ;;  %960 = vmatmul.bf16.gmra.mxu2 %v823_v5  ;;  %1049 = vmatmul.bf16.gmra.mxu3 %v823_v5 }
 0x1a4   : > { %v744_v13 = vpop.f32.mrf.mxu1 }
 0x1a5   : > { %v1696_v14 = vpack.c.bf16 %v1665_v8, %v1664_v6  ;;  %v745_v19 = vadd.f32 %v5911_v0, %v744_v13 }
 0x1a7   : > { %5018 = vmatmul.msk.bf16.vlgmr.msrb.gmra.mxu1 %vm646_vm1, %v1696_v14  ;;  %v800_v24 = vmax.f32 %v745_v19, 0.0 }
 0x1a8   : > { %v1589_v18 = vpop.f32.mrf.mxu0  ;;  %3724 = vmatpush.bf16.msrb.mxu1 %v5669_v7 }
 0x1a9   : > { %v1590_v25 = vadd.f32 %v5702_v15, %v1589_v18 }
 0x1ab   : > { %5011 = vmatmul.msk.bf16.gmra.mxu0 %vm435_vm0, %v5342_v17  ;;  %v1666_v31 = vmax.f32 %v1590_v25, 0.0 }
 0x1ac   : > { %v746_v21 = vpop.f32.mrf.mxu1  ;;  %3725 = vmatpush.bf16.msrb.mxu1 %v5676_v9 }
 0x1ad   : > { %v747_v22 = vadd.f32 %v5911_v0, %v746_v21  ;;  %v5344_v21 = vld [vmem:[%s5651_s17 + $0x168] sm:$0xff] }
 0x1af   : > { %v801_v26 = vmax.f32 %v747_v22, 0.0 }
 0x1b0   : > { %v1591_v28 = vpop.f32.mrf.mxu0  ;;  %3726 = vmatpush.bf16.msrb.mxu1 %v5683_v10  ;;  %v5343_v10 = vld [vmem:[%s5651_s17 + $0x148] sm:$0xff] }
 0x1b1   : > { %v1592_v29 = vadd.f32 %v5702_v15, %v1591_v28  ;;  %v824_v7 = vpack.c.bf16 %v801_v26, %v800_v24 }
 0x1b3   : > { %v1667_v32 = vmax.f32 %v1592_v29, 0.0  ;;  %965 = vmatmul.bf16.gmra.mxu2 %v824_v7  ;;  %1054 = vmatmul.bf16.gmra.mxu3 %v824_v7 }
 0x1b4   : > { %v749_v33 = vpop.f32.mrf.mxu1  ;;  %3727 = vmatpush.bf16.msrb.mxu1 %v5689_v11 }
 0x1b5   : > { %v1697_v9 = vpack.c.bf16 %v1667_v32, %v1666_v31  ;;  %v750_v42 = vadd.f32 %v5911_v0, %v749_v33 }
 0x1b6   : > { %v926_v35 = vpop.f32.mrf.mxu2  ;;  %v1015_v37 = vpop.f32.mrf.mxu3 }
 0x1b7   : > { %5019 = vmatmul.msk.bf16.gmra.mxu1 %vm646_vm1, %v1697_v9  ;;  %v927_v11 = vadd.f32 %v926_v35, %v6005_v38  ;;  %v1016_v43 = vadd.f32 %v1015_v37, %v6007_v39  ;;  %v802_v47 = vmax.f32 %v750_v42, 0.0 }
 0x1b8   : > { %v1594_v41 = vpop.f32.mrf.mxu0 }
 0x1b9   : > { %v1595_v51 = vadd.f32 %v5702_v15, %v1594_v41  ;;  %v1095_v57 = vmax.f32 %v927_v11, 0.0  ;;  %v1096_v58 = vmax.f32 %v1016_v43, 0.0 }
 0x1bb   : > { %5012 = vmatmul.msk.bf16.gmra.mxu0 %vm435_vm0, %v5343_v10  ;;  %v1668_v5 = vmax.f32 %v1595_v51, 0.0 }
 0x1bc   : > { %v751_v44 = vpop.f32.mrf.mxu1 }
 0x1bd   : > { %v752_v46 = vadd.f32 %v5911_v0, %v751_v44 }
 0x1be   : > { %v928_v49 = vpop.f32.mrf.mxu2  ;;  %v1017_v50 = vpop.f32.mrf.mxu3 }
 0x1bf   : > { %v803_v53 = vmax.f32 %v752_v46, 0.0  ;;  %v929_v54 = vadd.f32 %v928_v49, %v6005_v38  ;;  %v1018_v56 = vadd.f32 %v1017_v50, %v6007_v39 }
 0x1c0   : > { %v1596_v60 = vpop.f32.mrf.mxu0 }
 0x1c1   : > { %v1097_v61 = vmax.f32 %v929_v54, 0.0  ;;  %v1098_v1 = vmax.f32 %v1018_v56, 0.0  ;;  %v1597_v2 = vadd.f32 %v5702_v15, %v1596_v60  ;;  %v825_v4 = vpack.c.bf16 %v803_v53, %v802_v47 }
 0x1c3   : > { %v6018_v6 = vmax.f32 %v1095_v57, %v1097_v61  ;;  %v6020_v8 = vmax.f32 %v1096_v58, %v1098_v1  ;;  %v1669_v13 = vmax.f32 %v1597_v2, 0.0  ;;  %970 = vmatmul.bf16.gmra.mxu2 %v825_v4  ;;  %1059 = vmatmul.bf16.gmra.mxu3 %v825_v4  ;;  %v5345_v57 = vld [vmem:[%s5651_s17 + $0x188] sm:$0xff] }
 0x1c4   : > { %v754_v14 = vpop.f32.mrf.mxu1 }
 0x1c5   : > { %v1698_v17 = vpack.c.bf16 %v1669_v13, %v1668_v5  ;;  %v755_v24 = vadd.f32 %v5911_v0, %v754_v14 }
 0x1c6   : > { %v931_v18 = vpop.f32.mrf.mxu2  ;;  %v1020_v19 = vpop.f32.mrf.mxu3 }
 0x1c7   : > { %5020 = vmatmul.msk.bf16.gmra.mxu1 %vm646_vm1, %v1698_v17  ;;  %v932_v26 = vadd.f32 %v931_v18, %v6005_v38  ;;  %v1021_v29 = vadd.f32 %v1020_v19, %v6007_v39  ;;  %v804_v34 = vmax.f32 %v755_v24, 0.0 }
 0x1c8   : > { %v1599_v22 = vpop.f32.mrf.mxu0 }
 0x1c9   : > { %v1600_v32 = vadd.f32 %v5702_v15, %v1599_v22  ;;  %v1099_v10 = vmax.f32 %v932_v26, 0.0  ;;  %v1100_v11 = vmax.f32 %v1021_v29, 0.0 }
 0x1cb   : > { %5013 = vmatmul.msk.bf16.gmra.mxu0 %vm435_vm0, %v5344_v21  ;;  %v1670_v46 = vmax.f32 %v1600_v32, 0.0 }
 0x1cc   : > { %v756_v25 = vpop.f32.mrf.mxu1 }
 0x1cd   : > { %v757_v28 = vadd.f32 %v5911_v0, %v756_v25 }
 0x1ce   : > { %v933_v7 = vpop.f32.mrf.mxu2  ;;  %v1022_v31 = vpop.f32.mrf.mxu3 }
 0x1cf   : > { %v805_v33 = vmax.f32 %v757_v28, 0.0  ;;  %v934_v9 = vadd.f32 %v933_v7, %v6005_v38  ;;  %v1023_v35 = vadd.f32 %v1022_v31, %v6007_v39 }
 0x1d0   : > { %v1601_v37 = vpop.f32.mrf.mxu0 }
 0x1d1   : > { %v1101_v41 = vmax.f32 %v934_v9, 0.0  ;;  %v1602_v42 = vadd.f32 %v5702_v15, %v1601_v37  ;;  %v1102_v43 = vmax.f32 %v1023_v35, 0.0  ;;  %v826_v44 = vpack.c.bf16 %v805_v33, %v804_v34 }
 0x1d3   : > { %v6033_v47 = vmax.f32 %v1099_v10, %v1101_v41  ;;  %v1671_v49 = vmax.f32 %v1602_v42, 0.0  ;;  %v6035_v50 = vmax.f32 %v1100_v11, %v1102_v43  ;;  %975 = vmatmul.bf16.gmra.mxu2 %v826_v44  ;;  %1064 = vmatmul.bf16.gmra.mxu3 %v826_v44  ;;  %v5346_v41 = vld [vmem:[%s5651_s17 + $0x1a8] sm:$0xff] }
 0x1d4   : > { %v759_v51 = vpop.f32.mrf.mxu1 }
 0x1d5   : > { %v1699_v53 = vpack.c.bf16 %v1671_v49, %v1670_v46  ;;  %v760_v60 = vadd.f32 %v5911_v0, %v759_v51 }
 0x1d6   : > { %v936_v54 = vpop.f32.mrf.mxu2  ;;  %v1025_v56 = vpop.f32.mrf.mxu3 }
 0x1d7   : > { %5021 = vmatmul.msk.bf16.gmra.mxu1 %vm646_vm1, %v1699_v53  ;;  %v937_v61 = vadd.f32 %v936_v54, %v6005_v38  ;;  %v1026_v2 = vadd.f32 %v1025_v56, %v6007_v39  ;;  %v806_v21 = vmax.f32 %v760_v60, 0.0 }
 0x1d8   : > { %v1604_v58 = vpop.f32.mrf.mxu0 }
 0x1d9   : > { %v1605_v14 = vadd.f32 %v5702_v15, %v1604_v58  ;;  %v1103_v22 = vmax.f32 %v937_v61, 0.0  ;;  %v1104_v25 = vmax.f32 %v1026_v2, 0.0 }
 0x1db   : > { %5014 = vmatmul.msk.bf16.gmra.mxu0 %vm435_vm0, %v5345_v57  ;;  %v1672_v31 = vmax.f32 %v1605_v14, 0.0 }
 0x1dc   : > { %v761_v1 = vpop.f32.mrf.mxu1 }
 0x1dd   : > { %v762_v4 = vadd.f32 %v5911_v0, %v761_v1 }
 0x1de   : > { %v938_v5 = vpop.f32.mrf.mxu2  ;;  %v1027_v13 = vpop.f32.mrf.mxu3 }
 0x1df   : > { %v807_v17 = vmax.f32 %v762_v4, 0.0  ;;  %v939_v18 = vadd.f32 %v938_v5, %v6005_v38  ;;  %v1028_v19 = vadd.f32 %v1027_v13, %v6007_v39 }
 0x1e0   : > { %v1606_v24 = vpop.f32.mrf.mxu0 }
 0x1e1   : > { %v1105_v26 = vmax.f32 %v939_v18, 0.0  ;;  %v1106_v28 = vmax.f32 %v1028_v19, 0.0  ;;  %v1607_v29 = vadd.f32 %v5702_v15, %v1606_v24  ;;  %v827_v7 = vpack.c.bf16 %v807_v17, %v806_v21 }
 0x1e3   : > { %v6048_v32 = vmax.f32 %v1103_v22, %v1105_v26  ;;  %v6050_v33 = vmax.f32 %v1104_v25, %v1106_v28  ;;  %v1673_v9 = vmax.f32 %v1607_v29, 0.0  ;;  %980 = vmatmul.bf16.gmra.mxu2 %v827_v7  ;;  %1069 = vmatmul.bf16.gmra.mxu3 %v827_v7  ;;  %v5347_v28 = vld [vmem:[%s5651_s17 + $0x1c8] sm:$0xff] }
 0x1e4   : > { %v764_v34 = vpop.f32.mrf.mxu1 }
 0x1e5   : > { %v1700_v35 = vpack.c.bf16 %v1673_v9, %v1672_v31  ;;  %v765_v11 = vadd.f32 %v5911_v0, %v764_v34 }
 0x1e6   : > { %v941_v37 = vpop.f32.mrf.mxu2  ;;  %v1030_v10 = vpop.f32.mrf.mxu3 }
 0x1e7   : > { %5022 = vmatmul.msk.bf16.gmra.mxu1 %vm646_vm1, %v1700_v35  ;;  %v942_v44 = vadd.f32 %v941_v37, %v6005_v38  ;;  %v1031_v49 = vadd.f32 %v1030_v10, %v6007_v39  ;;  %v808_v58 = vmax.f32 %v765_v11, 0.0  ;;  %v6077_v10 = vld [vmem:[%s7186_s5] ss:$0 sm:$0xff] }
 0x1e8   : > { %v1609_v42 = vpop.f32.mrf.mxu0 }
 0x1e9   : > { %v1610_v54 = vadd.f32 %v5702_v15, %v1609_v42  ;;  %v1107_v1 = vmax.f32 %v942_v44, 0.0  ;;  %v1108_v5 = vmax.f32 %v1031_v49, 0.0 }
 0x1eb   : > { %5015 = vmatmul.msk.bf16.gmra.mxu0 %vm435_vm0, %v5346_v41  ;;  %v1674_v17 = vmax.f32 %v1610_v54, 0.0 }
 0x1ec   : > { %v766_v43 = vpop.f32.mrf.mxu1 }
 0x1ed   : > { %v767_v46 = vadd.f32 %v5911_v0, %v766_v43 }
 0x1ee   : > { %v943_v51 = vpop.f32.mrf.mxu2  ;;  %v1032_v53 = vpop.f32.mrf.mxu3 }
 0x1ef   : > { %v809_v56 = vmax.f32 %v767_v46, 0.0  ;;  %v944_v57 = vadd.f32 %v943_v51, %v6005_v38  ;;  %v1033_v60 = vadd.f32 %v1032_v53, %v6007_v39 }
 0x1f0   : > { %v1611_v61 = vpop.f32.mrf.mxu0 }
 0x1f1   : > { %v1109_v2 = vmax.f32 %v944_v57, 0.0  ;;  %v1612_v4 = vadd.f32 %v5702_v15, %v1611_v61  ;;  %v1110_v13 = vmax.f32 %v1033_v60, 0.0  ;;  %v828_v14 = vpack.c.bf16 %v809_v56, %v808_v58 }
 0x1f3   : > { %v6063_v18 = vmax.f32 %v1107_v1, %v1109_v2  ;;  %v1675_v19 = vmax.f32 %v1612_v4, 0.0  ;;  %v6065_v21 = vmax.f32 %v1108_v5, %v1110_v13  ;;  %985 = vmatmul.bf16.gmra.mxu2 %v828_v14  ;;  %1074 = vmatmul.bf16.gmra.mxu3 %v828_v14  ;;  %v5348_v14 = vld [vmem:[%s5651_s17 + $0x1e8] sm:$0xff] }
 0x1f4   : > { %v769_v22 = vpop.f32.mrf.mxu1 }
 0x1f5   : > { %v1701_v24 = vpack.c.bf16 %v1675_v19, %v1674_v17  ;;  %v770_v15 = vadd.f32 %v5911_v0, %v769_v22 }
 0x1f6   : > { %v946_v25 = vpop.f32.mrf.mxu2  ;;  %v1035_v26 = vpop.f32.mrf.mxu3 }
 0x1f7   : > { %5023 = vmatmul.msk.bf16.gmra.mxu1 %vm646_vm1, %v1701_v24  ;;  %v947_v7 = vadd.f32 %v946_v25, %v6005_v38  ;;  %v1036_v9 = vadd.f32 %v1035_v26, %v6007_v39  ;;  %v810_v44 = vmax.f32 %v770_v15, 0.0 }
 0x1f8   : > { %v1614_v29 = vpop.f32.mrf.mxu0 }
 0x1f9   : > { %v1615_v41 = vadd.f32 %v6077_v10, %v1614_v29  ;;  %v1111_v46 = vmax.f32 %v947_v7, 0.0  ;;  %v1112_v51 = vmax.f32 %v1036_v9, 0.0 }
 0x1fb   : > { %5016 = vmatmul.msk.bf16.gmra.mxu0 %vm435_vm0, %v5347_v28  ;;  %v1676_v58 = vmax.f32 %v1615_v41, 0.0 }
 0x1fc   : > { %v771_v31 = vpop.f32.mrf.mxu1 }
 0x1fd   : > { %v772_v34 = vadd.f32 %v5911_v0, %v771_v31 }
 0x1fe   : > { %v948_v35 = vpop.f32.mrf.mxu2  ;;  %v1037_v37 = vpop.f32.mrf.mxu3 }
 0x1ff   : > { %v811_v42 = vmax.f32 %v772_v34, 0.0  ;;  %v949_v11 = vadd.f32 %v948_v35, %v6005_v38  ;;  %v1038_v43 = vadd.f32 %v1037_v37, %v6007_v39 }
 0x200   : > { %v1616_v49 = vpop.f32.mrf.mxu0 }
 0x201   : > { %v1113_v53 = vmax.f32 %v949_v11, 0.0  ;;  %v1114_v54 = vmax.f32 %v1038_v43, 0.0  ;;  %v1617_v56 = vadd.f32 %v6077_v10, %v1616_v49  ;;  %v829_v57 = vpack.c.bf16 %v811_v42, %v810_v44 }
 0x203   : > { %v6083_v60 = vmax.f32 %v1111_v46, %v1113_v53  ;;  %v6085_v61 = vmax.f32 %v1112_v51, %v1114_v54  ;;  %v1677_v1 = vmax.f32 %v1617_v56, 0.0  ;;  %990 = vmatmul.bf16.gmra.mxu2 %v829_v57  ;;  %1079 = vmatmul.bf16.gmra.mxu3 %v829_v57 }
 0x204   : > { %v774_v2 = vpop.f32.mrf.mxu1 }
 0x205   : > { %v1702_v4 = vpack.c.bf16 %v1677_v1, %v1676_v58  ;;  %v775_v19 = vadd.f32 %v5911_v0, %v774_v2  ;;  %v5349_v1 = vld [vmem:[%s5651_s17 + $0x10] sm:$0xff] }
 0x206   : > { %v951_v5 = vpop.f32.mrf.mxu2  ;;  %v1040_v13 = vpop.f32.mrf.mxu3 }
 0x207   : > { %5024 = vmatmul.msk.bf16.gmra.mxu1 %vm646_vm1, %v1702_v4  ;;  %v952_v24 = vadd.f32 %v951_v5, %v6005_v38  ;;  %v1041_v26 = vadd.f32 %v1040_v13, %v6007_v39  ;;  %v812_v9 = vmax.f32 %v775_v19, 0.0 }
 0x208   : > { %v1619_v17 = vpop.f32.mrf.mxu0 }
 0x209   : > { %v1620_v15 = vadd.f32 %v6077_v10, %v1619_v17  ;;  %v1115_v37 = vmax.f32 %v952_v24, 0.0  ;;  %v1116_v11 = vmax.f32 %v1041_v26, 0.0 }
 0x20b   : > { %5017 = vmatmul.msk.bf16.gmra.mxu0 %vm435_vm0, %v5348_v14  ;;  %v1678_v46 = vmax.f32 %v1620_v15, 0.0 }
 0x20c   : > { %v776_v22 = vpop.f32.mrf.mxu1 }
 0x20d   : > { %v777_v25 = vadd.f32 %v5911_v0, %v776_v22 }
 0x20e   : > { %v953_v28 = vpop.f32.mrf.mxu2  ;;  %v1042_v29 = vpop.f32.mrf.mxu3 }
 0x20f   : > { %v813_v7 = vmax.f32 %v777_v25, 0.0  ;;  %v954_v31 = vadd.f32 %v953_v28, %v6005_v38  ;;  %v1043_v34 = vadd.f32 %v1042_v29, %v6007_v39 }
 0x210   : > { %v1621_v35 = vpop.f32.mrf.mxu0 }
 0x211   : > { %v1117_v41 = vmax.f32 %v954_v31, 0.0  ;;  %v1622_v42 = vadd.f32 %v6077_v10, %v1621_v35  ;;  %v1118_v43 = vmax.f32 %v1043_v34, 0.0  ;;  %v830_v44 = vpack.c.bf16 %v813_v7, %v812_v9 }
 0x213   : > { %v6098_v49 = vmax.f32 %v1115_v37, %v1117_v41  ;;  %v1679_v51 = vmax.f32 %v1622_v42, 0.0  ;;  %v6100_v53 = vmax.f32 %v1116_v11, %v1118_v43  ;;  %995 = vmatmul.bf16.gmra.mxu2 %v830_v44  ;;  %1084 = vmatmul.bf16.gmra.mxu3 %v830_v44 }
 0x214   : > { %v779_v54 = vpop.f32.mrf.mxu1 }
 0x215   : > { %v1703_v56 = vpack.c.bf16 %v1679_v51, %v1678_v46  ;;  %v780_v4 = vadd.f32 %v5911_v0, %v779_v54 }
 0x216   : > { %v956_v57 = vpop.f32.mrf.mxu2  ;;  %v1045_v58 = vpop.f32.mrf.mxu3 }
 0x217   : > { %5025 = vmatmul.msk.bf16.gmra.mxu1 %vm646_vm1, %v1703_v56  ;;  %v957_v5 = vadd.f32 %v956_v57, %v6005_v38  ;;  %v1046_v14 = vadd.f32 %v1045_v58, %v6007_v39  ;;  %v814_v29 = vmax.f32 %v780_v4, 0.0  ;;  %v5350_v56 = vld [vmem:[%s5651_s17 + $0x30] sm:$0xff] }
 0x218   : > { %v1624_v2 = vpop.f32.mrf.mxu0 }
 0x219   : > { %v1625_v24 = vadd.f32 %v6077_v10, %v1624_v2  ;;  %v1119_v15 = vmax.f32 %v957_v5, 0.0  ;;  %v1120_v31 = vmax.f32 %v1046_v14, 0.0 }
 0x21b   : > { %5098 = vmatmul.msk.bf16.vlgmr.msra.gmra.mxu0 %vm435_vm0, %v5349_v1  ;;  %v1680_v41 = vmax.f32 %v1625_v24, 0.0 }
 0x21c   : > { %v781_v13 = vpop.f32.mrf.mxu1 }
 0x21d   : > { %v782_v17 = vadd.f32 %v5911_v0, %v781_v13 }
 0x21e   : > { %v958_v19 = vpop.f32.mrf.mxu2  ;;  %v1047_v22 = vpop.f32.mrf.mxu3 }
 0x21f   : > { %v815_v25 = vmax.f32 %v782_v17, 0.0  ;;  %v959_v26 = vadd.f32 %v958_v19, %v6005_v38  ;;  %v1048_v28 = vadd.f32 %v1047_v22, %v6007_v39 }
 0x220   : > { %v1626_v7 = vpop.f32.mrf.mxu0 }
 0x221   : > { %v1121_v9 = vmax.f32 %v959_v26, 0.0  ;;  %v1122_v34 = vmax.f32 %v1048_v28, 0.0  ;;  %v1627_v35 = vadd.f32 %v6077_v10, %v1626_v7  ;;  %v831_v37 = vpack.c.bf16 %v815_v25, %v814_v29 }
 0x223   : > { %v6113_v42 = vmax.f32 %v1119_v15, %v1121_v9  ;;  %v6115_v11 = vmax.f32 %v1120_v31, %v1122_v34  ;;  %v1681_v43 = vmax.f32 %v1627_v35, 0.0  ;;  %1000 = vmatmul.bf16.gmra.mxu2 %v831_v37  ;;  %1089 = vmatmul.bf16.gmra.mxu3 %v831_v37 }
 0x224   : > { %v1769_v44 = vpop.f32.mrf.mxu1 }
 0x225   : > { %v1704_v46 = vpack.c.bf16 %v1681_v43, %v1680_v41  ;;  %v1770_v58 = vadd.f32 %v5911_v0, %v1769_v44 }
 0x226   : > { %v961_v51 = vpop.f32.mrf.mxu2  ;;  %v1050_v54 = vpop.f32.mrf.mxu3 }
 0x227   : > { %5026 = vmatmul.msk.bf16.gmra.mxu1 %vm646_vm1, %v1704_v46  ;;  %v962_v2 = vadd.f32 %v961_v51, %v6005_v38  ;;  %v1051_v5 = vadd.f32 %v1050_v54, %v6007_v39  ;;  %v1849_v17 = vmax.f32 %v1770_v58, 0.0  ;;  %v5351_v54 = vld [vmem:[%s5651_s17 + $0x50] sm:$0xff] }
 0x228   : > { %v1629_v57 = vpop.f32.mrf.mxu0 }
 0x229   : > { %v1630_v24 = vadd.f32 %v6077_v10, %v1629_v57  ;;  %v1123_v28 = vmax.f32 %v962_v2, 0.0  ;;  %v1124_v7 = vmax.f32 %v1051_v5, 0.0 }
 0x22b   : > { %5099 = vmatmul.msk.bf16.gmra.mxu0 %vm435_vm0, %v5350_v56  ;;  %v1682_v35 = vmax.f32 %v1630_v24, 0.0 }
 0x22c   : > { %v1771_v1 = vpop.f32.mrf.mxu1 }
 0x22d   : > { %v1772_v4 = vadd.f32 %v5911_v0, %v1771_v1 }
 0x22e   : > { %v963_v13 = vpop.f32.mrf.mxu2  ;;  %v1052_v14 = vpop.f32.mrf.mxu3 }
 0x22f   : > { %v1850_v19 = vmax.f32 %v1772_v4, 0.0  ;;  %v964_v22 = vadd.f32 %v963_v13, %v6005_v38  ;;  %v1053_v25 = vadd.f32 %v1052_v14, %v6007_v39 }
 0x230   : > { %v1631_v26 = vpop.f32.mrf.mxu0 }
 0x231   : > { %v1881_v29 = vpack.c.bf16 %v1850_v19, %v1849_v17  ;;  %v1125_v15 = vmax.f32 %v964_v22, 0.0  ;;  %v1126_v31 = vmax.f32 %v1053_v25, 0.0  ;;  %v1632_v9 = vadd.f32 %v6077_v10, %v1631_v26 }
 0x233   : > { %v6128_v34 = vmax.f32 %v1123_v28, %v1125_v15  ;;  %v6130_v37 = vmax.f32 %v1124_v7, %v1126_v31  ;;  %v1683_v41 = vmax.f32 %v1632_v9, 0.0  ;;  %1905 = vmatmul.bf16.vlgmr.msrb.gmra.mxu2 %v1881_v29  ;;  %1994 = vmatmul.bf16.vlgmr.msrb.gmra.mxu3 %v1881_v29 }
 0x234   : > { %v1774_v43 = vpop.f32.mrf.mxu1  ;;  %3857 = vmatpush.bf16.msrb.mxu2 %v5745_v62  ;;  %3946 = vmatpush.bf16.msrb.mxu3 %v5750_v3 }
 0x235   : > { %v1705_v44 = vpack.c.bf16 %v1683_v41, %v1682_v35  ;;  %v1775_v57 = vadd.f32 %v5911_v0, %v1774_v43  ;;  %v6165_v35 = vld [vmem:[%s7186_s5 + $0x1] ss:$0 sm:$0xff] }
 0x236   : > { %v966_v46 = vpop.f32.mrf.mxu2  ;;  %v1055_v51 = vpop.f32.mrf.mxu3 }
 0x237   : > { %5027 = vmatmul.msk.bf16.gmra.mxu1 %vm646_vm1, %v1705_v44  ;;  %v967_v58 = vadd.f32 %v966_v46, %v6005_v38  ;;  %v1056_v3 = vadd.f32 %v1055_v51, %v6007_v39  ;;  %v1851_v14 = vmax.f32 %v1775_v57, 0.0 }
 0x238   : > { %v1634_v56 = vpop.f32.mrf.mxu0  ;;  %3858 = vmatpush.bf16.msrb.mxu2 %v5763_v12  ;;  %3947 = vmatpush.bf16.msrb.mxu3 %v5770_v16 }
 0x239   : > { %v1635_v12 = vadd.f32 %v6077_v10, %v1634_v56  ;;  %v1127_v17 = vmax.f32 %v967_v58, 0.0  ;;  %v1128_v22 = vmax.f32 %v1056_v3, 0.0 }
 0x23b   : > { %5100 = vmatmul.msk.bf16.gmra.mxu0 %vm435_vm0, %v5351_v54 }
 0x23c   : > { %v1776_v62 = vpop.f32.mrf.mxu1  ;;  %3859 = vmatpush.bf16.msrb.mxu2 %v5780_v20  ;;  %3948 = vmatpush.bf16.msrb.mxu3 %v5789_v23  ;;  %v1684_v23 = vmax.f32 %v1635_v12, 0.0 }
 0x23d   : > { %v1777_v1 = vadd.f32 %v5911_v0, %v1776_v62 }
 0x23e   : > { %v968_v2 = vpop.f32.mrf.mxu2  ;;  %v1057_v4 = vpop.f32.mrf.mxu3 }
 0x23f   : > { %v1852_v16 = vmax.f32 %v1777_v1, 0.0  ;;  %v969_v5 = vadd.f32 %v968_v2, %v6005_v38  ;;  %v1058_v13 = vadd.f32 %v1057_v4, %v6007_v39 }
 0x240   : > { %v1636_v19 = vpop.f32.mrf.mxu0  ;;  %3860 = vmatpush.bf16.msrb.mxu2 %v5802_v27  ;;  %3949 = vmatpush.bf16.msrb.mxu3 %v5808_v30  ;;  %v5352_v27 = vld [vmem:[%s5651_s17 + $0x70] sm:$0xff] }
 0x241   : > { %v1129_v24 = vmax.f32 %v969_v5, 0.0  ;;  %v1130_v25 = vmax.f32 %v1058_v13, 0.0  ;;  %v1637_v0 = vadd.f32 %v6077_v10, %v1636_v19  ;;  %v1882_v20 = vpack.c.bf16 %v1852_v16, %v1851_v14 }
 0x243   : > { %v6151_v26 = vmax.f32 %v1127_v17, %v1129_v24  ;;  %v6153_v28 = vmax.f32 %v1128_v22, %v1130_v25  ;;  %v1685_v29 = vmax.f32 %v1637_v0, 0.0  ;;  %1910 = vmatmul.bf16.gmra.mxu2 %v1882_v20  ;;  %1999 = vmatmul.bf16.gmra.mxu3 %v1882_v20  ;;  %v5353_v22 = vld [vmem:[%s5651_s17 + $0x90] sm:$0xff] }
 0x244   : > { %v1779_v15 = vpop.f32.mrf.mxu1  ;;  %3861 = vmatpush.bf16.msrb.mxu2 %v5822_v36  ;;  %3950 = vmatpush.bf16.msrb.mxu3 %v5827_v40 }
 0x245   : > { %v1706_v7 = vpack.c.bf16 %v1685_v29, %v1684_v23  ;;  %v1780_v36 = vadd.f32 %v6165_v35, %v1779_v15 }
 0x246   : > { %v971_v31 = vpop.f32.mrf.mxu2  ;;  %v1060_v9 = vpop.f32.mrf.mxu3 }
 0x247   : > { %5028 = vmatmul.msk.bf16.gmra.mxu1 %vm646_vm1, %v1706_v7  ;;  %v972_v41 = vadd.f32 %v971_v31, %v6005_v38  ;;  %v1853_v56 = vmax.f32 %v1780_v36, 0.0 }
 0x248   : > { %v1639_v30 = vpop.f32.mrf.mxu0  ;;  %3862 = vmatpush.bf16.msrb.mxu2 %v5840_v45  ;;  %3951 = vmatpush.bf16.msrb.mxu3 %v5847_v48  ;;  %v1061_v45 = vadd.f32 %v1060_v9, %v6007_v39 }
 0x249   : > { %v1640_v46 = vadd.f32 %v6077_v10, %v1639_v30  ;;  %v1131_v62 = vmax.f32 %v972_v41, 0.0 }
 0x24b   : > { %5101 = vmatmul.msk.bf16.gmra.mxu0 %vm435_vm0, %v5352_v27  ;;  %v1686_v4 = vmax.f32 %v1640_v46, 0.0 }
 0x24c   : > { %v1781_v40 = vpop.f32.mrf.mxu1  ;;  %3863 = vmatpush.bf16.msrb.mxu2 %v5857_v52  ;;  %3952 = vmatpush.bf16.msrb.mxu3 %v5866_v55  ;;  %v1132_v52 = vmax.f32 %v1061_v45, 0.0 }
 0x24d   : > { %v1782_v43 = vadd.f32 %v6165_v35, %v1781_v40 }
 0x24e   : > { %v973_v48 = vpop.f32.mrf.mxu2  ;;  %v1062_v44 = vpop.f32.mrf.mxu3 }
 0x24f   : > { %v1854_v51 = vmax.f32 %v1782_v43, 0.0  ;;  %v974_v54 = vadd.f32 %v973_v48, %v6005_v38  ;;  %v1063_v57 = vadd.f32 %v1062_v44, %v6007_v39 }
 0x250   : > { %v1641_v58 = vpop.f32.mrf.mxu0  ;;  %3864 = vmatpush.bf16.msrb.mxu2 %v5879_v59  ;;  %3953 = vmatpush.bf16.msrb.mxu3 %v5885_v63 }
 0x251   : > { %v1133_v3 = vmax.f32 %v974_v54, 0.0  ;;  %v1642_v1 = vadd.f32 %v6077_v10, %v1641_v58  ;;  %v1134_v55 = vmax.f32 %v1063_v57, 0.0  ;;  %v1883_v2 = vpack.c.bf16 %v1854_v51, %v1853_v56 }
 0x253   : > { %v6179_v12 = vmax.f32 %v1131_v62, %v1133_v3  ;;  %v1687_v16 = vmax.f32 %v1642_v1, 0.0  ;;  %v6181_v5 = vmax.f32 %v1132_v52, %v1134_v55  ;;  %1915 = vmatmul.bf16.gmra.mxu2 %v1883_v2  ;;  %2004 = vmatmul.bf16.gmra.mxu3 %v1883_v2  ;;  %v5354_v3 = vld [vmem:[%s5651_s17 + $0xb0] sm:$0xff] }
 0x254   : > { %v1784_v13 = vpop.f32.mrf.mxu1 }
 0x255   : > { %v1707_v14 = vpack.c.bf16 %v1687_v16, %v1686_v4  ;;  %v1785_v63 = vadd.f32 %v6165_v35, %v1784_v13 }
 0x256   : > { %v976_v17 = vpop.f32.mrf.mxu2  ;;  %v1065_v19 = vpop.f32.mrf.mxu3 }
 0x257   : > { %5029 = vmatmul.msk.bf16.gmra.mxu1 %vm646_vm1, %v1707_v14  ;;  %v977_v0 = vadd.f32 %v976_v17, %v6005_v38  ;;  %v1066_v20 = vadd.f32 %v1065_v19, %v6007_v39  ;;  %v1855_v23 = vmax.f32 %v1785_v63, 0.0 }
 0x258   : > { %v1644_v59 = vpop.f32.mrf.mxu0 }
 0x259   : > { %v1645_v29 = vadd.f32 %v6077_v10, %v1644_v59  ;;  %v1135_v41 = vmax.f32 %v977_v0, 0.0  ;;  %v1136_v43 = vmax.f32 %v1066_v20, 0.0 }
 0x25b   : > { %5102 = vmatmul.msk.bf16.gmra.mxu0 %vm435_vm0, %v5353_v22  ;;  %v1688_v44 = vmax.f32 %v1645_v29, 0.0 }
 0x25c   : > { %v1786_v24 = vpop.f32.mrf.mxu1 }
 0x25d   : > { %v1787_v25 = vadd.f32 %v6165_v35, %v1786_v24 }
 0x25e   : > { %v978_v7 = vpop.f32.mrf.mxu2  ;;  %v1067_v31 = vpop.f32.mrf.mxu3 }
 0x25f   : > { %v1856_v15 = vmax.f32 %v1787_v25, 0.0  ;;  %v979_v9 = vadd.f32 %v978_v7, %v6005_v38  ;;  %v1068_v27 = vadd.f32 %v1067_v31, %v6007_v39 }
 0x260   : > { %v1646_v30 = vpop.f32.mrf.mxu0 }
 0x261   : > { %v1647_v36 = vadd.f32 %v6077_v10, %v1646_v30  ;;  %v1884_v40 = vpack.c.bf16 %v1856_v15, %v1855_v23  ;;  %v1137_v45 = vmax.f32 %v979_v9, 0.0  ;;  %v1138_v48 = vmax.f32 %v1068_v27, 0.0 }
 0x263   : > { %v1689_v46 = vmax.f32 %v1647_v36, 0.0  ;;  %v6194_v51 = vmax.f32 %v1135_v41, %v1137_v45  ;;  %v6196_v54 = vmax.f32 %v1136_v43, %v1138_v48  ;;  %1920 = vmatmul.bf16.gmra.mxu2 %v1884_v40  ;;  %2009 = vmatmul.bf16.gmra.mxu3 %v1884_v40  ;;  %v5355_v43 = vld [vmem:[%s5651_s17 + $0xd0] sm:$0xff] }
 0x264   : > { %v1789_v56 = vpop.f32.mrf.mxu1 }
 0x265   : > { %v1708_v57 = vpack.c.bf16 %v1689_v46, %v1688_v44  ;;  %v1790_v52 = vadd.f32 %v6165_v35, %v1789_v56 }
 0x266   : > { %v981_v58 = vpop.f32.mrf.mxu2  ;;  %v1070_v62 = vpop.f32.mrf.mxu3 }
 0x267   : > { %5030 = vmatmul.msk.bf16.gmra.mxu1 %vm646_vm1, %v1708_v57  ;;  %v982_v4 = vadd.f32 %v981_v58, %v6005_v38  ;;  %v1071_v16 = vadd.f32 %v1070_v62, %v6007_v39  ;;  %v1857_v13 = vmax.f32 %v1790_v52, 0.0 }
 0x268   : > { %v1649_v1 = vpop.f32.mrf.mxu0 }
 0x269   : > { %v1650_v14 = vadd.f32 %v6077_v10, %v1649_v1  ;;  %v1139_v20 = vmax.f32 %v982_v4, 0.0  ;;  %v1140_v23 = vmax.f32 %v1071_v16, 0.0 }
 0x26b   : > { %5103 = vmatmul.msk.bf16.gmra.mxu0 %vm435_vm0, %v5354_v3  ;;  %v1690_v7 = vmax.f32 %v1650_v14, 0.0 }
 0x26c   : > { %v1791_v55 = vpop.f32.mrf.mxu1 }
 0x26d   : > { %v1792_v2 = vadd.f32 %v6165_v35, %v1791_v55 }
 0x26e   : > { %v983_v19 = vpop.f32.mrf.mxu2  ;;  %v1072_v22 = vpop.f32.mrf.mxu3 }
 0x26f   : > { %v1858_v17 = vmax.f32 %v1792_v2, 0.0  ;;  %v984_v59 = vadd.f32 %v983_v19, %v6005_v38  ;;  %v1073_v63 = vadd.f32 %v1072_v22, %v6007_v39 }
 0x270   : > { %v1651_v24 = vpop.f32.mrf.mxu0 }
 0x271   : > { %v1652_v25 = vadd.f32 %v6077_v10, %v1651_v24  ;;  %v1885_v0 = vpack.c.bf16 %v1858_v17, %v1857_v13  ;;  %v1141_v29 = vmax.f32 %v984_v59, 0.0  ;;  %v1142_v15 = vmax.f32 %v1073_v63, 0.0 }
 0x273   : > { %v1691_v31 = vmax.f32 %v1652_v25, 0.0  ;;  %v6209_v9 = vmax.f32 %v1139_v20, %v1141_v29  ;;  %v6211_v27 = vmax.f32 %v1140_v23, %v1142_v15  ;;  %1925 = vmatmul.bf16.gmra.mxu2 %v1885_v0  ;;  %2014 = vmatmul.bf16.gmra.mxu3 %v1885_v0  ;;  %v5356_v15 = vld [vmem:[%s5651_s17 + $0xf0] sm:$0xff] }
 0x274   : > { %v1794_v30 = vpop.f32.mrf.mxu1 }
 0x275   : > { %v1709_v36 = vpack.c.bf16 %v1691_v31, %v1690_v7  ;;  %v1795_v48 = vadd.f32 %v6165_v35, %v1794_v30 }
 0x276   : > { %v986_v40 = vpop.f32.mrf.mxu2  ;;  %v1075_v41 = vpop.f32.mrf.mxu3 }
 0x277   : > { %5031 = vmatmul.msk.bf16.gmra.mxu1 %vm646_vm1, %v1709_v36  ;;  %v987_v56 = vadd.f32 %v986_v40, %v6005_v38  ;;  %v1076_v57 = vadd.f32 %v1075_v41, %v6007_v39  ;;  %v1859_v58 = vmax.f32 %v1795_v48, 0.0 }
 0x278   : > { %v1654_v45 = vpop.f32.mrf.mxu0 }
 0x279   : > { %v1655_v62 = vadd.f32 %v6077_v10, %v1654_v45  ;;  %v1143_v14 = vmax.f32 %v987_v56, 0.0  ;;  %v1144_v17 = vmax.f32 %v1076_v57, 0.0 }
 0x27b   : > { %5104 = vmatmul.msk.bf16.gmra.mxu0 %vm435_vm0, %v5355_v43  ;;  %v1692_v59 = vmax.f32 %v1655_v62, 0.0 }
 0x27c   : > { %v1796_v44 = vpop.f32.mrf.mxu1 }
 0x27d   : > { %v1797_v46 = vadd.f32 %v6165_v35, %v1796_v44 }
 0x27e   : > { %v988_v1 = vpop.f32.mrf.mxu2  ;;  %v1077_v52 = vpop.f32.mrf.mxu3 }
 0x27f   : > { %v1860_v3 = vmax.f32 %v1797_v46, 0.0  ;;  %v989_v55 = vadd.f32 %v988_v1, %v6005_v38  ;;  %v1078_v2 = vadd.f32 %v1077_v52, %v6007_v39 }
 0x280   : > { %v1656_v4 = vpop.f32.mrf.mxu0 }
 0x281   : > { %v1657_v16 = vadd.f32 %v6077_v10, %v1656_v4  ;;  %v1886_v13 = vpack.c.bf16 %v1860_v3, %v1859_v58  ;;  %v1145_v19 = vmax.f32 %v989_v55, 0.0  ;;  %v1146_v22 = vmax.f32 %v1078_v2, 0.0 }
 0x283   : > { %v1693_v63 = vmax.f32 %v1657_v16, 0.0  ;;  %v6224_v24 = vmax.f32 %v1143_v14, %v1145_v19  ;;  %v6226_v25 = vmax.f32 %v1144_v17, %v1146_v22  ;;  %1930 = vmatmul.bf16.gmra.mxu2 %v1886_v13  ;;  %2019 = vmatmul.bf16.gmra.mxu3 %v1886_v13 }
 0x284   : > { %v1799_v0 = vpop.f32.mrf.mxu1 }
 0x285   : > { %v1710_v20 = vpack.c.bf16 %v1693_v63, %v1692_v59  ;;  %v1800_v31 = vadd.f32 %v6165_v35, %v1799_v0  ;;  %v5357_v63 = vld [vmem:[%s5651_s17 + $0x110] sm:$0xff] }
 0x286   : > { %v991_v23 = vpop.f32.mrf.mxu2  ;;  %v1080_v29 = vpop.f32.mrf.mxu3 }
 0x287   : > { %5032 = vmatmul.msk.bf16.gmra.mxu1 %vm646_vm1, %v1710_v20  ;;  %v992_v40 = vadd.f32 %v991_v23, %v6005_v38  ;;  %v1081_v41 = vadd.f32 %v1080_v29, %v6007_v39  ;;  %v1861_v43 = vmax.f32 %v1800_v31, 0.0 }
 0x288   : > { %v1659_v7 = vpop.f32.mrf.mxu0 }
 0x289   : > { %v1660_v45 = vadd.f32 %v6077_v10, %v1659_v7  ;;  %v1147_v1 = vmax.f32 %v992_v40, 0.0  ;;  %v1148_v52 = vmax.f32 %v1081_v41, 0.0 }
 0x28b   : > { %5105 = vmatmul.msk.bf16.gmra.mxu0 %vm435_vm0, %v5356_v15  ;;  %v1694_v4 = vmax.f32 %v1660_v45, 0.0 }
 0x28c   : > { %v1801_v30 = vpop.f32.mrf.mxu1 }
 0x28d   : > { %v1802_v36 = vadd.f32 %v6165_v35, %v1801_v30 }
 0x28e   : > { %v993_v44 = vpop.f32.mrf.mxu2  ;;  %v1082_v46 = vpop.f32.mrf.mxu3 }
 0x28f   : > { %v1862_v48 = vmax.f32 %v1802_v36, 0.0  ;;  %v994_v56 = vadd.f32 %v993_v44, %v6005_v38  ;;  %v1083_v57 = vadd.f32 %v1082_v46, %v6007_v39 }
 0x290   : > { %v1661_v58 = vpop.f32.mrf.mxu0 }
 0x291   : > { %v1662_v62 = vadd.f32 %v6077_v10, %v1661_v58  ;;  %v1887_v3 = vpack.c.bf16 %v1862_v48, %v1861_v43  ;;  %v1149_v55 = vmax.f32 %v994_v56, 0.0  ;;  %v1150_v2 = vmax.f32 %v1083_v57, 0.0 }
 0x293   : > { %v1695_v16 = vmax.f32 %v1662_v62, 0.0  ;;  %v6239_v13 = vmax.f32 %v1147_v1, %v1149_v55  ;;  %v6241_v14 = vmax.f32 %v1148_v52, %v1150_v2  ;;  %1935 = vmatmul.bf16.gmra.mxu2 %v1887_v3  ;;  %2024 = vmatmul.bf16.gmra.mxu3 %v1887_v3 }
 0x294   : > { %v1804_v17 = vpop.f32.mrf.mxu1 }
 0x295   : > { %v1711_v19 = vpack.c.bf16 %v1695_v16, %v1694_v4  ;;  %v1805_v20 = vadd.f32 %v6165_v35, %v1804_v17 }
 0x296   : > { %v996_v22 = vpop.f32.mrf.mxu2  ;;  %v1085_v59 = vpop.f32.mrf.mxu3 }
 0x297   : > { %5033 = vmatmul.msk.bf16.gmra.mxu1 %vm646_vm1, %v1711_v19  ;;  %v997_v15 = vadd.f32 %v996_v22, %v6005_v38  ;;  %v1086_v7 = vadd.f32 %v1085_v59, %v6007_v39  ;;  %v1863_v31 = vmax.f32 %v1805_v20, 0.0  ;;  %v5358_v19 = vld [vmem:[%s5651_s17 + $0x130] sm:$0xff] }
 0x298   : > { %v2564_v0 = vpop.f32.mrf.mxu0 }
 0x299   : > { %v2565_v30 = vadd.f32 %v6077_v10, %v2564_v0  ;;  %v1151_v56 = vmax.f32 %v997_v15, 0.0  ;;  %v1152_v57 = vmax.f32 %v1086_v7, 0.0 }
 0x29b   : > { %5106 = vmatmul.msk.bf16.gmra.mxu0 %vm435_vm0, %v5357_v63  ;;  %v2644_v3 = vmax.f32 %v2565_v30, 0.0 }
 0x29c   : > { %v1806_v23 = vpop.f32.mrf.mxu1 }
 0x29d   : > { %v1807_v29 = vadd.f32 %v6165_v35, %v1806_v23 }
 0x29e   : > { %v998_v40 = vpop.f32.mrf.mxu2  ;;  %v1087_v41 = vpop.f32.mrf.mxu3 }
 0x29f   : > { %v1864_v36 = vmax.f32 %v1807_v29, 0.0  ;;  %v999_v43 = vadd.f32 %v998_v40, %v6005_v38  ;;  %v1088_v45 = vadd.f32 %v1087_v41, %v6007_v39 }
 0x2a0   : > { %v2566_v48 = vpop.f32.mrf.mxu0 }
 0x2a1   : > { %v2567_v44 = vadd.f32 %v6077_v10, %v2566_v48  ;;  %v1888_v46 = vpack.c.bf16 %v1864_v36, %v1863_v31  ;;  %v1153_v58 = vmax.f32 %v999_v43, 0.0  ;;  %v1154_v62 = vmax.f32 %v1088_v45, 0.0 }
 0x2a3   : > { %v2645_v1 = vmax.f32 %v2567_v44, 0.0  ;;  %v6254_v52 = vmax.f32 %v1151_v56, %v1153_v58  ;;  %v6256_v55 = vmax.f32 %v1152_v57, %v1154_v62  ;;  %1940 = vmatmul.bf16.gmra.mxu2 %v1888_v46  ;;  %2029 = vmatmul.bf16.gmra.mxu3 %v1888_v46  ;;  %v1160_v57 = vrot.slane %v6018_v6, 4 }
 0x2a4   : > { %v1809_v2 = vpop.f32.mrf.mxu1 }
 0x2a5   : > { %v2676_v4 = vpack.c.bf16 %v2645_v1, %v2644_v3  ;;  %v1810_v59 = vadd.f32 %v6165_v35, %v1809_v2  ;;  %v1167_v3 = vrot.slane %v6020_v8, 4 }
 0x2a6   : > { %v1001_v16 = vpop.f32.mrf.mxu2  ;;  %v1090_v17 = vpop.f32.mrf.mxu3 }
 0x2a7   : > { %5114 = vmatmul.msk.bf16.vlgmr.msra.gmra.mxu1 %vm646_vm1, %v2676_v4  ;;  %v1002_v20 = vadd.f32 %v1001_v16, %v6005_v38  ;;  %v1091_v23 = vadd.f32 %v1090_v17, %v6007_v39  ;;  %v1865_v29 = vmax.f32 %v1810_v59, 0.0  ;;  %v1161_v17 = vmax.f32 %v6018_v6, %v1160_v57  ;;  %v5359_v59 = vld [vmem:[%s5651_s17 + $0x150] sm:$0xff] }
 0x2a8   : > { %v2569_v22 = vpop.f32.mrf.mxu0 }
 0x2a9   : > { %v2570_v15 = vadd.f32 %v6077_v10, %v2569_v22  ;;  %v1155_v48 = vmax.f32 %v1002_v20, 0.0  ;;  %v1156_v44 = vmax.f32 %v1091_v23, 0.0  ;;  %v1162_v20 = vrot.slane %v1161_v17, 2 }
 0x2ab   : > { %5107 = vmatmul.msk.bf16.gmra.mxu0 %vm435_vm0, %v5358_v19  ;;  %v2646_v58 = vmax.f32 %v2570_v15, 0.0  ;;  %v1163_v6 = vmax.f32 %v1161_v17, %v1162_v20 }
 0x2ac   : > { %v1811_v63 = vpop.f32.mrf.mxu1 }
 0x2ad   : > { %v1812_v0 = vadd.f32 %v6165_v35, %v1811_v63  ;;  %v1168_v63 = vmax.f32 %v6020_v8, %v1167_v3 }
 0x2ae   : > { %v1003_v31 = vpop.f32.mrf.mxu2  ;;  %v1092_v30 = vpop.f32.mrf.mxu3 }
 0x2af   : > { %v1866_v7 = vmax.f32 %v1812_v0, 0.0  ;;  %v1004_v36 = vadd.f32 %v1003_v31, %v6005_v38  ;;  %v1093_v40 = vadd.f32 %v1092_v30, %v6007_v39  ;;  %v1169_v23 = vrot.slane %v1168_v63, 2 }
 0x2b0   : > { %v2571_v41 = vpop.f32.mrf.mxu0 }
 0x2b1   : > { %v2572_v43 = vadd.f32 %v6077_v10, %v2571_v41  ;;  %v1889_v45 = vpack.c.bf16 %v1866_v7, %v1865_v29  ;;  %v1157_v46 = vmax.f32 %v1004_v36, 0.0  ;;  %v1158_v56 = vmax.f32 %v1093_v40, 0.0 }
 0x2b2   : > { %v1170_v41 = vmax.f32 %v1168_v63, %v1169_v23 }
 0x2b3   : > { %v2647_v62 = vmax.f32 %v2572_v43, 0.0  ;;  %v6271_v1 = vmax.f32 %v1155_v48, %v1157_v46  ;;  %v6273_v2 = vmax.f32 %v1156_v44, %v1158_v56  ;;  %1945 = vmatmul.bf16.gmra.mxu2 %v1889_v45  ;;  %2034 = vmatmul.bf16.gmra.mxu3 %v1889_v45  ;;  %v1174_v46 = vrot.slane %v6033_v47, 4 }
 0x2b4   : > { %v1814_v16 = vpop.f32.mrf.mxu1  ;;  %v1171_v63 = vrot.slane %v1170_v41, 1 }
 0x2b5   : > { %v2677_v4 = vpack.c.bf16 %v2647_v62, %v2646_v58  ;;  %v1815_v29 = vadd.f32 %v6165_v35, %v1814_v16  ;;  %v1181_v58 = vrot.slane %v6035_v50, 4  ;;  %v1175_v20 = vmax.f32 %v6033_v47, %v1174_v46 }
 0x2b6   : > { %v1906_v19 = vpop.f32.mrf.mxu2  ;;  %v1995_v22 = vpop.f32.mrf.mxu3 }
 0x2b7   : > { %5115 = vmatmul.msk.bf16.gmra.mxu1 %vm646_vm1, %v2677_v4  ;;  %v1907_v7 = vadd.f32 %v1906_v19, %v6005_v38  ;;  %v1996_v30 = vadd.f32 %v1995_v22, %v6007_v39  ;;  %v1867_v43 = vmax.f32 %v1815_v29, 0.0 }
 0x2b8   : > { %v2574_v0 = vpop.f32.mrf.mxu0 }
 0x2b9   : > { %v2575_v36 = vadd.f32 %v6077_v10, %v2574_v0  ;;  %v2075_v62 = vmax.f32 %v1907_v7, 0.0  ;;  %v2076_v16 = vmax.f32 %v1996_v30, 0.0 }
 0x2bb   : > { %5108 = vmatmul.msk.bf16.gmra.mxu0 %vm435_vm0, %v5359_v59  ;;  %v2648_v17 = vmax.f32 %v2575_v36, 0.0  ;;  %v1164_v59 = vrot.slane %v1163_v6, 1  ;;  %v5360_v36 = vld [vmem:[%s5651_s17 + $0x170] sm:$0xff] }
 0x2bc   : > { %v1816_v15 = vpop.f32.mrf.mxu1 }
 0x2bd   : > { %v1817_v31 = vadd.f32 %v6165_v35, %v1816_v15 }
 0x2be   : > { %v1908_v8 = vpop.f32.mrf.mxu2  ;;  %v1997_v40 = vpop.f32.mrf.mxu3 }
 0x2bf   : > { %v1868_v45 = vmax.f32 %v1817_v31, 0.0  ;;  %v1909_v48 = vadd.f32 %v1908_v8, %v6005_v38  ;;  %v1998_v56 = vadd.f32 %v1997_v40, %v6007_v39  ;;  %v1182_v31 = vmax.f32 %v6035_v50, %v1181_v58 }
 0x2c0   : > { %v2576_v44 = vpop.f32.mrf.mxu0 }
 0x2c1   : > { %v2577_v57 = vadd.f32 %v6077_v10, %v2576_v44  ;;  %v2077_v3 = vmax.f32 %v1909_v48, 0.0  ;;  %v1890_v4 = vpack.c.bf16 %v1868_v45, %v1867_v43  ;;  %v2078_v19 = vmax.f32 %v1998_v56, 0.0 }
 0x2c2   : > { %v1165_v43 = vmax.f32 %v1163_v6, %v1164_v59  ;;  %v1172_v45 = vmax.f32 %v1170_v41, %v1171_v63  ;;  %v1176_v56 = vrot.slane %v1175_v20, 2  ;;  %v1188_v59 = vrot.slane %v6048_v32, 4 }
 0x2c3   : > { %v2649_v22 = vmax.f32 %v2577_v57, 0.0  ;;  %v2139_v0 = vmax.f32 %v2075_v62, %v2077_v3  ;;  %1950 = vmatmul.bf16.gmra.mxu2 %v1890_v4  ;;  %2039 = vmatmul.bf16.gmra.mxu3 %v1890_v4  ;;  %v2146_v23 = vmax.f32 %v2076_v16, %v2078_v19  ;;  %v1183_v62 = vrot.slane %v1182_v31, 2 }
 0x2c4   : > { %v1819_v15 = vpop.f32.mrf.mxu1  ;;  %v1383_v50 = vmax.f32 %v1165_v43, 0.0  ;;  %v1384_v58 = vmax.f32 %v1172_v45, 0.0  ;;  %v1177_v16 = vmax.f32 %v1175_v20, %v1176_v56 }
 0x2c5   : > { %v2678_v29 = vpack.c.bf16 %v2649_v22, %v2648_v17  ;;  %v2140_v7 = vrot.slane %v2139_v0, 4  ;;  %v2147_v8 = vrot.slane %v2146_v23, 4  ;;  %v1820_v3 = vadd.f32 %v6165_v35, %v1819_v15 }
 0x2c6   : > { %v1911_v40 = vpop.f32.mrf.mxu2  ;;  %v2000_v30 = vpop.f32.mrf.mxu3  ;;  %v1184_v22 = vmax.f32 %v1182_v31, %v1183_v62 }
 0x2c7   : > { %v2141_v48 = vmax.f32 %v2139_v0, %v2140_v7  ;;  %5116 = vmatmul.msk.bf16.gmra.mxu1 %vm646_vm1, %v2678_v29  ;;  %v2148_v57 = vmax.f32 %v2146_v23, %v2147_v8  ;;  %v1912_v6 = vadd.f32 %v1911_v40, %v6005_v38  ;;  %v2001_v41 = vadd.f32 %v2000_v30, %v6007_v39 }
 0x2c8   : > { %v2579_v44 = vpop.f32.mrf.mxu0  ;;  %v1195_v23 = vrot.slane %v6050_v33, 4  ;;  %v1869_v15 = vmax.f32 %v1820_v3, 0.0 }
 0x2c9   : > { %v2142_v47 = vrot.slane %v2141_v48, 2  ;;  %v2149_v46 = vrot.slane %v2148_v57, 2  ;;  %v2580_v7 = vadd.f32 %v6077_v10, %v2579_v44  ;;  %v2080_v56 = vmax.f32 %v2001_v41, 0.0 }
 0x2cb   : > { %5109 = vmatmul.msk.bf16.gmra.mxu0 %vm435_vm0, %v5360_v36  ;;  %v2143_v4 = vmax.f32 %v2141_v48, %v2142_v47  ;;  %v2150_v17 = vmax.f32 %v2148_v57, %v2149_v46  ;;  %v2079_v48 = vmax.f32 %v1912_v6, 0.0  ;;  %v1189_v6 = vmax.f32 %v6048_v32, %v1188_v59 }
 0x2cc   : > { %v1821_v19 = vpop.f32.mrf.mxu1 }
 0x2cd   : > { %v2144_v63 = vrot.slane %v2143_v4, 1  ;;  %v1822_v0 = vadd.f32 %v6165_v35, %v1821_v19  ;;  %v2151_v29 = vrot.slane %v2150_v17, 1  ;;  %v2650_v19 = vmax.f32 %v2580_v7, 0.0 }
 0x2ce   : > { %v1913_v8 = vpop.f32.mrf.mxu2  ;;  %v2002_v20 = vpop.f32.mrf.mxu3 }
 0x2cf   : > { %v2145_v36 = vmax.f32 %v2143_v4, %v2144_v63  ;;  %v1870_v43 = vmax.f32 %v1822_v0, 0.0  ;;  %v1914_v40 = vadd.f32 %v1913_v8, %v6005_v38  ;;  %v2003_v30 = vadd.f32 %v2002_v20, %v6007_v39 }
 0x2d0   : > { %v2581_v31 = vpop.f32.mrf.mxu0  ;;  %v2152_v45 = vmax.f32 %v2150_v17, %v2151_v29  ;;  %v1178_v8 = vrot.slane %v1177_v16, 1  ;;  %v1185_v17 = vrot.slane %v1184_v22, 1 }
 0x2d1   : > { %v2582_v57 = vadd.f32 %v6077_v10, %v2581_v31  ;;  %v6305_v62 = vmax.f32 %v1383_v50, %v2145_v36  ;;  %v2081_v47 = vmax.f32 %v1914_v40, 0.0  ;;  %v2082_v46 = vmax.f32 %v2003_v30, 0.0  ;;  %v5361_v36 = vld [vmem:[%s5651_s17 + $0x190] sm:$0xff] }
 0x2d2   : > { %v1891_v3 = vpack.c.bf16 %v1870_v43, %v1869_v15  ;;  %v6307_v44 = vmax.f32 %v1384_v58, %v2152_v45  ;;  %v1196_v50 = vmax.f32 %v6050_v33, %v1195_v23  ;;  %v1179_v30 = vmax.f32 %v1177_v16, %v1178_v8 }
 0x2d3   : > { %v2651_v4 = vmax.f32 %v2582_v57, 0.0  ;;  %v2153_v63 = vmax.f32 %v2079_v48, %v2081_v47  ;;  %v2160_v0 = vmax.f32 %v2080_v56, %v2082_v46  ;;  %v1186_v31 = vmax.f32 %v1184_v22, %v1185_v17 }
 0x2d4   : > { %1955 = vmatmul.bf16.gmra.mxu2 %v1891_v3  ;;  %2044 = vmatmul.bf16.gmra.mxu3 %v1891_v3  ;;  %v1824_v10 = vpop.f32.mrf.mxu1  ;;  %v1190_v45 = vrot.slane %v1189_v6, 2  ;;  %v1197_v48 = vrot.slane %v1196_v50, 2  ;;  %v1385_v57 = vmax.f32 %v1179_v30, 0.0 }
 0x2d5   : > { %v2679_v41 = vpack.c.bf16 %v2651_v4, %v2650_v19  ;;  %v2154_v29 = vrot.slane %v2153_v63, 4  ;;  %v2161_v20 = vrot.slane %v2160_v0, 4  ;;  %v1825_v59 = vadd.f32 %v6165_v35, %v1824_v10 }
 0x2d6   : > { %v1916_v15 = vpop.f32.mrf.mxu2  ;;  %v2005_v58 = vpop.f32.mrf.mxu3  ;;  %v1386_v47 = vmax.f32 %v1186_v31, 0.0  ;;  %v1191_v46 = vmax.f32 %v1189_v6, %v1190_v45  ;;  %v1198_v4 = vmax.f32 %v1196_v50, %v1197_v48 }
 0x2d7   : > { %v2155_v7 = vmax.f32 %v2153_v63, %v2154_v29  ;;  %v2162_v43 = vmax.f32 %v2160_v0, %v2161_v20  ;;  %5117 = vmatmul.msk.bf16.gmra.mxu1 %vm646_vm1, %v2679_v41  ;;  %v1917_v3 = vadd.f32 %v1916_v15, %v6005_v38  ;;  %v1202_v0 = vrot.slane %v6063_v18, 4  ;;  %v6322_v41 = vld [vmem:[%s7186_s5] ss:$0 sm:$0xff] }
 0x2d8   : > { %v2584_v40 = vpop.f32.mrf.mxu0  ;;  %v1871_v8 = vmax.f32 %v1825_v59, 0.0  ;;  %v2006_v17 = vadd.f32 %v2005_v58, %v6007_v39 }
 0x2d9   : > { %v2156_v56 = vrot.slane %v2155_v7, 2  ;;  %v2163_v32 = vrot.slane %v2162_v43, 2  ;;  %v2585_v6 = vadd.f32 %v6322_v41, %v2584_v40  ;;  %v2083_v30 = vmax.f32 %v1917_v3, 0.0 }
 0x2da   : > { %v1203_v3 = vmax.f32 %v6063_v18, %v1202_v0 }
 0x2db   : > { %5110 = vmatmul.msk.bf16.gmra.mxu0 %vm435_vm0, %v5361_v36  ;;  %v2157_v33 = vmax.f32 %v2155_v7, %v2156_v56  ;;  %v2164_v23 = vmax.f32 %v2162_v43, %v2163_v32  ;;  %v1209_v43 = vrot.slane %v6065_v21, 4  ;;  %v2084_v32 = vmax.f32 %v2006_v17, 0.0 }
 0x2dc   : > { %v1826_v19 = vpop.f32.mrf.mxu1  ;;  %v2652_v59 = vmax.f32 %v2585_v6, 0.0  ;;  %v5362_v6 = vld [vmem:[%s5651_s17 + $0x1b0] sm:$0xff] }
 0x2dd   : > { %v2158_v63 = vrot.slane %v2157_v33, 1  ;;  %v2165_v16 = vrot.slane %v2164_v23, 1  ;;  %v1827_v22 = vadd.f32 %v6165_v35, %v1826_v19  ;;  %v1192_v19 = vrot.slane %v1191_v46, 1 }
 0x2de   : > { %v1918_v10 = vpop.f32.mrf.mxu2  ;;  %v2007_v29 = vpop.f32.mrf.mxu3 }
 0x2df   : > { %v2159_v20 = vmax.f32 %v2157_v33, %v2158_v63  ;;  %v2166_v50 = vmax.f32 %v2164_v23, %v2165_v16  ;;  %v1872_v15 = vmax.f32 %v1827_v22, 0.0  ;;  %v1919_v36 = vadd.f32 %v1918_v10, %v6005_v38 }
 0x2e0   : > { %v2586_v7 = vpop.f32.mrf.mxu0  ;;  %v2008_v58 = vadd.f32 %v2007_v29, %v6007_v39  ;;  %v1199_v63 = vrot.slane %v1198_v4, 1 }
 0x2e1   : > { %v2587_v31 = vadd.f32 %v6322_v41, %v2586_v7  ;;  %v6329_v45 = vmax.f32 %v1385_v57, %v2159_v20  ;;  %v6331_v48 = vmax.f32 %v1386_v47, %v2166_v50  ;;  %v2085_v40 = vmax.f32 %v1919_v36, 0.0 }
 0x2e2   : > { %v1892_v56 = vpack.c.bf16 %v1872_v15, %v1871_v8  ;;  %v2086_v33 = vmax.f32 %v2008_v58, 0.0  ;;  %v1210_v47 = vmax.f32 %v6065_v21, %v1209_v43  ;;  %v1193_v50 = vmax.f32 %v1191_v46, %v1192_v19 }
 0x2e3   : > { %v2653_v23 = vmax.f32 %v2587_v31, 0.0  ;;  %v2167_v16 = vmax.f32 %v2083_v30, %v2085_v40  ;;  %v1200_v15 = vmax.f32 %v1198_v4, %v1199_v63  ;;  %v1204_v30 = vrot.slane %v1203_v3, 2 }
 0x2e4   : > { %1960 = vmatmul.bf16.gmra.mxu2 %v1892_v56  ;;  %2049 = vmatmul.bf16.gmra.mxu3 %v1892_v56  ;;  %v2174_v22 = vmax.f32 %v2084_v32, %v2086_v33  ;;  %v1829_v57 = vpop.f32.mrf.mxu1  ;;  %v1211_v31 = vrot.slane %v1210_v47, 2  ;;  %v1387_v21 = vmax.f32 %v1193_v50, 0.0  ;;  %v1216_v19 = vrot.slane %v6083_v60, 4 }
 0x2e5   : > { %v2680_v10 = vpack.c.bf16 %v2653_v23, %v2652_v59  ;;  %v2168_v29 = vrot.slane %v2167_v16, 4  ;;  %v1830_v40 = vadd.f32 %v6165_v35, %v1829_v57  ;;  %v1388_v43 = vmax.f32 %v1200_v15, 0.0 }
 0x2e6   : > { %v2175_v20 = vrot.slane %v2174_v22, 4  ;;  %v1921_v8 = vpop.f32.mrf.mxu2  ;;  %v2010_v17 = vpop.f32.mrf.mxu3  ;;  %v1205_v32 = vmax.f32 %v1203_v3, %v1204_v30  ;;  %v1212_v23 = vmax.f32 %v1210_v47, %v1211_v31 }
 0x2e7   : > { %v2169_v36 = vmax.f32 %v2167_v16, %v2168_v29  ;;  %5118 = vmatmul.msk.bf16.gmra.mxu1 %vm646_vm1, %v2680_v10  ;;  %v1922_v46 = vadd.f32 %v1921_v8, %v6005_v38  ;;  %v2011_v4 = vadd.f32 %v2010_v17, %v6007_v39  ;;  %v1873_v57 = vmax.f32 %v1830_v40, 0.0 }
 0x2e8   : > { %v2589_v7 = vpop.f32.mrf.mxu0  ;;  %v2176_v58 = vmax.f32 %v2174_v22, %v2175_v20  ;;  %v1223_v22 = vrot.slane %v6085_v61, 4 }
 0x2e9   : > { %v2170_v18 = vrot.slane %v2169_v36, 2  ;;  %v2590_v29 = vadd.f32 %v6322_v41, %v2589_v7  ;;  %v2088_v30 = vmax.f32 %v2011_v4, 0.0 }
 0x2ea   : > { %v2177_v0 = vrot.slane %v2176_v58, 2 }
 0x2eb   : > { %5111 = vmatmul.msk.bf16.gmra.mxu0 %vm435_vm0, %v5362_v6  ;;  %v2171_v56 = vmax.f32 %v2169_v36, %v2170_v18  ;;  %v2087_v36 = vmax.f32 %v1922_v46, 0.0  ;;  %v1217_v46 = vmax.f32 %v6083_v60, %v1216_v19 }
 0x2ec   : > { %v2178_v59 = vmax.f32 %v2176_v58, %v2177_v0  ;;  %v1831_v33 = vpop.f32.mrf.mxu1 }
 0x2ed   : > { %v2172_v63 = vrot.slane %v2171_v56, 1  ;;  %v1832_v16 = vadd.f32 %v6165_v35, %v1831_v33  ;;  %v2654_v33 = vmax.f32 %v2590_v29, 0.0 }
 0x2ee   : > { %v2179_v10 = vrot.slane %v2178_v59, 1  ;;  %v1923_v20 = vpop.f32.mrf.mxu2  ;;  %v2012_v3 = vpop.f32.mrf.mxu3 }
 0x2ef   : > { %v2173_v6 = vmax.f32 %v2171_v56, %v2172_v63  ;;  %v1874_v50 = vmax.f32 %v1832_v16, 0.0  ;;  %v1924_v8 = vadd.f32 %v1923_v20, %v6005_v38  ;;  %v2013_v17 = vadd.f32 %v2012_v3, %v6007_v39 }
 0x2f0   : > { %v2591_v47 = vpop.f32.mrf.mxu0  ;;  %v2180_v15 = vmax.f32 %v2178_v59, %v2179_v10  ;;  %v1206_v20 = vrot.slane %v1205_v32, 1  ;;  %v1213_v59 = vrot.slane %v1212_v23, 1 }
 0x2f1   : > { %v2592_v58 = vadd.f32 %v6322_v41, %v2591_v47  ;;  %v6348_v31 = vmax.f32 %v1387_v21, %v2173_v6  ;;  %v2089_v18 = vmax.f32 %v1924_v8, 0.0  ;;  %v2090_v0 = vmax.f32 %v2013_v17, 0.0 }
 0x2f2   : > { %v1893_v40 = vpack.c.bf16 %v1874_v50, %v1873_v57  ;;  %v6350_v7 = vmax.f32 %v1388_v43, %v2180_v15  ;;  %v1224_v21 = vmax.f32 %v6085_v61, %v1223_v22  ;;  %v5363_v50 = vld [vmem:[%s5651_s17 + $0x1d0] sm:$0xff]  ;;  %v1207_v47 = vmax.f32 %v1205_v32, %v1206_v20 }
 0x2f3   : > { %v2655_v56 = vmax.f32 %v2592_v58, 0.0  ;;  %v2181_v63 = vmax.f32 %v2087_v36, %v2089_v18  ;;  %v2188_v16 = vmax.f32 %v2088_v30, %v2090_v0  ;;  %v1214_v15 = vmax.f32 %v1212_v23, %v1213_v59 }
 0x2f4   : > { %1965 = vmatmul.bf16.gmra.mxu2 %v1893_v40  ;;  %2054 = vmatmul.bf16.gmra.mxu3 %v1893_v40  ;;  %v1834_v10 = vpop.f32.mrf.mxu1  ;;  %v1218_v36 = vrot.slane %v1217_v46, 2  ;;  %v1225_v30 = vrot.slane %v1224_v21, 2  ;;  %v1389_v18 = vmax.f32 %v1207_v47, 0.0  ;;  %v1230_v20 = vrot.slane %v6098_v49, 4 }
 0x2f5   : > { %v2681_v4 = vpack.c.bf16 %v2655_v56, %v2654_v33  ;;  %v2182_v3 = vrot.slane %v2181_v63, 4  ;;  %v2189_v6 = vrot.slane %v2188_v16, 4  ;;  %v1835_v19 = vadd.f32 %v6165_v35, %v1834_v10 }
 0x2f6   : > { %v1926_v57 = vpop.f32.mrf.mxu2  ;;  %v2015_v43 = vpop.f32.mrf.mxu3  ;;  %v1390_v0 = vmax.f32 %v1214_v15, 0.0  ;;  %v1219_v40 = vmax.f32 %v1217_v46, %v1218_v36 }
 0x2f7   : > { %v2183_v29 = vmax.f32 %v2181_v63, %v2182_v3  ;;  %v2190_v8 = vmax.f32 %v2188_v16, %v2189_v6  ;;  %5119 = vmatmul.msk.bf16.gmra.mxu1 %vm646_vm1, %v2681_v4  ;;  %v1927_v33 = vadd.f32 %v1926_v57, %v6005_v38  ;;  %v1226_v63 = vmax.f32 %v1224_v21, %v1225_v30 }
 0x2f8   : > { %v2594_v17 = vpop.f32.mrf.mxu0  ;;  %v1875_v59 = vmax.f32 %v1835_v19, 0.0  ;;  %v2016_v4 = vadd.f32 %v2015_v43, %v6007_v39  ;;  %v1237_v21 = vrot.slane %v6100_v53, 4 }
 0x2f9   : > { %v2184_v58 = vrot.slane %v2183_v29, 2  ;;  %v2191_v60 = vrot.slane %v2190_v8, 2  ;;  %v2595_v10 = vadd.f32 %v6322_v41, %v2594_v17  ;;  %v2091_v47 = vmax.f32 %v1927_v33, 0.0 }
 0x2fa   : > { %v1231_v33 = vmax.f32 %v6098_v49, %v1230_v20 }
 0x2fb   : > { %5112 = vmatmul.msk.bf16.gmra.mxu0 %vm435_vm0, %v5363_v50  ;;  %v2185_v61 = vmax.f32 %v2183_v29, %v2184_v58  ;;  %v2192_v22 = vmax.f32 %v2190_v8, %v2191_v60  ;;  %v2092_v58 = vmax.f32 %v2016_v4, 0.0  ;;  %v2656_v60 = vmax.f32 %v2595_v10, 0.0  ;;  %v5364_v10 = vld [vmem:[%s5651_s17 + $0x1f0] sm:$0xff] }
 0x2fc   : > { %v1836_v56 = vpop.f32.mrf.mxu1 }
 0x2fd   : > { %v2186_v16 = vrot.slane %v2185_v61, 1  ;;  %v2193_v32 = vrot.slane %v2192_v22, 1  ;;  %v1837_v23 = vadd.f32 %v6165_v35, %v1836_v56  ;;  %v1227_v56 = vrot.slane %v1226_v63, 1 }
 0x2fe   : > { %v1928_v3 = vpop.f32.mrf.mxu2  ;;  %v2017_v6 = vpop.f32.mrf.mxu3 }
 0x2ff   : > { %v2187_v50 = vmax.f32 %v2185_v61, %v2186_v16  ;;  %v2194_v29 = vmax.f32 %v2192_v22, %v2193_v32  ;;  %v1876_v46 = vmax.f32 %v1837_v23, 0.0  ;;  %v1929_v57 = vadd.f32 %v1928_v3, %v6005_v38 }
 0x300   : > { %v2596_v8 = vpop.f32.mrf.mxu0  ;;  %v2018_v35 = vadd.f32 %v2017_v6, %v6007_v39  ;;  %v1220_v22 = vrot.slane %v1219_v40, 1 }
 0x301   : > { %v2597_v15 = vadd.f32 %v6322_v41, %v2596_v8  ;;  %v6367_v36 = vmax.f32 %v1389_v18, %v2187_v50  ;;  %v6369_v43 = vmax.f32 %v1390_v0, %v2194_v29  ;;  %v2093_v17 = vmax.f32 %v1929_v57, 0.0 }
 0x302   : > { %v1894_v30 = vpack.c.bf16 %v1876_v46, %v1875_v59  ;;  %v2094_v19 = vmax.f32 %v2018_v35, 0.0  ;;  %v1238_v0 = vmax.f32 %v6100_v53, %v1237_v21  ;;  %v1221_v50 = vmax.f32 %v1219_v40, %v1220_v22  ;;  %v6378_v53 = vld [vmem:[%s7186_s5 + $0x1] ss:$0 sm:$0xff] }
 0x303   : > { %7217 = vst [vmem:[#allocation5_spill] sm:$0xff] %v6367_v36  ;;  %v2657_v61 = vmax.f32 %v2597_v15, 0.0  ;;  %v2195_v16 = vmax.f32 %v2091_v47, %v2093_v17  ;;  %v1228_v29 = vmax.f32 %v1226_v63, %v1227_v56  ;;  %v1232_v8 = vrot.slane %v1231_v33, 2 }
 0x304   : > { %7218 = vst [vmem:[#allocation6_spill] sm:$0xff] %v6369_v43  ;;  %1970 = vmatmul.bf16.gmra.mxu2 %v1894_v30  ;;  %2059 = vmatmul.bf16.gmra.mxu3 %v1894_v30  ;;  %v2202_v32 = vmax.f32 %v2092_v58, %v2094_v19  ;;  %v1839_v18 = vpop.f32.mrf.mxu1  ;;  %v1239_v35 = vrot.slane %v1238_v0, 2  ;;  %v1391_v40 = vmax.f32 %v1221_v50, 0.0  ;;  %v1244_v22 = vrot.slane %v6113_v42, 4 }
 0x305   : > { %v2682_v23 = vpack.c.bf16 %v2657_v61, %v2656_v60  ;;  %v2196_v3 = vrot.slane %v2195_v16, 4  ;;  %v1840_v21 = vadd.f32 %v6378_v53, %v1839_v18  ;;  %v1392_v63 = vmax.f32 %v1228_v29, 0.0 }
 0x306   : > { %v2203_v6 = vrot.slane %v2202_v32, 4  ;;  %v1931_v59 = vpop.f32.mrf.mxu2  ;;  %v2020_v4 = vpop.f32.mrf.mxu3  ;;  %v1233_v17 = vmax.f32 %v1231_v33, %v1232_v8  ;;  %v1240_v61 = vmax.f32 %v1238_v0, %v1239_v35 }
 0x307   : > { %v2197_v46 = vmax.f32 %v2195_v16, %v2196_v3  ;;  %5120 = vmatmul.msk.bf16.gmra.mxu1 %vm646_vm1, %v2682_v23  ;;  %v1932_v58 = vadd.f32 %v1931_v59, %v6005_v38  ;;  %v2021_v60 = vadd.f32 %v2020_v4, %v6007_v39  ;;  %v1877_v18 = vmax.f32 %v1840_v21, 0.0 }
 0x308   : > { %v2599_v57 = vpop.f32.mrf.mxu0  ;;  %v2204_v47 = vmax.f32 %v2202_v32, %v2203_v6  ;;  %v1251_v32 = vrot.slane %v6115_v11, 4 }
 0x309   : > { %v2198_v49 = vrot.slane %v2197_v46, 2  ;;  %v2600_v3 = vadd.f32 %v6322_v41, %v2599_v57  ;;  %v2096_v8 = vmax.f32 %v2021_v60, 0.0 }
 0x30a   : > { %v2205_v20 = vrot.slane %v2204_v47, 2 }
 0x30b   : > { %5113 = vmatmul.msk.bf16.gmra.mxu0 %vm435_vm0, %v5364_v10  ;;  %v2199_v15 = vmax.f32 %v2197_v46, %v2198_v49  ;;  %v2095_v46 = vmax.f32 %v1932_v58, 0.0  ;;  %v1245_v58 = vmax.f32 %v6113_v42, %v1244_v22 }
 0x30c   : > { %v2206_v30 = vmax.f32 %v2204_v47, %v2205_v20  ;;  %v1841_v19 = vpop.f32.mrf.mxu1 }
 0x30d   : > { %v2200_v56 = vrot.slane %v2199_v15, 1  ;;  %v1842_v16 = vadd.f32 %v6378_v53, %v1841_v19  ;;  %v2658_v19 = vmax.f32 %v2600_v3, 0.0 }
 0x30e   : > { %v2207_v23 = vrot.slane %v2206_v30, 1  ;;  %v1933_v6 = vpop.f32.mrf.mxu2  ;;  %v2022_v33 = vpop.f32.mrf.mxu3 }
 0x30f   : > { %v2201_v10 = vmax.f32 %v2199_v15, %v2200_v56  ;;  %v1878_v50 = vmax.f32 %v1842_v16, 0.0  ;;  %v1934_v59 = vadd.f32 %v1933_v6, %v6005_v38  ;;  %v2023_v4 = vadd.f32 %v2022_v33, %v6007_v39 }
 0x310   : > { %v2601_v0 = vpop.f32.mrf.mxu0  ;;  %v2208_v29 = vmax.f32 %v2206_v30, %v2207_v23  ;;  %v1234_v6 = vrot.slane %v1233_v17, 1  ;;  %v1241_v30 = vrot.slane %v1240_v61, 1 }
 0x311   : > { %v2602_v47 = vadd.f32 %v6322_v41, %v2601_v0  ;;  %v6391_v35 = vmax.f32 %v1391_v40, %v2201_v10  ;;  %v2097_v49 = vmax.f32 %v1934_v59, 0.0  ;;  %v2098_v20 = vmax.f32 %v2023_v4, 0.0 }
 0x312   : > { %v1895_v21 = vpack.c.bf16 %v1878_v50, %v1877_v18  ;;  %v6393_v57 = vmax.f32 %v1392_v63, %v2208_v29  ;;  %v1252_v40 = vmax.f32 %v6115_v11, %v1251_v32  ;;  %v5365_v50 = vld [vmem:[%s5651_s17 + $0x18] sm:$0xff]  ;;  %v1235_v0 = vmax.f32 %v1233_v17, %v1234_v6 }
 0x313   : > { %v2659_v15 = vmax.f32 %v2602_v47, 0.0  ;;  %v2209_v56 = vmax.f32 %v2095_v46, %v2097_v49  ;;  %v2216_v16 = vmax.f32 %v2096_v8, %v2098_v20  ;;  %v1242_v29 = vmax.f32 %v1240_v61, %v1241_v30 }
 0x314   : > { %7219 = vst [vmem:[#allocation7_spill] sm:$0xff] %v6393_v57  ;;  %1975 = vmatmul.bf16.gmra.mxu2 %v1895_v21  ;;  %2064 = vmatmul.bf16.gmra.mxu3 %v1895_v21  ;;  %v1844_v23 = vpop.f32.mrf.mxu1  ;;  %v1246_v46 = vrot.slane %v1245_v58, 2  ;;  %v1253_v8 = vrot.slane %v1252_v40, 2  ;;  %v1393_v49 = vmax.f32 %v1235_v0, 0.0  ;;  %v1258_v6 = vrot.slane %v6128_v34, 4 }
 0x315   : > { %v2683_v60 = vpack.c.bf16 %v2659_v15, %v2658_v19  ;;  %v2210_v33 = vrot.slane %v2209_v56, 4  ;;  %v2217_v10 = vrot.slane %v2216_v16, 4  ;;  %v1845_v22 = vadd.f32 %v6378_v53, %v1844_v23 }
 0x316   : > { %v1936_v18 = vpop.f32.mrf.mxu2  ;;  %v2025_v63 = vpop.f32.mrf.mxu3  ;;  %v1394_v20 = vmax.f32 %v1242_v29, 0.0  ;;  %v1247_v21 = vmax.f32 %v1245_v58, %v1246_v46 }
 0x317   : > { %v2211_v3 = vmax.f32 %v2209_v56, %v2210_v33  ;;  %v2218_v59 = vmax.f32 %v2216_v16, %v2217_v10  ;;  %5121 = vmatmul.msk.bf16.gmra.mxu1 %vm646_vm1, %v2683_v60  ;;  %v1937_v19 = vadd.f32 %v1936_v18, %v6005_v38  ;;  %v1254_v56 = vmax.f32 %v1252_v40, %v1253_v8 }
 0x318   : > { %v2604_v4 = vpop.f32.mrf.mxu0  ;;  %v1879_v30 = vmax.f32 %v1845_v22, 0.0  ;;  %v2026_v60 = vadd.f32 %v2025_v63, %v6007_v39  ;;  %v1265_v40 = vrot.slane %v6130_v37, 4 }
 0x319   : > { %v2212_v47 = vrot.slane %v2211_v3, 2  ;;  %v2219_v42 = vrot.slane %v2218_v59, 2  ;;  %v2605_v23 = vadd.f32 %v6322_v41, %v2604_v4  ;;  %v2099_v0 = vmax.f32 %v1937_v19, 0.0 }
 0x31a   : > { %v1259_v19 = vmax.f32 %v6128_v34, %v1258_v6 }
 0x31b   : > { %5194 = vmatmul.msk.bf16.vlgmr.msrb.gmra.mxu0 %vm435_vm0, %v5365_v50  ;;  %v2213_v11 = vmax.f32 %v2211_v3, %v2212_v47  ;;  %v2220_v32 = vmax.f32 %v2218_v59, %v2219_v42  ;;  %v2100_v42 = vmax.f32 %v2026_v60, 0.0  ;;  %v2660_v22 = vmax.f32 %v2605_v23, 0.0  ;;  %v5366_v23 = vld [vmem:[%s5651_s17 + $0x38] sm:$0xff] }
 0x31c   : > { %v1846_v15 = vpop.f32.mrf.mxu1 }
 0x31d   : > { %v2214_v16 = vrot.slane %v2213_v11, 1  ;;  %v2221_v17 = vrot.slane %v2220_v32, 1  ;;  %v1847_v61 = vadd.f32 %v6378_v53, %v1846_v15  ;;  %v1248_v15 = vrot.slane %v1247_v21, 1 }
 0x31e   : > { %v1938_v33 = vpop.f32.mrf.mxu2  ;;  %v2027_v10 = vpop.f32.mrf.mxu3 }
 0x31f   : > { %v2215_v50 = vmax.f32 %v2213_v11, %v2214_v16  ;;  %v2222_v3 = vmax.f32 %v2220_v32, %v2221_v17  ;;  %v1880_v58 = vmax.f32 %v1847_v61, 0.0  ;;  %v1939_v18 = vadd.f32 %v1938_v33, %v6005_v38 }
 0x320   : > { %v2606_v59 = vpop.f32.mrf.mxu0  ;;  %v2028_v29 = vadd.f32 %v2027_v10, %v6007_v39  ;;  %v1255_v16 = vrot.slane %v1254_v56, 1 }
 0x321   : > { %v2607_v46 = vadd.f32 %v6322_v41, %v2606_v59  ;;  %v6410_v8 = vmax.f32 %v1393_v49, %v2215_v50  ;;  %v6412_v63 = vmax.f32 %v1394_v20, %v2222_v3  ;;  %v2101_v4 = vmax.f32 %v1939_v18, 0.0 }
 0x322   : > { %v1896_v47 = vpack.c.bf16 %v1880_v58, %v1879_v30  ;;  %v2102_v11 = vmax.f32 %v2028_v29, 0.0  ;;  %v1266_v20 = vmax.f32 %v6130_v37, %v1265_v40  ;;  %v1249_v3 = vmax.f32 %v1247_v21, %v1248_v15 }
 0x323   : > { %7220 = vst [vmem:[#allocation8_spill] sm:$0xff] %v6412_v63  ;;  %v2661_v32 = vmax.f32 %v2607_v46, 0.0  ;;  %v2223_v17 = vmax.f32 %v2099_v0, %v2101_v4  ;;  %v1256_v58 = vmax.f32 %v1254_v56, %v1255_v16  ;;  %v1260_v0 = vrot.slane %v1259_v19, 2 }
 0x324   : > { %1980 = vmatmul.bf16.gmra.mxu2 %v1896_v47  ;;  %2069 = vmatmul.bf16.gmra.mxu3 %v1896_v47  ;;  %v2230_v61 = vmax.f32 %v2100_v42, %v2102_v11  ;;  %v2749_v49 = vpop.f32.mrf.mxu1  ;;  %v1267_v46 = vrot.slane %v1266_v20, 2  ;;  %v1395_v37 = vmax.f32 %v1249_v3, 0.0  ;;  %v1272_v15 = vrot.slane %v6151_v26, 4 }
 0x325   : > { %v2684_v33 = vpack.c.bf16 %v2661_v32, %v2660_v22  ;;  %v2224_v10 = vrot.slane %v2223_v17, 4  ;;  %v2750_v4 = vadd.f32 %v6378_v53, %v2749_v49  ;;  %v1396_v40 = vmax.f32 %v1256_v58, 0.0 }
 0x326   : > { %v2231_v50 = vrot.slane %v2230_v61, 4  ;;  %v1941_v30 = vpop.f32.mrf.mxu2  ;;  %v2030_v60 = vpop.f32.mrf.mxu3  ;;  %v1261_v42 = vmax.f32 %v1259_v19, %v1260_v0  ;;  %v1268_v32 = vmax.f32 %v1266_v20, %v1267_v46 }
 0x327   : > { %v2225_v18 = vmax.f32 %v2223_v17, %v2224_v10  ;;  %5122 = vmatmul.msk.bf16.gmra.mxu1 %vm646_vm1, %v2684_v33  ;;  %v1942_v21 = vadd.f32 %v1941_v30, %v6005_v38  ;;  %v2031_v56 = vadd.f32 %v2030_v60, %v6007_v39  ;;  %v2829_v49 = vmax.f32 %v2750_v4, 0.0 }
 0x328   : > { %v2609_v59 = vpop.f32.mrf.mxu0  ;;  %v2232_v29 = vmax.f32 %v2230_v61, %v2231_v50  ;;  %v1279_v61 = vrot.slane %v6153_v28, 4 }
 0x329   : > { %v2226_v34 = vrot.slane %v2225_v18, 2  ;;  %v2610_v10 = vadd.f32 %v6322_v41, %v2609_v59  ;;  %v2104_v0 = vmax.f32 %v2031_v56, 0.0 }
 0x32a   : > { %v2233_v6 = vrot.slane %v2232_v29, 2 }
 0x32b   : > { %5195 = vmatmul.msk.bf16.gmra.mxu0 %vm435_vm0, %v5366_v23  ;;  %v2227_v47 = vmax.f32 %v2225_v18, %v2226_v34  ;;  %v2103_v18 = vmax.f32 %v1942_v21, 0.0  ;;  %v1273_v21 = vmax.f32 %v6151_v26, %v1272_v15 }
 0x32c   : > { %v2234_v22 = vmax.f32 %v2232_v29, %v2233_v6  ;;  %v2751_v11 = vpop.f32.mrf.mxu1 }
 0x32d   : > { %v2228_v16 = vrot.slane %v2227_v47, 1  ;;  %v2752_v17 = vadd.f32 %v6378_v53, %v2751_v11  ;;  %v2662_v11 = vmax.f32 %v2610_v10, 0.0 }
 0x32e   : > { %v2235_v33 = vrot.slane %v2234_v22, 1  ;;  %v1943_v50 = vpop.f32.mrf.mxu2  ;;  %v2032_v19 = vpop.f32.mrf.mxu3 }
 0x32f   : > { %v2229_v23 = vmax.f32 %v2227_v47, %v2228_v16  ;;  %v2830_v3 = vmax.f32 %v2752_v17, 0.0  ;;  %v1944_v30 = vadd.f32 %v1943_v50, %v6005_v38  ;;  %v2033_v60 = vadd.f32 %v2032_v19, %v6007_v39 }
 0x330   : > { %v2611_v20 = vpop.f32.mrf.mxu0  ;;  %v2236_v58 = vmax.f32 %v2234_v22, %v2235_v33  ;;  %v1262_v50 = vrot.slane %v1261_v42, 1  ;;  %v1269_v22 = vrot.slane %v1268_v32, 1 }
 0x331   : > { %v2612_v29 = vadd.f32 %v6322_v41, %v2611_v20  ;;  %v6429_v46 = vmax.f32 %v1395_v37, %v2229_v23  ;;  %v2861_v34 = vpack.c.bf16 %v2830_v3, %v2829_v49  ;;  %v2105_v6 = vmax.f32 %v1944_v30, 0.0  ;;  %v5367_v3 = vld [vmem:[%s5651_s17 + $0x58] sm:$0xff] }
 0x332   : > { %v2106_v4 = vmax.f32 %v2033_v60, 0.0  ;;  %v6431_v59 = vmax.f32 %v1396_v40, %v2236_v58  ;;  %v1280_v37 = vmax.f32 %v6153_v28, %v1279_v61  ;;  %v1263_v20 = vmax.f32 %v1261_v42, %v1262_v50 }
 0x333   : > { %v2663_v47 = vmax.f32 %v2612_v29, 0.0  ;;  %v2237_v16 = vmax.f32 %v2103_v18, %v2105_v6  ;;  %v1270_v58 = vmax.f32 %v1268_v32, %v1269_v22  ;;  %v1274_v18 = vrot.slane %v1273_v21, 2 }
 0x334   : > { %v2244_v17 = vmax.f32 %v2104_v0, %v2106_v4  ;;  %2885 = vmatmul.bf16.vlgmr.msra.gmra.mxu2 %v2861_v34  ;;  %2974 = vmatmul.bf16.vlgmr.msra.gmra.mxu3 %v2861_v34  ;;  %v2754_v33 = vpop.f32.mrf.mxu1  ;;  %v1281_v0 = vrot.slane %v1280_v37, 2  ;;  %v1397_v34 = vmax.f32 %v1263_v20, 0.0  ;;  %v1286_v50 = vrot.slane %v6179_v12, 4 }
 0x335   : > { %v2685_v56 = vpack.c.bf16 %v2663_v47, %v2662_v11  ;;  %v2238_v49 = vrot.slane %v2237_v16, 4  ;;  %v2755_v15 = vadd.f32 %v6378_v53, %v2754_v33  ;;  %v1398_v6 = vmax.f32 %v1270_v58, 0.0 }
 0x336   : > { %v2245_v19 = vrot.slane %v2244_v17, 4  ;;  %v1946_v23 = vpop.f32.mrf.mxu2  ;;  %v2035_v40 = vpop.f32.mrf.mxu3  ;;  %v1275_v4 = vmax.f32 %v1273_v21, %v1274_v18 }
 0x337   : > { %v2239_v10 = vmax.f32 %v2237_v16, %v2238_v49  ;;  %5123 = vmatmul.msk.bf16.gmra.mxu1 %vm646_vm1, %v2685_v56  ;;  %v1947_v11 = vadd.f32 %v1946_v23, %v6005_v38  ;;  %v1282_v16 = vmax.f32 %v1280_v37, %v1281_v0  ;;  %v2831_v22 = vmax.f32 %v2755_v15, 0.0 }
 0x338   : > { %v2246_v30 = vmax.f32 %v2244_v17, %v2245_v19  ;;  %v2614_v60 = vpop.f32.mrf.mxu0  ;;  %v2036_v56 = vadd.f32 %v2035_v40, %v6007_v39  ;;  %v1293_v37 = vrot.slane %v6181_v5, 4 }
 0x339   : > { %v2240_v29 = vrot.slane %v2239_v10, 2  ;;  %v2615_v33 = vadd.f32 %v6322_v41, %v2614_v60  ;;  %v2107_v20 = vmax.f32 %v1947_v11, 0.0  ;;  %v1287_v11 = vmax.f32 %v6179_v12, %v1286_v50 }
 0x33a   : > { %v2247_v26 = vrot.slane %v2246_v30, 2 }
 0x33b   : > { %5196 = vmatmul.msk.bf16.gmra.mxu0 %vm435_vm0, %v5367_v3  ;;  %v2241_v28 = vmax.f32 %v2239_v10, %v2240_v29  ;;  %v2664_v15 = vmax.f32 %v2615_v33, 0.0  ;;  %v5368_v33 = vld [vmem:[%s5651_s17 + $0x78] sm:$0xff] }
 0x33c   : > { %v2248_v61 = vmax.f32 %v2246_v30, %v2247_v26  ;;  %v2756_v47 = vpop.f32.mrf.mxu1  ;;  %v2108_v26 = vmax.f32 %v2036_v56, 0.0 }
 0x33d   : > { %v2242_v17 = vrot.slane %v2241_v28, 1  ;;  %v2757_v32 = vadd.f32 %v6378_v53, %v2756_v47  ;;  %v1276_v47 = vrot.slane %v1275_v4, 1 }
 0x33e   : > { %v2249_v42 = vrot.slane %v2248_v61, 1  ;;  %v1948_v49 = vpop.f32.mrf.mxu2  ;;  %v2037_v19 = vpop.f32.mrf.mxu3 }
 0x33f   : > { %v2243_v3 = vmax.f32 %v2241_v28, %v2242_v17  ;;  %v2832_v21 = vmax.f32 %v2757_v32, 0.0  ;;  %v1949_v23 = vadd.f32 %v1948_v49, %v6005_v38  ;;  %v2038_v58 = vadd.f32 %v2037_v19, %v6007_v39 }
 0x340   : > { %v2250_v10 = vmax.f32 %v2248_v61, %v2249_v42  ;;  %v2616_v30 = vpop.f32.mrf.mxu0  ;;  %v1283_v17 = vrot.slane %v1282_v16, 1 }
 0x341   : > { %v2617_v18 = vadd.f32 %v6322_v41, %v2616_v30  ;;  %v6448_v0 = vmax.f32 %v1397_v34, %v2243_v3  ;;  %v2109_v60 = vmax.f32 %v1949_v23, 0.0  ;;  %v2862_v29 = vpack.c.bf16 %v2832_v21, %v2831_v22 }
 0x342   : > { %v6450_v40 = vmax.f32 %v1398_v6, %v2250_v10  ;;  %v2110_v28 = vmax.f32 %v2038_v58, 0.0  ;;  %v1294_v6 = vmax.f32 %v6181_v5, %v1293_v37  ;;  %v1277_v10 = vmax.f32 %v1275_v4, %v1276_v47 }
 0x343   : > { %v2665_v61 = vmax.f32 %v2617_v18, 0.0  ;;  %v2251_v42 = vmax.f32 %v2107_v20, %v2109_v60  ;;  %v1284_v21 = vmax.f32 %v1282_v16, %v1283_v17  ;;  %v1288_v20 = vrot.slane %v1287_v11, 2 }
 0x344   : > { %7221 = vst [vmem:[#allocation9_spill] sm:$0xff] %v6450_v40  ;;  %2890 = vmatmul.bf16.gmra.mxu2 %v2862_v29  ;;  %2979 = vmatmul.bf16.gmra.mxu3 %v2862_v29  ;;  %v2258_v32 = vmax.f32 %v2108_v26, %v2110_v28  ;;  %v2759_v34 = vpop.f32.mrf.mxu1  ;;  %v1295_v18 = vrot.slane %v1294_v6, 2  ;;  %v1399_v5 = vmax.f32 %v1277_v10, 0.0  ;;  %v1300_v47 = vrot.slane %v6194_v51, 4 }
 0x345   : > { %v2686_v49 = vpack.c.bf16 %v2665_v61, %v2664_v15  ;;  %v2252_v19 = vrot.slane %v2251_v42, 4  ;;  %v2760_v60 = vadd.f32 %v6378_v53, %v2759_v34  ;;  %v1400_v37 = vmax.f32 %v1284_v21, 0.0 }
 0x346   : > { %v2259_v3 = vrot.slane %v2258_v32, 4  ;;  %v1951_v22 = vpop.f32.mrf.mxu2  ;;  %v2040_v56 = vpop.f32.mrf.mxu3  ;;  %v1289_v26 = vmax.f32 %v1287_v11, %v1288_v20  ;;  %v1296_v61 = vmax.f32 %v1294_v6, %v1295_v18 }
 0x347   : > { %v2253_v23 = vmax.f32 %v2251_v42, %v2252_v19  ;;  %5124 = vmatmul.msk.bf16.gmra.mxu1 %vm646_vm1, %v2686_v49  ;;  %v1952_v4 = vadd.f32 %v1951_v22, %v6005_v38  ;;  %v2041_v16 = vadd.f32 %v2040_v56, %v6007_v39  ;;  %v2833_v34 = vmax.f32 %v2760_v60, 0.0 }
 0x348   : > { %v2619_v30 = vpop.f32.mrf.mxu0  ;;  %v2260_v58 = vmax.f32 %v2258_v32, %v2259_v3  ;;  %v1307_v32 = vrot.slane %v6196_v54, 4 }
 0x349   : > { %v2254_v12 = vrot.slane %v2253_v23, 2  ;;  %v2620_v19 = vadd.f32 %v6322_v41, %v2619_v30  ;;  %v2112_v20 = vmax.f32 %v2041_v16, 0.0 }
 0x34a   : > { %v2261_v50 = vrot.slane %v2260_v58, 2 }
 0x34b   : > { %5197 = vmatmul.msk.bf16.gmra.mxu0 %vm435_vm0, %v5368_v33  ;;  %v2255_v29 = vmax.f32 %v2253_v23, %v2254_v12  ;;  %v2111_v23 = vmax.f32 %v1952_v4, 0.0  ;;  %v1301_v4 = vmax.f32 %v6194_v51, %v1300_v47 }
 0x34c   : > { %v2262_v15 = vmax.f32 %v2260_v58, %v2261_v50  ;;  %v2761_v28 = vpop.f32.mrf.mxu1 }
 0x34d   : > { %v2256_v17 = vrot.slane %v2255_v29, 1  ;;  %v2762_v42 = vadd.f32 %v6378_v53, %v2761_v28  ;;  %v2666_v28 = vmax.f32 %v2620_v19, 0.0 }
 0x34e   : > { %v2263_v49 = vrot.slane %v2262_v15, 1  ;;  %v1953_v3 = vpop.f32.mrf.mxu2  ;;  %v2042_v11 = vpop.f32.mrf.mxu3 }
 0x34f   : > { %v2257_v33 = vmax.f32 %v2255_v29, %v2256_v17  ;;  %v2834_v10 = vmax.f32 %v2762_v42, 0.0  ;;  %v1954_v22 = vadd.f32 %v1953_v3, %v6005_v38  ;;  %v2043_v56 = vadd.f32 %v2042_v11, %v6007_v39 }
 0x350   : > { %v2621_v6 = vpop.f32.mrf.mxu0  ;;  %v2264_v21 = vmax.f32 %v2262_v15, %v2263_v49  ;;  %v1290_v3 = vrot.slane %v1289_v26, 1  ;;  %v1297_v15 = vrot.slane %v1296_v61, 1 }
 0x351   : > { %v2622_v58 = vadd.f32 %v6322_v41, %v2621_v6  ;;  %v6467_v18 = vmax.f32 %v1399_v5, %v2257_v33  ;;  %v2113_v12 = vmax.f32 %v1954_v22, 0.0  ;;  %v2114_v50 = vmax.f32 %v2043_v56, 0.0 }
 0x352   : > { %v2863_v60 = vpack.c.bf16 %v2834_v10, %v2833_v34  ;;  %v6469_v30 = vmax.f32 %v1400_v37, %v2264_v21  ;;  %v1308_v5 = vmax.f32 %v6196_v54, %v1307_v32  ;;  %v5369_v10 = vld [vmem:[%s5651_s17 + $0x98] sm:$0xff]  ;;  %v1291_v6 = vmax.f32 %v1289_v26, %v1290_v3 }
 0x353   : > { %v2667_v29 = vmax.f32 %v2622_v58, 0.0  ;;  %v2265_v17 = vmax.f32 %v2111_v23, %v2113_v12  ;;  %v2272_v42 = vmax.f32 %v2112_v20, %v2114_v50  ;;  %v1298_v21 = vmax.f32 %v1296_v61, %v1297_v15 }
 0x354   : > { %7222 = vst [vmem:[#allocation10_spill] sm:$0xff] %v6469_v30  ;;  %2895 = vmatmul.bf16.gmra.mxu2 %v2863_v60  ;;  %2984 = vmatmul.bf16.gmra.mxu3 %v2863_v60  ;;  %v2764_v49 = vpop.f32.mrf.mxu1  ;;  %v1302_v23 = vrot.slane %v1301_v4, 2  ;;  %v1309_v20 = vrot.slane %v1308_v5, 2  ;;  %v1401_v12 = vmax.f32 %v1291_v6, 0.0  ;;  %v1314_v3 = vrot.slane %v6209_v9, 4 }
 0x355   : > { %v2687_v16 = vpack.c.bf16 %v2667_v29, %v2666_v28  ;;  %v2266_v11 = vrot.slane %v2265_v17, 4  ;;  %v2273_v33 = vrot.slane %v2272_v42, 4  ;;  %v2765_v47 = vadd.f32 %v6378_v53, %v2764_v49 }
 0x356   : > { %v1402_v50 = vmax.f32 %v1298_v21, 0.0  ;;  %v1303_v60 = vmax.f32 %v1301_v4, %v1302_v23 }
 0x357   : > { %v1956_v34 = vpop.f32.mrf.mxu2  ;;  %v2045_v37 = vpop.f32.mrf.mxu3  ;;  %v2267_v19 = vmax.f32 %v2265_v17, %v2266_v11  ;;  %v2274_v22 = vmax.f32 %v2272_v42, %v2273_v33  ;;  %5125 = vmatmul.msk.bf16.gmra.mxu1 %vm646_vm1, %v2687_v16  ;;  %v1310_v17 = vmax.f32 %v1308_v5, %v1309_v20  ;;  %v2835_v15 = vmax.f32 %v2765_v47, 0.0 }
 0x358   : > { %v2624_v56 = vpop.f32.mrf.mxu0  ;;  %v1957_v28 = vadd.f32 %v1956_v34, %v6005_v38  ;;  %v2046_v16 = vadd.f32 %v2045_v37, %v6007_v39  ;;  %v1321_v5 = vrot.slane %v6211_v27, 4 }
 0x359   : > { %v2268_v58 = vrot.slane %v2267_v19, 2  ;;  %v2275_v51 = vrot.slane %v2274_v22, 2  ;;  %v2625_v49 = vadd.f32 %v6322_v41, %v2624_v56 }
 0x35a   : > { %v2115_v6 = vmax.f32 %v1957_v28, 0.0  ;;  %v1315_v28 = vmax.f32 %v6209_v9, %v1314_v3 }
 0x35b   : > { %5198 = vmatmul.msk.bf16.gmra.mxu0 %vm435_vm0, %v5369_v10  ;;  %v2269_v54 = vmax.f32 %v2267_v19, %v2268_v58  ;;  %v2276_v32 = vmax.f32 %v2274_v22, %v2275_v51  ;;  %v2116_v51 = vmax.f32 %v2046_v16, 0.0  ;;  %v2668_v47 = vmax.f32 %v2625_v49, 0.0  ;;  %v5370_v49 = vld [vmem:[%s5651_s17 + $0xb8] sm:$0xff] }
 0x35c   : > { %v2766_v29 = vpop.f32.mrf.mxu1 }
 0x35d   : > { %v2270_v42 = vrot.slane %v2269_v54, 1  ;;  %v2277_v26 = vrot.slane %v2276_v32, 1  ;;  %v2767_v61 = vadd.f32 %v6378_v53, %v2766_v29  ;;  %v1304_v29 = vrot.slane %v1303_v60, 1 }
 0x35f   : > { %v1958_v11 = vpop.f32.mrf.mxu2  ;;  %v2047_v33 = vpop.f32.mrf.mxu3  ;;  %v2271_v10 = vmax.f32 %v2269_v54, %v2270_v42  ;;  %v2278_v19 = vmax.f32 %v2276_v32, %v2277_v26  ;;  %v2836_v4 = vmax.f32 %v2767_v61, 0.0  ;;  %v1311_v42 = vrot.slane %v1310_v17, 1 }
 0x360   : > { %v1959_v34 = vadd.f32 %v1958_v11, %v6005_v38  ;;  %v2626_v22 = vpop.f32.mrf.mxu0  ;;  %v2048_v21 = vadd.f32 %v2047_v33, %v6007_v39 }
 0x361   : > { %v2627_v23 = vadd.f32 %v6322_v41, %v2626_v22  ;;  %v6486_v20 = vmax.f32 %v1401_v12, %v2271_v10  ;;  %v6488_v37 = vmax.f32 %v1402_v50, %v2278_v19  ;;  %v2864_v58 = vpack.c.bf16 %v2836_v4, %v2835_v15 }
 0x362   : > { %v2117_v56 = vmax.f32 %v1959_v34, 0.0  ;;  %v2118_v54 = vmax.f32 %v2048_v21, 0.0  ;;  %v1322_v50 = vmax.f32 %v6211_v27, %v1321_v5  ;;  %v1305_v10 = vmax.f32 %v1303_v60, %v1304_v29 }
 0x363   : > { %7223 = vst [vmem:[#allocation11_spill] sm:$0xff] %v6488_v37  ;;  %v2669_v32 = vmax.f32 %v2627_v23, 0.0  ;;  %v1312_v19 = vmax.f32 %v1310_v17, %v1311_v42  ;;  %v1316_v22 = vrot.slane %v1315_v28, 2 }
 0x364   : > { %v2279_v26 = vmax.f32 %v2115_v6, %v2117_v56  ;;  %2900 = vmatmul.bf16.gmra.mxu2 %v2864_v58  ;;  %2989 = vmatmul.bf16.gmra.mxu3 %v2864_v58  ;;  %v2286_v61 = vmax.f32 %v2116_v51, %v2118_v54  ;;  %v2769_v12 = vpop.f32.mrf.mxu1  ;;  %v1323_v21 = vrot.slane %v1322_v50, 2  ;;  %v1403_v27 = vmax.f32 %v1305_v10, 0.0 }
 0x365   : > { %v2688_v41 = vpack.c.bf16 %v2669_v32, %v2668_v47  ;;  %v2770_v23 = vadd.f32 %v6378_v53, %v2769_v12  ;;  %v1404_v5 = vmax.f32 %v1312_v19, 0.0  ;;  %v1317_v58 = vmax.f32 %v1315_v28, %v1316_v22  ;;  %v6504_v28 = vld [vmem:[%s7186_s5] ss:$0 sm:$0xff] }
 0x366   : > { %v2280_v11 = vrot.slane %v2279_v26, 4  ;;  %v2287_v33 = vrot.slane %v2286_v61, 4  ;;  %v1324_v54 = vmax.f32 %v1322_v50, %v1323_v21  ;;  %v1328_v32 = vrot.slane %v6224_v24, 4 }
 0x367   : > { %v1961_v15 = vpop.f32.mrf.mxu2  ;;  %v2050_v16 = vpop.f32.mrf.mxu3  ;;  %5126 = vmatmul.msk.bf16.gmra.mxu1 %vm646_vm1, %v2688_v41  ;;  %v2837_v41 = vmax.f32 %v2770_v23, 0.0 }
 0x368   : > { %v2281_v4 = vmax.f32 %v2279_v26, %v2280_v11  ;;  %v2629_v34 = vpop.f32.mrf.mxu0  ;;  %v2288_v6 = vmax.f32 %v2286_v61, %v2287_v33  ;;  %v1962_v60 = vadd.f32 %v1961_v15, %v6005_v38  ;;  %v2051_v17 = vadd.f32 %v2050_v16, %v6007_v39 }
 0x369   : > { %v1335_v26 = vrot.slane %v6226_v25, 4  ;;  %v2630_v12 = vadd.f32 %v6504_v28, %v2629_v34 }
 0x36a   : > { %v2282_v9 = vrot.slane %v2281_v4, 2  ;;  %v2289_v3 = vrot.slane %v2288_v6, 2  ;;  %v2120_v22 = vmax.f32 %v2051_v17, 0.0 }
 0x36b   : > { %5199 = vmatmul.msk.bf16.gmra.mxu0 %vm435_vm0, %v5370_v49 }
 0x36c   : > { %v2283_v56 = vmax.f32 %v2281_v4, %v2282_v9  ;;  %v2290_v51 = vmax.f32 %v2288_v6, %v2289_v3  ;;  %v2771_v47 = vpop.f32.mrf.mxu1  ;;  %v2119_v4 = vmax.f32 %v1962_v60, 0.0  ;;  %v1329_v60 = vmax.f32 %v6224_v24, %v1328_v32 }
 0x36d   : > { %v2772_v42 = vadd.f32 %v6378_v53, %v2771_v47  ;;  %v2670_v47 = vmax.f32 %v2630_v12, 0.0 }
 0x36e   : > { %v2284_v29 = vrot.slane %v2283_v56, 1  ;;  %v2291_v61 = vrot.slane %v2290_v51, 1 }
 0x36f   : > { %v1963_v11 = vpop.f32.mrf.mxu2  ;;  %v2052_v33 = vpop.f32.mrf.mxu3  ;;  %v2838_v50 = vmax.f32 %v2772_v42, 0.0 }
 0x370   : > { %v2285_v15 = vmax.f32 %v2283_v56, %v2284_v29  ;;  %v1964_v16 = vadd.f32 %v1963_v11, %v6005_v38  ;;  %v2053_v49 = vadd.f32 %v2052_v33, %v6007_v39  ;;  %v2631_v10 = vpop.f32.mrf.mxu0  ;;  %v2292_v19 = vmax.f32 %v2290_v51, %v2291_v61 }
 0x371   : > { %v2632_v6 = vadd.f32 %v6504_v28, %v2631_v10  ;;  %v2865_v23 = vpack.c.bf16 %v2838_v50, %v2837_v41  ;;  %v1318_v11 = vrot.slane %v1317_v58, 1  ;;  %v1325_v51 = vrot.slane %v1324_v54, 1  ;;  %v5371_v50 = vld [vmem:[%s5651_s17 + $0xd8] sm:$0xff] }
 0x372   : > { %v6510_v21 = vmax.f32 %v1403_v27, %v2285_v15  ;;  %v2121_v9 = vmax.f32 %v1964_v16, 0.0  ;;  %v2122_v3 = vmax.f32 %v2053_v49, 0.0  ;;  %v6512_v34 = vmax.f32 %v1404_v5, %v2292_v19 }
 0x373   : > { %v2671_v56 = vmax.f32 %v2632_v6, 0.0  ;;  %v1336_v27 = vmax.f32 %v6226_v25, %v1335_v26  ;;  %v1319_v10 = vmax.f32 %v1317_v58, %v1318_v11  ;;  %v1326_v19 = vmax.f32 %v1324_v54, %v1325_v51 }
 0x374   : > { %7224 = vst [vmem:[#allocation12_spill] sm:$0xff] %v6512_v34  ;;  %v2293_v29 = vmax.f32 %v2119_v4, %v2121_v9  ;;  %v2300_v42 = vmax.f32 %v2120_v22, %v2122_v3  ;;  %2905 = vmatmul.bf16.gmra.mxu2 %v2865_v23  ;;  %2994 = vmatmul.bf16.gmra.mxu3 %v2865_v23  ;;  %v2774_v61 = vpop.f32.mrf.mxu1  ;;  %v1330_v4 = vrot.slane %v1329_v60, 2  ;;  %v1342_v11 = vrot.slane %v6239_v13, 4 }
 0x375   : > { %v2689_v17 = vpack.c.bf16 %v2671_v56, %v2670_v47  ;;  %v1337_v22 = vrot.slane %v1336_v27, 2  ;;  %v2775_v32 = vadd.f32 %v6378_v53, %v2774_v61  ;;  %v1405_v9 = vmax.f32 %v1319_v10, 0.0 }
 0x376   : > { %v2294_v33 = vrot.slane %v2293_v29, 4  ;;  %v2301_v15 = vrot.slane %v2300_v42, 4  ;;  %v1406_v3 = vmax.f32 %v1326_v19, 0.0  ;;  %v1331_v23 = vmax.f32 %v1329_v60, %v1330_v4 }
 0x377   : > { %v1966_v41 = vpop.f32.mrf.mxu2  ;;  %v2055_v5 = vpop.f32.mrf.mxu3  ;;  %5127 = vmatmul.msk.bf16.gmra.mxu1 %vm646_vm1, %v2689_v17  ;;  %v2839_v51 = vmax.f32 %v2775_v32, 0.0 }
 0x378   : > { %v2295_v12 = vmax.f32 %v2293_v29, %v2294_v33  ;;  %v2302_v16 = vmax.f32 %v2300_v42, %v2301_v15  ;;  %v2634_v49 = vpop.f32.mrf.mxu0  ;;  %v1967_v47 = vadd.f32 %v1966_v41, %v6005_v38  ;;  %v1338_v29 = vmax.f32 %v1336_v27, %v1337_v22 }
 0x379   : > { %v2056_v17 = vadd.f32 %v2055_v5, %v6007_v39  ;;  %v2635_v61 = vadd.f32 %v6504_v28, %v2634_v49  ;;  %v1349_v27 = vrot.slane %v6241_v14, 4 }
 0x37a   : > { %v2296_v6 = vrot.slane %v2295_v12, 2  ;;  %v2303_v24 = vrot.slane %v2302_v16, 2  ;;  %v2123_v10 = vmax.f32 %v1967_v47, 0.0  ;;  %v1339_v47 = vrot.slane %v1338_v29, 1 }
 0x37b   : > { %5200 = vmatmul.msk.bf16.gmra.mxu0 %vm435_vm0, %v5371_v50  ;;  %v2672_v32 = vmax.f32 %v2635_v61, 0.0  ;;  %v5372_v61 = vld [vmem:[%s5651_s17 + $0xf8] sm:$0xff] }
 0x37c   : > { %v2297_v25 = vmax.f32 %v2295_v12, %v2296_v6  ;;  %v2304_v26 = vmax.f32 %v2302_v16, %v2303_v24  ;;  %v2776_v56 = vpop.f32.mrf.mxu1  ;;  %v2124_v24 = vmax.f32 %v2056_v17, 0.0 }
 0x37d   : > { %v2777_v54 = vadd.f32 %v6378_v53, %v2776_v56  ;;  %v1332_v56 = vrot.slane %v1331_v23, 1 }
 0x37e   : > { %v2298_v42 = vrot.slane %v2297_v25, 1  ;;  %v2305_v58 = vrot.slane %v2304_v26, 1 }
 0x37f   : > { %v1968_v33 = vpop.f32.mrf.mxu2  ;;  %v2057_v15 = vpop.f32.mrf.mxu3  ;;  %v2840_v60 = vmax.f32 %v2777_v54, 0.0 }
 0x380   : > { %v2299_v50 = vmax.f32 %v2297_v25, %v2298_v42  ;;  %v2306_v12 = vmax.f32 %v2304_v26, %v2305_v58  ;;  %v1969_v41 = vadd.f32 %v1968_v33, %v6005_v38  ;;  %v2636_v16 = vpop.f32.mrf.mxu0  ;;  %v2058_v19 = vadd.f32 %v2057_v15, %v6007_v39 }
 0x381   : > { %v2637_v4 = vadd.f32 %v6504_v28, %v2636_v16  ;;  %v2866_v6 = vpack.c.bf16 %v2840_v60, %v2839_v51  ;;  %v1340_v16 = vmax.f32 %v1338_v29, %v1339_v47  ;;  %v1356_v47 = vrot.slane %v6254_v52, 4 }
 0x382   : > { %v6529_v22 = vmax.f32 %v1405_v9, %v2299_v50  ;;  %v6531_v5 = vmax.f32 %v1406_v3, %v2306_v12  ;;  %v2125_v49 = vmax.f32 %v1969_v41, 0.0  ;;  %v2126_v25 = vmax.f32 %v2058_v19, 0.0 }
 0x383   : > { %v2673_v26 = vmax.f32 %v2637_v4, 0.0  ;;  %v1343_v9 = vmax.f32 %v6239_v13, %v1342_v11  ;;  %v1350_v3 = vmax.f32 %v6241_v14, %v1349_v27  ;;  %v1333_v12 = vmax.f32 %v1331_v23, %v1332_v56 }
 0x384   : > { %v2307_v42 = vmax.f32 %v2123_v10, %v2125_v49  ;;  %2910 = vmatmul.bf16.gmra.mxu2 %v2866_v6  ;;  %2999 = vmatmul.bf16.gmra.mxu3 %v2866_v6  ;;  %v2314_v58 = vmax.f32 %v2124_v24, %v2126_v25  ;;  %v2779_v33 = vpop.f32.mrf.mxu1  ;;  %v1408_v27 = vmax.f32 %v1340_v16, 0.0 }
 0x385   : > { %v2690_v54 = vpack.c.bf16 %v2673_v26, %v2672_v32  ;;  %v1344_v19 = vrot.slane %v1343_v9, 2  ;;  %v1351_v4 = vrot.slane %v1350_v3, 2  ;;  %v2780_v13 = vadd.f32 %v6378_v53, %v2779_v33 }
 0x386   : > { %v2308_v15 = vrot.slane %v2307_v42, 4  ;;  %v2315_v50 = vrot.slane %v2314_v58, 4  ;;  %v1407_v14 = vmax.f32 %v1333_v12, 0.0 }
 0x387   : > { %v1971_v51 = vpop.f32.mrf.mxu2  ;;  %v2060_v17 = vpop.f32.mrf.mxu3  ;;  %5128 = vmatmul.msk.bf16.gmra.mxu1 %vm646_vm1, %v2690_v54  ;;  %v1345_v26 = vmax.f32 %v1343_v9, %v1344_v19  ;;  %v1352_v29 = vmax.f32 %v1350_v3, %v1351_v4  ;;  %v2841_v54 = vmax.f32 %v2780_v13, 0.0 }
 0x388   : > { %v2309_v60 = vmax.f32 %v2307_v42, %v2308_v15  ;;  %v2639_v41 = vpop.f32.mrf.mxu0  ;;  %v2316_v10 = vmax.f32 %v2314_v58, %v2315_v50  ;;  %v1972_v23 = vadd.f32 %v1971_v51, %v6005_v38  ;;  %v2061_v32 = vadd.f32 %v2060_v17, %v6007_v39 }
 0x389   : > { %v2640_v33 = vadd.f32 %v6504_v28, %v2639_v41  ;;  %v1363_v41 = vrot.slane %v6256_v55, 4 }
 0x38a   : > { %v2310_v49 = vrot.slane %v2309_v60, 2  ;;  %v2317_v6 = vrot.slane %v2316_v10, 2  ;;  %v2127_v3 = vmax.f32 %v1972_v23, 0.0  ;;  %v2128_v16 = vmax.f32 %v2061_v32, 0.0 }
 0x38b   : > { %5201 = vmatmul.msk.bf16.gmra.mxu0 %vm435_vm0, %v5372_v61  ;;  %v2674_v13 = vmax.f32 %v2640_v33, 0.0  ;;  %v1353_v23 = vrot.slane %v1352_v29, 1 }
 0x38c   : > { %v2311_v11 = vmax.f32 %v2309_v60, %v2310_v49  ;;  %v2318_v24 = vmax.f32 %v2316_v10, %v2317_v6  ;;  %v2781_v25 = vpop.f32.mrf.mxu1 }
 0x38d   : > { %v2782_v42 = vadd.f32 %v6378_v53, %v2781_v25 }
 0x38e   : > { %v2312_v56 = vrot.slane %v2311_v11, 1  ;;  %v2319_v58 = vrot.slane %v2318_v24, 1 }
 0x38f   : > { %v1973_v15 = vpop.f32.mrf.mxu2  ;;  %v2062_v50 = vpop.f32.mrf.mxu3  ;;  %v2842_v12 = vmax.f32 %v2782_v42, 0.0 }
 0x390   : > { %v2313_v61 = vmax.f32 %v2311_v11, %v2312_v56  ;;  %v1974_v51 = vadd.f32 %v1973_v15, %v6005_v38  ;;  %v2063_v17 = vadd.f32 %v2062_v50, %v6007_v39  ;;  %v2641_v60 = vpop.f32.mrf.mxu0  ;;  %v2320_v9 = vmax.f32 %v2318_v24, %v2319_v58 }
 0x391   : > { %v2642_v53 = vadd.f32 %v6504_v28, %v2641_v60  ;;  %v2867_v49 = vpack.c.bf16 %v2842_v12, %v2841_v54  ;;  %v1346_v24 = vrot.slane %v1345_v26, 1  ;;  %v1364_v54 = vmax.f32 %v6256_v55, %v1363_v41 }
 0x392   : > { %v6547_v10 = vmax.f32 %v1407_v14, %v2313_v61  ;;  %v2129_v19 = vmax.f32 %v1974_v51, 0.0  ;;  %v2130_v4 = vmax.f32 %v2063_v17, 0.0  ;;  %v6550_v6 = vmax.f32 %v1408_v27, %v2320_v9  ;;  %v5373_v61 = vld [vmem:[%s5651_s17 + $0x118] sm:$0xff] }
 0x393   : > { %v2675_v11 = vmax.f32 %v2642_v53, 0.0  ;;  %v1357_v14 = vmax.f32 %v6254_v52, %v1356_v47  ;;  %v1347_v17 = vmax.f32 %v1345_v26, %v1346_v24  ;;  %v1354_v60 = vmax.f32 %v1352_v29, %v1353_v23  ;;  %v6559_v52 = vld [vmem:[%s7186_s5 + $0x1] ss:$0 sm:$0xff] }
 0x394   : > { %v2321_v25 = vmax.f32 %v2127_v3, %v2129_v19  ;;  %v2328_v56 = vmax.f32 %v2128_v16, %v2130_v4  ;;  %2915 = vmatmul.bf16.gmra.mxu2 %v2867_v49  ;;  %3004 = vmatmul.bf16.gmra.mxu3 %v2867_v49  ;;  %v2784_v42 = vpop.f32.mrf.mxu1  ;;  %v1365_v53 = vrot.slane %v1364_v54, 2 }
 0x395   : > { %v2691_v32 = vpack.c.bf16 %v2675_v11, %v2674_v13  ;;  %v1358_v9 = vrot.slane %v1357_v14, 2  ;;  %v2785_v55 = vadd.f32 %v6559_v52, %v2784_v42  ;;  %v1409_v4 = vmax.f32 %v1347_v17, 0.0 }
 0x396   : > { %v2322_v58 = vrot.slane %v2321_v25, 4  ;;  %v2329_v15 = vrot.slane %v2328_v56, 4  ;;  %v1410_v49 = vmax.f32 %v1354_v60, 0.0 }
 0x397   : > { %v1976_v50 = vpop.f32.mrf.mxu2  ;;  %v2065_v27 = vpop.f32.mrf.mxu3  ;;  %5129 = vmatmul.msk.bf16.gmra.mxu1 %vm646_vm1, %v2691_v32  ;;  %v1359_v41 = vmax.f32 %v1357_v14, %v1358_v9  ;;  %v2843_v24 = vmax.f32 %v2785_v55, 0.0  ;;  %v1370_v14 = vrot.slane %v6271_v1, 4 }
 0x398   : > { %v2323_v33 = vmax.f32 %v2321_v25, %v2322_v58  ;;  %v2330_v12 = vmax.f32 %v2328_v56, %v2329_v15  ;;  %v3544_v51 = vpop.f32.mrf.mxu0  ;;  %v1977_v26 = vadd.f32 %v1976_v50, %v6005_v38  ;;  %v1366_v56 = vmax.f32 %v1364_v54, %v1365_v53 }
 0x399   : > { %v2066_v23 = vadd.f32 %v2065_v27, %v6007_v39  ;;  %v3545_v32 = vadd.f32 %v6504_v28, %v3544_v51 }
 0x39a   : > { %v2324_v3 = vrot.slane %v2323_v33, 2  ;;  %v2331_v16 = vrot.slane %v2330_v12, 2  ;;  %v2131_v17 = vmax.f32 %v1977_v26, 0.0 }
 0x39b   : > { %5202 = vmatmul.msk.bf16.gmra.mxu0 %vm435_vm0, %v5373_v61  ;;  %v3624_v53 = vmax.f32 %v3545_v32, 0.0  ;;  %v5374_v32 = vld [vmem:[%s5651_s17 + $0x138] sm:$0xff] }
 0x39c   : > { %v2325_v47 = vmax.f32 %v2323_v33, %v2324_v3  ;;  %v2332_v19 = vmax.f32 %v2330_v12, %v2331_v16  ;;  %v2786_v29 = vpop.f32.mrf.mxu1  ;;  %v2132_v16 = vmax.f32 %v2066_v23, 0.0 }
 0x39d   : > { %v2787_v25 = vadd.f32 %v6559_v52, %v2786_v29  ;;  %v1360_v29 = vrot.slane %v1359_v41, 1 }
 0x39e   : > { %v2326_v13 = vrot.slane %v2325_v47, 1  ;;  %v2333_v11 = vrot.slane %v2332_v19, 1 }
 0x39f   : > { %v1978_v42 = vpop.f32.mrf.mxu2  ;;  %v2067_v58 = vpop.f32.mrf.mxu3  ;;  %v2844_v33 = vmax.f32 %v2787_v25, 0.0  ;;  %v1367_v25 = vrot.slane %v1366_v56, 1 }
 0x3a0   : > { %v2327_v15 = vmax.f32 %v2325_v47, %v2326_v13  ;;  %v2334_v61 = vmax.f32 %v2332_v19, %v2333_v11  ;;  %v1979_v12 = vadd.f32 %v1978_v42, %v6005_v38  ;;  %v3546_v50 = vpop.f32.mrf.mxu0  ;;  %v2068_v60 = vadd.f32 %v2067_v58, %v6007_v39 }
 0x3a1   : > { %v3547_v54 = vadd.f32 %v6504_v28, %v3546_v50  ;;  %v2868_v3 = vpack.c.bf16 %v2844_v33, %v2843_v24  ;;  %v1361_v33 = vmax.f32 %v1359_v41, %v1360_v29  ;;  %v1368_v50 = vmax.f32 %v1366_v56, %v1367_v25 }
 0x3a2   : > { %v6571_v9 = vmax.f32 %v1409_v4, %v2327_v15  ;;  %v6573_v27 = vmax.f32 %v1410_v49, %v2334_v61  ;;  %v2133_v51 = vmax.f32 %v1979_v12, 0.0  ;;  %v2134_v55 = vmax.f32 %v2068_v60, 0.0 }
 0x3a3   : > { %v3625_v47 = vmax.f32 %v3547_v54, 0.0  ;;  %v1377_v4 = vrot.slane %v6273_v2, 4  ;;  %v1371_v49 = vmax.f32 %v6271_v1, %v1370_v14  ;;  %v1411_v14 = vmax.f32 %v1361_v33, 0.0 }
 0x3a4   : > { %v2335_v19 = vmax.f32 %v2131_v17, %v2133_v51  ;;  %2920 = vmatmul.bf16.gmra.mxu2 %v2868_v3  ;;  %3009 = vmatmul.bf16.gmra.mxu3 %v2868_v3  ;;  %v2342_v26 = vmax.f32 %v2132_v16, %v2134_v55  ;;  %v2789_v11 = vpop.f32.mrf.mxu1  ;;  %v1412_v41 = vmax.f32 %v1368_v50, 0.0 }
 0x3a5   : > { %v3656_v13 = vpack.c.bf16 %v3625_v47, %v3624_v53  ;;  %v1378_v17 = vmax.f32 %v6273_v2, %v1377_v4  ;;  %v1372_v54 = vrot.slane %v1371_v49, 2  ;;  %v2790_v3 = vadd.f32 %v6559_v52, %v2789_v11 }
 0x3a6   : > { %v2336_v42 = vrot.slane %v2335_v19, 4  ;;  %v2343_v58 = vrot.slane %v2342_v26, 4 }
 0x3a7   : > { %v1981_v24 = vpop.f32.mrf.mxu2  ;;  %v2070_v23 = vpop.f32.mrf.mxu3  ;;  %5210 = vmatmul.msk.bf16.vlgmr.msrb.gmra.mxu1 %vm646_vm1, %v3656_v13  ;;  %v1373_v29 = vmax.f32 %v1371_v49, %v1372_v54  ;;  %v2845_v13 = vmax.f32 %v2790_v3, 0.0 }
 0x3a8   : > { %v2337_v15 = vmax.f32 %v2335_v19, %v2336_v42  ;;  %v3549_v61 = vpop.f32.mrf.mxu0  ;;  %v2344_v12 = vmax.f32 %v2342_v26, %v2343_v58  ;;  %v1982_v53 = vadd.f32 %v1981_v24, %v6005_v38  ;;  %v2071_v55 = vadd.f32 %v2070_v23, %v6007_v39 }
 0x3a9   : > { %v1379_v19 = vrot.slane %v1378_v17, 2  ;;  %v3550_v11 = vadd.f32 %v6504_v28, %v3549_v61 }
 0x3aa   : > { %v2338_v60 = vrot.slane %v2337_v15, 2  ;;  %v2345_v51 = vrot.slane %v2344_v12, 2  ;;  %v2135_v33 = vmax.f32 %v1982_v53, 0.0 }
 0x3ab   : > { %5203 = vmatmul.msk.bf16.gmra.mxu0 %vm435_vm0, %v5374_v32  ;;  %v1380_v61 = vmax.f32 %v1378_v17, %v1379_v19 }
 0x3ac   : > { %v2339_v1 = vmax.f32 %v2337_v15, %v2338_v60  ;;  %v2346_v16 = vmax.f32 %v2344_v12, %v2345_v51  ;;  %v2791_v47 = vpop.f32.mrf.mxu1  ;;  %v2136_v12 = vmax.f32 %v2071_v55, 0.0  ;;  %v1374_v55 = vrot.slane %v1373_v29, 1 }
 0x3ad   : > { %v2792_v2 = vadd.f32 %v6559_v52, %v2791_v47 }
 0x3ae   : > { %v2340_v56 = vrot.slane %v2339_v1, 1  ;;  %v2347_v26 = vrot.slane %v2346_v16, 1  ;;  %v1375_v19 = vmax.f32 %v1373_v29, %v1374_v55 }
 0x3af   : > { %v1983_v25 = vpop.f32.mrf.mxu2  ;;  %v2072_v4 = vpop.f32.mrf.mxu3  ;;  %v2846_v58 = vmax.f32 %v2792_v2, 0.0 }
 0x3b0   : > { %v2341_v42 = vmax.f32 %v2339_v1, %v2340_v56  ;;  %v1984_v32 = vadd.f32 %v1983_v25, %v6005_v38  ;;  %v2073_v24 = vadd.f32 %v2072_v4, %v6007_v39  ;;  %v3551_v23 = vpop.f32.mrf.mxu0  ;;  %v2348_v15 = vmax.f32 %v2346_v16, %v2347_v26 }
 0x3b1   : > { %v3552_v50 = vadd.f32 %v6504_v28, %v3551_v23  ;;  %v2869_v51 = vpack.c.bf16 %v2846_v58, %v2845_v13  ;;  %v3626_v1 = vmax.f32 %v3550_v11, 0.0 }
 0x3b2   : > { %v6589_v60 = vmax.f32 %v1411_v14, %v2341_v42  ;;  %v2137_v49 = vmax.f32 %v1984_v32, 0.0  ;;  %v2138_v54 = vmax.f32 %v2073_v24, 0.0  ;;  %v6591_v3 = vmax.f32 %v1412_v41, %v2348_v15  ;;  %v5375_v32 = vld [vmem:[%s5651_s17 + $0x158] sm:$0xff] }
 0x3b3   : > { %v3627_v47 = vmax.f32 %v3552_v50, 0.0  ;;  %v1381_v14 = vrot.slane %v1380_v61, 1 }
 0x3b4   : > { %7225 = vst [vmem:[#allocation13_spill] sm:$0xff] %v6591_v3  ;;  %v2349_v56 = vmax.f32 %v2135_v33, %v2137_v49  ;;  %v2356_v2 = vmax.f32 %v2136_v12, %v2138_v54  ;;  %2925 = vmatmul.bf16.gmra.mxu2 %v2869_v51  ;;  %3014 = vmatmul.bf16.gmra.mxu3 %v2869_v51  ;;  %v2794_v53 = vpop.f32.mrf.mxu1  ;;  %v1413_v49 = vmax.f32 %v1375_v19, 0.0 }
 0x3b5   : > { %v3657_v16 = vpack.c.bf16 %v3627_v47, %v3626_v1  ;;  %v1382_v24 = vmax.f32 %v1380_v61, %v1381_v14  ;;  %v2795_v23 = vadd.f32 %v6559_v52, %v2794_v53 }
 0x3b6   : > { %v2350_v26 = vrot.slane %v2349_v56, 4  ;;  %v2357_v25 = vrot.slane %v2356_v2, 4 }
 0x3b7   : > { %v2886_v4 = vpop.f32.mrf.mxu2  ;;  %v2975_v42 = vpop.f32.mrf.mxu3  ;;  %5211 = vmatmul.msk.bf16.gmra.mxu1 %vm646_vm1, %v3657_v16  ;;  %v1414_v47 = vmax.f32 %v1382_v24, 0.0 }
 0x3b8   : > { %v2351_v13 = vmax.f32 %v2349_v56, %v2350_v26  ;;  %v2358_v17 = vmax.f32 %v2356_v2, %v2357_v25  ;;  %v3554_v41 = vpop.f32.mrf.mxu0  ;;  %v2887_v12 = vadd.f32 %v2886_v4, %v6005_v38  ;;  %v2847_v56 = vmax.f32 %v2795_v23, 0.0 }
 0x3b9   : > { %v2976_v29 = vadd.f32 %v2975_v42, %v6007_v39  ;;  %v3555_v61 = vadd.f32 %v6504_v28, %v3554_v41 }
 0x3ba   : > { %v2352_v11 = vrot.slane %v2351_v13, 2  ;;  %v2359_v58 = vrot.slane %v2358_v17, 2  ;;  %v3055_v4 = vmax.f32 %v2887_v12, 0.0 }
 0x3bb   : > { %5204 = vmatmul.msk.bf16.gmra.mxu0 %vm435_vm0, %v5375_v32 }
 0x3bc   : > { %v2353_v15 = vmax.f32 %v2351_v13, %v2352_v11  ;;  %v2360_v33 = vmax.f32 %v2358_v17, %v2359_v58  ;;  %v2796_v50 = vpop.f32.mrf.mxu1  ;;  %v3056_v11 = vmax.f32 %v2976_v29, 0.0  ;;  %v3628_v58 = vmax.f32 %v3555_v61, 0.0 }
 0x3bd   : > { %v2797_v1 = vadd.f32 %v6559_v52, %v2796_v50 }
 0x3be   : > { %v2354_v54 = vrot.slane %v2353_v15, 1  ;;  %v2361_v51 = vrot.slane %v2360_v33, 1 }
 0x3bf   : > { %v2888_v2 = vpop.f32.mrf.mxu2  ;;  %v2977_v16 = vpop.f32.mrf.mxu3  ;;  %v2848_v26 = vmax.f32 %v2797_v1, 0.0 }
 0x3c0   : > { %v2355_v53 = vmax.f32 %v2353_v15, %v2354_v54  ;;  %v2362_v55 = vmax.f32 %v2360_v33, %v2361_v51  ;;  %v2889_v25 = vadd.f32 %v2888_v2, %v6005_v38  ;;  %v3556_v14 = vpop.f32.mrf.mxu0  ;;  %v2978_v32 = vadd.f32 %v2977_v16, %v6007_v39  ;;  %v5376_v2 = vld [vmem:[%s5651_s17 + $0x178] sm:$0xff] }
 0x3c1   : > { %v3557_v13 = vadd.f32 %v6504_v28, %v3556_v14  ;;  %v2870_v41 = vpack.c.bf16 %v2848_v26, %v2847_v56 }
 0x3c2   : > { %v6604_v17 = vmax.f32 %v1413_v49, %v2355_v53  ;;  %v6606_v19 = vmax.f32 %v1414_v47, %v2362_v55  ;;  %v3057_v42 = vmax.f32 %v2889_v25, 0.0  ;;  %v3058_v24 = vmax.f32 %v2978_v32, 0.0 }
 0x3c3   : > { %v3629_v23 = vmax.f32 %v3557_v13, 0.0 }
 0x3c4   : > { %v3119_v15 = vmax.f32 %v3055_v4, %v3057_v42  ;;  %2930 = vmatmul.bf16.gmra.mxu2 %v2870_v41  ;;  %3019 = vmatmul.bf16.gmra.mxu3 %v2870_v41  ;;  %v3126_v33 = vmax.f32 %v3056_v11, %v3058_v24  ;;  %v2799_v50 = vpop.f32.mrf.mxu1 }
 0x3c5   : > { %v3658_v12 = vpack.c.bf16 %v3629_v23, %v3628_v58  ;;  %v2800_v53 = vadd.f32 %v6559_v52, %v2799_v50 }
 0x3c6   : > { %v3120_v54 = vrot.slane %v3119_v15, 4  ;;  %v3127_v51 = vrot.slane %v3126_v33, 4 }
 0x3c7   : > { %v2891_v1 = vpop.f32.mrf.mxu2  ;;  %v2980_v49 = vpop.f32.mrf.mxu3  ;;  %5212 = vmatmul.msk.bf16.gmra.mxu1 %vm646_vm1, %v3658_v12  ;;  %v2849_v41 = vmax.f32 %v2800_v53, 0.0 }
 0x3c8   : > { %v3121_v47 = vmax.f32 %v3119_v15, %v3120_v54  ;;  %v3559_v16 = vpop.f32.mrf.mxu0  ;;  %v3128_v56 = vmax.f32 %v3126_v33, %v3127_v51  ;;  %v2892_v25 = vadd.f32 %v2891_v1, %v6005_v38  ;;  %v2981_v14 = vadd.f32 %v2980_v49, %v6007_v39 }
 0x3c9   : > { %v3560_v11 = vadd.f32 %v6504_v28, %v3559_v16 }
 0x3ca   : > { %v3122_v29 = vrot.slane %v3121_v47, 2  ;;  %v3129_v61 = vrot.slane %v3128_v56, 2  ;;  %v3059_v51 = vmax.f32 %v2892_v25, 0.0  ;;  %v3060_v1 = vmax.f32 %v2981_v14, 0.0 }
 0x3cb   : > { %5205 = vmatmul.msk.bf16.gmra.mxu0 %vm435_vm0, %v5376_v2  ;;  %v5378_v2 = vld [vmem:[%s5651_s17 + $0x1b8] sm:$0xff] }
 0x3cc   : > { %v3123_v55 = vmax.f32 %v3121_v47, %v3122_v29  ;;  %v3130_v26 = vmax.f32 %v3128_v56, %v3129_v61  ;;  %v2801_v4 = vpop.f32.mrf.mxu1  ;;  %v3630_v61 = vmax.f32 %v3560_v11, 0.0 }
 0x3cd   : > { %v2802_v13 = vadd.f32 %v6559_v52, %v2801_v4 }
 0x3ce   : > { %v3124_v32 = vrot.slane %v3123_v55, 1  ;;  %v3131_v42 = vrot.slane %v3130_v26, 1 }
 0x3cf   : > { %v2893_v58 = vpop.f32.mrf.mxu2  ;;  %v2982_v24 = vpop.f32.mrf.mxu3  ;;  %v2850_v15 = vmax.f32 %v2802_v13, 0.0 }
 0x3d0   : > { %v6616_v23 = vmax.f32 %v3123_v55, %v3124_v32  ;;  %v2894_v33 = vadd.f32 %v2893_v58, %v6005_v38  ;;  %v2983_v12 = vadd.f32 %v2982_v24, %v6007_v39  ;;  %v3561_v50 = vpop.f32.mrf.mxu0  ;;  %v6620_v54 = vmax.f32 %v3130_v26, %v3131_v42  ;;  %v5377_v58 = vld [vmem:[%s5651_s17 + $0x198] sm:$0xff] }
 0x3d1   : > { %v3562_v49 = vadd.f32 %v6504_v28, %v3561_v50  ;;  %v2871_v56 = vpack.c.bf16 %v2850_v15, %v2849_v41 }
 0x3d2   : > { %v3061_v47 = vmax.f32 %v2894_v33, 0.0  ;;  %v3062_v16 = vmax.f32 %v2983_v12, 0.0 }
 0x3d3   : > { %v3631_v53 = vmax.f32 %v3562_v49, 0.0 }
 0x3d4   : > { %v3133_v55 = vmax.f32 %v3059_v51, %v3061_v47  ;;  %v3140_v4 = vmax.f32 %v3060_v1, %v3062_v16  ;;  %2935 = vmatmul.bf16.gmra.mxu2 %v2871_v56  ;;  %3024 = vmatmul.bf16.gmra.mxu3 %v2871_v56  ;;  %v2804_v25 = vpop.f32.mrf.mxu1 }
 0x3d5   : > { %v3659_v26 = vpack.c.bf16 %v3631_v53, %v3630_v61  ;;  %v2805_v11 = vadd.f32 %v6559_v52, %v2804_v25 }
 0x3d6   : > { %v3134_v14 = vrot.slane %v3133_v55, 4  ;;  %v3141_v32 = vrot.slane %v3140_v4, 4 }
 0x3d7   : > { %v2896_v13 = vpop.f32.mrf.mxu2  ;;  %v2985_v42 = vpop.f32.mrf.mxu3  ;;  %5213 = vmatmul.msk.bf16.gmra.mxu1 %vm646_vm1, %v3659_v26  ;;  %v2851_v61 = vmax.f32 %v2805_v11, 0.0 }
 0x3d8   : > { %v3135_v24 = vmax.f32 %v3133_v55, %v3134_v14  ;;  %v3142_v33 = vmax.f32 %v3140_v4, %v3141_v32  ;;  %v3564_v41 = vpop.f32.mrf.mxu0  ;;  %v2897_v1 = vadd.f32 %v2896_v13, %v6005_v38  ;;  %v2986_v53 = vadd.f32 %v2985_v42, %v6007_v39 }
 0x3d9   : > { %v3565_v55 = vadd.f32 %v6504_v28, %v3564_v41 }
 0x3da   : > { %v3136_v15 = vrot.slane %v3135_v24, 2  ;;  %v3143_v12 = vrot.slane %v3142_v33, 2 }
 0x3db   : > { %5206 = vmatmul.msk.bf16.gmra.mxu0 %vm435_vm0, %v5377_v58 }
 0x3dc   : > { %v3137_v50 = vmax.f32 %v3135_v24, %v3136_v15  ;;  %v3144_v51 = vmax.f32 %v3142_v33, %v3143_v12  ;;  %v2806_v49 = vpop.f32.mrf.mxu1  ;;  %v3063_v24 = vmax.f32 %v2897_v1, 0.0 }
 0x3dd   : > { %v2807_v56 = vadd.f32 %v6559_v52, %v2806_v49 }
 0x3de   : > { %v3138_v47 = vrot.slane %v3137_v50, 1  ;;  %v3145_v16 = vrot.slane %v3144_v51, 1 }
 0x3df   : > { %v2898_v4 = vpop.f32.mrf.mxu2  ;;  %v2987_v26 = vpop.f32.mrf.mxu3  ;;  %v2852_v32 = vmax.f32 %v2807_v56, 0.0 }
 0x3e0   : > { %v6635_v14 = vmax.f32 %v3137_v50, %v3138_v47  ;;  %v6637_v25 = vmax.f32 %v3144_v51, %v3145_v16  ;;  %v2899_v58 = vadd.f32 %v2898_v4, %v6005_v38  ;;  %v3566_v13 = vpop.f32.mrf.mxu0  ;;  %v2988_v33 = vadd.f32 %v2987_v26, %v6007_v39 }
 0x3e1   : > { %v3567_v15 = vadd.f32 %v6504_v28, %v3566_v13  ;;  %v2872_v11 = vpack.c.bf16 %v2852_v32, %v2851_v61  ;;  %v3064_v50 = vmax.f32 %v2986_v53, 0.0  ;;  %v3632_v51 = vmax.f32 %v3565_v55, 0.0 }
 0x3e2   : > { %7226 = vst [vmem:[#allocation14_spill] sm:$0xff] %v6635_v14  ;;  %v3065_v12 = vmax.f32 %v2899_v58, 0.0  ;;  %v3066_v49 = vmax.f32 %v2988_v33, 0.0 }
 0x3e3   : > { %v3633_v47 = vmax.f32 %v3567_v15, 0.0 }
 0x3e4   : > { %v3147_v16 = vmax.f32 %v3063_v24, %v3065_v12  ;;  %2940 = vmatmul.bf16.gmra.mxu2 %v2872_v11  ;;  %3029 = vmatmul.bf16.gmra.mxu3 %v2872_v11  ;;  %v3154_v1 = vmax.f32 %v3064_v50, %v3066_v49  ;;  %v2809_v4 = vpop.f32.mrf.mxu1 }
 0x3e5   : > { %v3660_v56 = vpack.c.bf16 %v3633_v47, %v3632_v51  ;;  %v2810_v32 = vadd.f32 %v6559_v52, %v2809_v4 }
 0x3e6   : > { %v3148_v26 = vrot.slane %v3147_v16, 4  ;;  %v3155_v13 = vrot.slane %v3154_v1, 4 }
 0x3e7   : > { %v2901_v29 = vpop.f32.mrf.mxu2  ;;  %v2990_v42 = vpop.f32.mrf.mxu3  ;;  %5214 = vmatmul.msk.bf16.gmra.mxu1 %vm646_vm1, %v3660_v56  ;;  %v2853_v47 = vmax.f32 %v2810_v32, 0.0 }
 0x3e8   : > { %v3149_v14 = vmax.f32 %v3147_v16, %v3148_v26  ;;  %v3569_v58 = vpop.f32.mrf.mxu0  ;;  %v3156_v61 = vmax.f32 %v3154_v1, %v3155_v13  ;;  %v2902_v15 = vadd.f32 %v2901_v29, %v6005_v38  ;;  %v2991_v12 = vadd.f32 %v2990_v42, %v6007_v39 }
 0x3e9   : > { %v3570_v16 = vadd.f32 %v6504_v28, %v3569_v58 }
 0x3ea   : > { %v3150_v53 = vrot.slane %v3149_v14, 2  ;;  %v3157_v55 = vrot.slane %v3156_v61, 2  ;;  %v3067_v42 = vmax.f32 %v2902_v15, 0.0 }
 0x3eb   : > { %5207 = vmatmul.msk.bf16.gmra.mxu0 %vm435_vm0, %v5378_v2 }
 0x3ec   : > { %v3151_v24 = vmax.f32 %v3149_v14, %v3150_v53  ;;  %v3158_v33 = vmax.f32 %v3156_v61, %v3157_v55  ;;  %v2811_v11 = vpop.f32.mrf.mxu1  ;;  %v3068_v61 = vmax.f32 %v2991_v12, 0.0  ;;  %v5379_v55 = vld [vmem:[%s5651_s17 + $0x1d8] sm:$0xff] }
 0x3ed   : > { %v2812_v51 = vadd.f32 %v6559_v52, %v2811_v11 }
 0x3ee   : > { %v3152_v50 = vrot.slane %v3151_v24, 1  ;;  %v3159_v49 = vrot.slane %v3158_v33, 1 }
 0x3ef   : > { %v2903_v1 = vpop.f32.mrf.mxu2  ;;  %v2992_v56 = vpop.f32.mrf.mxu3  ;;  %v2854_v4 = vmax.f32 %v2812_v51, 0.0 }
 0x3f0   : > { %v6654_v26 = vmax.f32 %v3151_v24, %v3152_v50  ;;  %v2904_v2 = vadd.f32 %v2903_v1, %v6005_v38  ;;  %v2993_v14 = vadd.f32 %v2992_v56, %v6007_v39  ;;  %v3571_v29 = vpop.f32.mrf.mxu0  ;;  %v6658_v13 = vmax.f32 %v3158_v33, %v3159_v49 }
 0x3f1   : > { %v3572_v53 = vadd.f32 %v6504_v28, %v3571_v29  ;;  %v2873_v24 = vpack.c.bf16 %v2854_v4, %v2853_v47  ;;  %v3634_v50 = vmax.f32 %v3570_v16, 0.0 }
 0x3f2   : > { %7227 = vst [vmem:[#allocation15_spill] sm:$0xff] %v6654_v26  ;;  %v3069_v58 = vmax.f32 %v2904_v2, 0.0  ;;  %v3070_v32 = vmax.f32 %v2993_v14, 0.0 }
 0x3f3   : > { %v3635_v51 = vmax.f32 %v3572_v53, 0.0 }
 0x3f4   : > { %v3161_v1 = vmax.f32 %v3067_v42, %v3069_v58  ;;  %v3168_v56 = vmax.f32 %v3068_v61, %v3070_v32  ;;  %2945 = vmatmul.bf16.gmra.mxu2 %v2873_v24  ;;  %3034 = vmatmul.bf16.gmra.mxu3 %v2873_v24  ;;  %v2814_v15 = vpop.f32.mrf.mxu1 }
 0x3f5   : > { %v3661_v33 = vpack.c.bf16 %v3635_v51, %v3634_v50  ;;  %v2815_v16 = vadd.f32 %v6559_v52, %v2814_v15 }
 0x3f6   : > { %v3162_v12 = vrot.slane %v3161_v1, 4  ;;  %v3169_v49 = vrot.slane %v3168_v56, 4 }
 0x3f7   : > { %v2906_v29 = vpop.f32.mrf.mxu2  ;;  %v2995_v41 = vpop.f32.mrf.mxu3  ;;  %5215 = vmatmul.msk.bf16.gmra.mxu1 %vm646_vm1, %v3661_v33  ;;  %v2855_v51 = vmax.f32 %v2815_v16, 0.0 }
 0x3f8   : > { %v3163_v2 = vmax.f32 %v3161_v1, %v3162_v12  ;;  %v3170_v26 = vmax.f32 %v3168_v56, %v3169_v49  ;;  %v3574_v47 = vpop.f32.mrf.mxu0  ;;  %v2907_v53 = vadd.f32 %v2906_v29, %v6005_v38  ;;  %v2996_v1 = vadd.f32 %v2995_v41, %v6007_v39 }
 0x3f9   : > { %v3575_v56 = vadd.f32 %v6504_v28, %v3574_v47 }
 0x3fa   : > { %v3164_v4 = vrot.slane %v3163_v2, 2  ;;  %v3171_v14 = vrot.slane %v3170_v26, 2 }
 0x3fb   : > { %5208 = vmatmul.msk.bf16.gmra.mxu0 %vm435_vm0, %v5379_v55 }
 0x3fc   : > { %v3165_v42 = vmax.f32 %v3163_v2, %v3164_v4  ;;  %v3172_v61 = vmax.f32 %v3170_v26, %v3171_v14  ;;  %v2816_v58 = vpop.f32.mrf.mxu1  ;;  %v3071_v2 = vmax.f32 %v2907_v53, 0.0 }
 0x3fd   : > { %v2817_v50 = vadd.f32 %v6559_v52, %v2816_v58  ;;  %v3636_v58 = vmax.f32 %v3575_v56, 0.0 }
 0x3fe   : > { %v3166_v32 = vrot.slane %v3165_v42, 1  ;;  %v3173_v24 = vrot.slane %v3172_v61, 1 }
 0x3ff   : > { %v2908_v33 = vpop.f32.mrf.mxu2  ;;  %v2997_v12 = vpop.f32.mrf.mxu3  ;;  %v2856_v55 = vmax.f32 %v2817_v50, 0.0 }
 0x400   : > { %v6673_v49 = vmax.f32 %v3165_v42, %v3166_v32  ;;  %v6675_v15 = vmax.f32 %v3172_v61, %v3173_v24  ;;  %v2909_v26 = vadd.f32 %v2908_v33, %v6005_v38  ;;  %v3576_v29 = vpop.f32.mrf.mxu0  ;;  %v2998_v4 = vadd.f32 %v2997_v12, %v6007_v39 }
 0x401   : > { %v3577_v14 = vadd.f32 %v6504_v28, %v3576_v29  ;;  %v2874_v42 = vpack.c.bf16 %v2856_v55, %v2855_v51  ;;  %v3072_v61 = vmax.f32 %v2996_v1, 0.0 }
 0x402   : > { %7228 = vst [vmem:[#allocation16_spill] sm:$0xff] %v6673_v49  ;;  %v3073_v16 = vmax.f32 %v2909_v26, 0.0  ;;  %v3074_v32 = vmax.f32 %v2998_v4, 0.0  ;;  %v5380_v49 = vld [vmem:[%s5651_s17 + $0x1f8] sm:$0xff]  ;;  %s5397_s17 = sshll.u32 %s5537_s24, 4 }
 0x403   : > { %7229 = vst [vmem:[#allocation17_spill] sm:$0xff] %v6675_v15  ;;  %v3637_v24 = vmax.f32 %v3577_v14, 0.0  ;;  %s4663_s20 = scalar_lea.hbm %s7187_s6, %s5397_s17 }
 0x404   : > { %v3175_v50 = vmax.f32 %v3071_v2, %v3073_v16  ;;  %2950 = vmatmul.bf16.gmra.mxu2 %v2874_v42  ;;  %3039 = vmatmul.bf16.gmra.mxu3 %v2874_v42  ;;  %v3182_v53 = vmax.f32 %v3072_v61, %v3074_v32  ;;  %v2819_v12 = vpop.f32.mrf.mxu1  ;;  %s4666_s28 = sshll.u32 %s4663_s20, 4  ;;  %s4667_s28 = int_to_ptr.hbm [resolvable:$true] %s4666_s28 }
 0x405   : > { %v3662_v33 = vpack.c.bf16 %v3637_v24, %v3636_v58  ;;  %v2820_v55 = vadd.f32 %v6559_v52, %v2819_v12  ;;  %s5481_s8 = sshra.s32 %s4667_s28, 4  ;;  %s5482_s8 = int_to_ptr.hbm [resolvable:$true] %s5481_s8 }
 0x406   : > { %v3176_v28 = vrot.slane %v3175_v50, 4  ;;  %v3183_v29 = vrot.slane %v3182_v53, 4  ;;  %s5483_s24 = scalar_lea.hbm %s5482_s8, 16  ;;  %p5488_p1 = scmp.lt.s32.totalorder %s5482_s8, %s7187_s6 }
 0x407   : > { %v2911_v11 = vpop.f32.mrf.mxu2  ;;  %v3000_v41 = vpop.f32.mrf.mxu3  ;;  %5216 = vmatmul.msk.bf16.gmra.mxu1 %vm646_vm1, %v3662_v33  ;;  %v2857_v24 = vmax.f32 %v2820_v55, 0.0  ;;  %p5484_p12 = scmp.ne.s32.totalorder %s5482_s8, %s5483_s24  ;;  %p5489_p2 = scmp.lt.s32.totalorder %s5487_s14, %s5483_s24 }
 0x408   : > { %v3177_v36 = vmax.f32 %v3175_v50, %v3176_v28  ;;  %v3579_v26 = vpop.f32.mrf.mxu0  ;;  %v3184_v51 = vmax.f32 %v3182_v53, %v3183_v29  ;;  %v2912_v14 = vadd.f32 %v2911_v11, %v6005_v38  ;;  %v3001_v16 = vadd.f32 %v3000_v41, %v6007_v39  ;;  %v6694_v50 = vld [vmem:[%s7186_s5] ss:$0 sm:$0xff] }
 0x409   : > { %v3580_v53 = vadd.f32 %v6694_v50, %v3579_v26  ;;  %p5485_p13 = pnand %p5484_p12, %p5624_p4  ;;  %p5490_p3 = por %p5489_p2, %p5488_p1 }
 0x40a   : > { %v3178_v1 = vrot.slane %v3177_v36, 2  ;;  %v3185_v56 = vrot.slane %v3184_v51, 2 }
 0x40b   : > { %5209 = vmatmul.msk.bf16.gmra.mxu0 %vm435_vm0, %v5380_v49  ;;  %p5486_p0 = pneg %p5485_p13 }
 0x40c   : > { %v3179_v2 = vmax.f32 %v3177_v36, %v3178_v1  ;;  %v3186_v4 = vmax.f32 %v3184_v51, %v3185_v56  ;;  %v2821_v42 = vpop.f32.mrf.mxu1  ;;  %v3075_v51 = vmax.f32 %v2912_v14, 0.0  ;;  %v3076_v1 = vmax.f32 %v3001_v16, 0.0 }
 0x40d   : > { %v2822_v58 = vadd.f32 %v6559_v52, %v2821_v42  ;;  %p5491_p5 = pnand %p5490_p3, %p5486_p0 }
 0x40e   : > { %v3180_v61 = vrot.slane %v3179_v2, 1  ;;  %v3187_v32 = vrot.slane %v3186_v4, 1 }
 0x40f   : > { %v2913_v49 = vpop.f32.mrf.mxu2  ;;  %v3002_v36 = vpop.f32.mrf.mxu3  ;;  %v2858_v11 = vmax.f32 %v2822_v58, 0.0 }
 0x410   : > { %v6697_v33 = vmax.f32 %v3179_v2, %v3180_v61  ;;  %v2914_v41 = vadd.f32 %v2913_v49, %v6005_v38  ;;  %v3003_v12 = vadd.f32 %v3002_v36, %v6007_v39  ;;  %v3581_v28 = vpop.f32.mrf.mxu0  ;;  %v6701_v29 = vmax.f32 %v3186_v4, %v3187_v32 }
 0x411   : > { %v3582_v56 = vadd.f32 %v6694_v50, %v3581_v28  ;;  %v2875_v47 = vpack.c.bf16 %v2858_v11, %v2857_v24  ;;  %v3638_v61 = vmax.f32 %v3580_v53, 0.0 }
 0x412   : > { %7230 = vst [vmem:[#allocation18_spill] sm:$0xff] %v6701_v29  ;;  %v3077_v26 = vmax.f32 %v2914_v41, 0.0  ;;  %v3078_v42 = vmax.f32 %v3003_v12, 0.0 }
 0x413   : > { %v3639_v58 = vmax.f32 %v3582_v56, 0.0 }
 0x414   : > { %v3189_v49 = vmax.f32 %v3075_v51, %v3077_v26  ;;  %v3196_v36 = vmax.f32 %v3076_v1, %v3078_v42  ;;  %2955 = vmatmul.bf16.gmra.mxu2 %v2875_v47  ;;  %3044 = vmatmul.bf16.gmra.mxu3 %v2875_v47  ;;  %v2824_v14 = vpop.f32.mrf.mxu1 }
 0x415   : > { %v3663_v4 = vpack.c.bf16 %v3639_v58, %v3638_v61  ;;  %v2825_v53 = vadd.f32 %v6559_v52, %v2824_v14 }
 0x416   : > { %v3190_v16 = vrot.slane %v3189_v49, 4  ;;  %v3197_v32 = vrot.slane %v3196_v36, 4 }
 0x417   : > { %v2916_v28 = vpop.f32.mrf.mxu2  ;;  %v3005_v15 = vpop.f32.mrf.mxu3  ;;  %5217 = vmatmul.msk.bf16.gmra.mxu1 %vm646_vm1, %v3663_v4  ;;  %v2859_v61 = vmax.f32 %v2825_v53, 0.0 }
 0x418   : > { %v3191_v43 = vmax.f32 %v3189_v49, %v3190_v16  ;;  %v3198_v55 = vmax.f32 %v3196_v36, %v3197_v32  ;;  %v3584_v24 = vpop.f32.mrf.mxu0  ;;  %v2917_v1 = vadd.f32 %v2916_v28, %v6005_v38  ;;  %v3006_v58 = vadd.f32 %v3005_v15, %v6007_v39 }
 0x419   : > { %v3585_v49 = vadd.f32 %v6694_v50, %v3584_v24 }
 0x41a   : > { %v3192_v11 = vrot.slane %v3191_v43, 2  ;;  %v3199_v41 = vrot.slane %v3198_v55, 2  ;;  %v3079_v28 = vmax.f32 %v2917_v1, 0.0 }
 0x41c   : > { %v3193_v12 = vmax.f32 %v3191_v43, %v3192_v11  ;;  %v3200_v51 = vmax.f32 %v3198_v55, %v3199_v41  ;;  %v2826_v47 = vpop.f32.mrf.mxu1 }
 0x41d   : > { %v2827_v42 = vadd.f32 %v6559_v52, %v2826_v47  ;;  %v3080_v47 = vmax.f32 %v3006_v58, 0.0 }
 0x41e   : > { %v3194_v56 = vrot.slane %v3193_v12, 1  ;;  %v3201_v26 = vrot.slane %v3200_v51, 1 }
 0x41f   : > { %v2918_v36 = vpop.f32.mrf.mxu2  ;;  %v3007_v4 = vpop.f32.mrf.mxu3  ;;  %v2860_v43 = vmax.f32 %v2827_v42, 0.0 }
 0x420   : > { %v6714_v16 = vmax.f32 %v3193_v12, %v3194_v56  ;;  %v6716_v32 = vmax.f32 %v3200_v51, %v3201_v26  ;;  %v2919_v55 = vadd.f32 %v2918_v36, %v6005_v38  ;;  %v3586_v14 = vpop.f32.mrf.mxu0  ;;  %v3008_v11 = vadd.f32 %v3007_v4, %v6007_v39 }
 0x421   : > { %v3587_v41 = vadd.f32 %v6694_v50, %v3586_v14  ;;  %v2876_v12 = vpack.c.bf16 %v2860_v43, %v2859_v61  ;;  %v3640_v51 = vmax.f32 %v3585_v49, 0.0 }
 0x422   : > { %7231 = vst [vmem:[#allocation19_spill] sm:$0xff] %v6716_v32  ;;  %v3081_v53 = vmax.f32 %v2919_v55, 0.0  ;;  %v3082_v56 = vmax.f32 %v3008_v11, 0.0 }
 0x423   : > { %v3641_v26 = vmax.f32 %v3587_v41, 0.0 }
 0x424   : > { %v3203_v42 = vmax.f32 %v3079_v28, %v3081_v53  ;;  %2960 = vmatmul.bf16.gmra.mxu2 %v2876_v12  ;;  %3049 = vmatmul.bf16.gmra.mxu3 %v2876_v12  ;;  %v3210_v1 = vmax.f32 %v3080_v47, %v3082_v56  ;;  %v3729_v4 = vpop.f32.mrf.mxu1 }
 0x425   : > { %v3664_v36 = vpack.c.bf16 %v3641_v26, %v3640_v51  ;;  %v3730_v49 = vadd.f32 %v6559_v52, %v3729_v4 }
 0x426   : > { %v3204_v2 = vrot.slane %v3203_v42, 4  ;;  %v3211_v14 = vrot.slane %v3210_v1, 4 }
 0x427   : > { %v2921_v29 = vpop.f32.mrf.mxu2  ;;  %v3010_v57 = vpop.f32.mrf.mxu3  ;;  %5218 = vmatmul.msk.bf16.gmra.mxu1 %vm646_vm1, %v3664_v36 }
 0x428   : > { %v3205_v15 = vmax.f32 %v3203_v42, %v3204_v2  ;;  %v3589_v24 = vpop.f32.mrf.mxu0  ;;  %v3212_v55 = vmax.f32 %v3210_v1, %v3211_v14  ;;  %v2922_v11 = vadd.f32 %v2921_v29, %v6005_v38  ;;  %v3011_v41 = vadd.f32 %v3010_v57, %v6007_v39 }
 0x429   : > { %v3809_v2 = vmax.f32 %v3730_v49, 0.0  ;;  %v3590_v56 = vadd.f32 %v6694_v50, %v3589_v24 }
 0x42a   : > { %v3206_v61 = vrot.slane %v3205_v15, 2  ;;  %v3213_v58 = vrot.slane %v3212_v55, 2  ;;  %v3083_v57 = vmax.f32 %v2922_v11, 0.0 }
 0x42c   : > { %v3207_v43 = vmax.f32 %v3205_v15, %v3206_v61  ;;  %v3214_v28 = vmax.f32 %v3212_v55, %v3213_v58  ;;  %v3731_v53 = vpop.f32.mrf.mxu1  ;;  %v3084_v55 = vmax.f32 %v3011_v41, 0.0 }
 0x42d   : > { %v3732_v47 = vadd.f32 %v6559_v52, %v3731_v53 }
 0x42e   : > { %v3208_v12 = vrot.slane %v3207_v43, 1  ;;  %v3215_v51 = vrot.slane %v3214_v28, 1 }
 0x42f   : > { %v2923_v26 = vpop.f32.mrf.mxu2  ;;  %v3012_v42 = vpop.f32.mrf.mxu3  ;;  %v3810_v36 = vmax.f32 %v3732_v47, 0.0 }
 0x430   : > { %v6731_v1 = vmax.f32 %v3207_v43, %v3208_v12  ;;  %v2924_v15 = vadd.f32 %v2923_v26, %v6005_v38  ;;  %v3013_v4 = vadd.f32 %v3012_v42, %v6007_v39  ;;  %v3591_v29 = vpop.f32.mrf.mxu0  ;;  %v6735_v14 = vmax.f32 %v3214_v28, %v3215_v51 }
 0x431   : > { %v3592_v61 = vadd.f32 %v6694_v50, %v3591_v29  ;;  %v3841_v24 = vpack.c.bf16 %v3810_v36, %v3809_v2  ;;  %v3642_v12 = vmax.f32 %v3590_v56, 0.0 }
 0x432   : > { %7232 = vst [vmem:[#allocation20_spill] sm:$0xff] %v6735_v14  ;;  %v3085_v49 = vmax.f32 %v2924_v15, 0.0  ;;  %v3086_v53 = vmax.f32 %v3013_v4, 0.0 }
 0x433   : > { %v3643_v47 = vmax.f32 %v3592_v61, 0.0 }
 0x434   : > { %v3217_v26 = vmax.f32 %v3083_v57, %v3085_v49  ;;  %v3224_v42 = vmax.f32 %v3084_v55, %v3086_v53  ;;  %3865 = vmatmul.bf16.vlgmr.msrb.gmra.mxu2 %v3841_v24  ;;  %3954 = vmatmul.bf16.vlgmr.msrb.gmra.mxu3 %v3841_v24  ;;  %v3734_v11 = vpop.f32.mrf.mxu1 }
 0x435   : > { %v3665_v28 = vpack.c.bf16 %v3643_v47, %v3642_v12  ;;  %v3735_v56 = vadd.f32 %v6559_v52, %v3734_v11 }
 0x436   : > { %v3218_v41 = vrot.slane %v3217_v26, 4  ;;  %v3225_v51 = vrot.slane %v3224_v42, 4 }
 0x437   : > { %v2926_v29 = vpop.f32.mrf.mxu2  ;;  %v3015_v32 = vpop.f32.mrf.mxu3  ;;  %5219 = vmatmul.msk.bf16.gmra.mxu1 %vm646_vm1, %v3665_v28  ;;  %v3811_v12 = vmax.f32 %v3735_v56, 0.0 }
 0x438   : > { %v3219_v63 = vmax.f32 %v3217_v26, %v3218_v41  ;;  %v3226_v58 = vmax.f32 %v3224_v42, %v3225_v51  ;;  %v3594_v2 = vpop.f32.mrf.mxu0  ;;  %v2927_v55 = vadd.f32 %v2926_v29, %v6005_v38  ;;  %v3016_v47 = vadd.f32 %v3015_v32, %v6007_v39 }
 0x439   : > { %v3595_v26 = vadd.f32 %v6694_v50, %v3594_v2 }
 0x43a   : > { %v3220_v36 = vrot.slane %v3219_v63, 2  ;;  %v3227_v15 = vrot.slane %v3226_v58, 2  ;;  %v3087_v29 = vmax.f32 %v2927_v55, 0.0 }
 0x43c   : > { %v3221_v4 = vmax.f32 %v3219_v63, %v3220_v36  ;;  %v3228_v57 = vmax.f32 %v3226_v58, %v3227_v15  ;;  %v3736_v61 = vpop.f32.mrf.mxu1 }
 0x43d   : > { %v3737_v53 = vadd.f32 %v6559_v52, %v3736_v61 }
 0x43e   : > { %v3222_v24 = vrot.slane %v3221_v4, 1  ;;  %v3229_v49 = vrot.slane %v3228_v57, 1 }
 0x43f   : > { %v2928_v42 = vpop.f32.mrf.mxu2  ;;  %v3017_v28 = vpop.f32.mrf.mxu3  ;;  %v3812_v63 = vmax.f32 %v3737_v53, 0.0 }
 0x440   : > { %v6748_v41 = vmax.f32 %v3221_v4, %v3222_v24  ;;  %v6750_v51 = vmax.f32 %v3228_v57, %v3229_v49  ;;  %v2929_v58 = vadd.f32 %v2928_v42, %v6005_v38  ;;  %v3596_v11 = vpop.f32.mrf.mxu0  ;;  %v3018_v36 = vadd.f32 %v3017_v28, %v6007_v39 }
 0x441   : > { %v3597_v52 = vadd.f32 %v6694_v50, %v3596_v11  ;;  %v3842_v56 = vpack.c.bf16 %v3812_v63, %v3811_v12  ;;  %v3088_v4 = vmax.f32 %v3016_v47, 0.0  ;;  %v3644_v57 = vmax.f32 %v3595_v26, 0.0  ;;  %v6763_v26 = vld [vmem:[%s7186_s5 + $0x1] ss:$0 sm:$0xff] }
 0x442   : > { %7233 = vst [vmem:[#allocation21_spill] sm:$0xff] %v6748_v41  ;;  %v3089_v15 = vmax.f32 %v2929_v58, 0.0  ;;  %v3090_v61 = vmax.f32 %v3018_v36, 0.0 }
 0x443   : > { %7234 = vst [vmem:[#allocation22_spill] sm:$0xff] %v6750_v51  ;;  %v3645_v24 = vmax.f32 %v3597_v52, 0.0 }
 0x444   : > { %v3231_v49 = vmax.f32 %v3087_v29, %v3089_v15  ;;  %3870 = vmatmul.bf16.gmra.mxu2 %v3842_v56  ;;  %3959 = vmatmul.bf16.gmra.mxu3 %v3842_v56  ;;  %v3238_v55 = vmax.f32 %v3088_v4, %v3090_v61  ;;  %v3739_v42 = vpop.f32.mrf.mxu1 }
 0x445   : > { %v3666_v53 = vpack.c.bf16 %v3645_v24, %v3644_v57  ;;  %v3740_v63 = vadd.f32 %v6763_v26, %v3739_v42 }
 0x446   : > { %v3232_v28 = vrot.slane %v3231_v49, 4  ;;  %v3239_v11 = vrot.slane %v3238_v55, 4 }
 0x447   : > { %v2931_v43 = vpop.f32.mrf.mxu2  ;;  %v3020_v14 = vpop.f32.mrf.mxu3  ;;  %5220 = vmatmul.msk.bf16.gmra.mxu1 %vm646_vm1, %v3666_v53  ;;  %v3813_v24 = vmax.f32 %v3740_v63, 0.0 }
 0x448   : > { %v3233_v32 = vmax.f32 %v3231_v49, %v3232_v28  ;;  %v3599_v2 = vpop.f32.mrf.mxu0  ;;  %v3240_v58 = vmax.f32 %v3238_v55, %v3239_v11  ;;  %v2932_v52 = vadd.f32 %v2931_v43, %v6005_v38  ;;  %v3021_v15 = vadd.f32 %v3020_v14, %v6007_v39 }
 0x449   : > { %v3600_v49 = vadd.f32 %v6694_v50, %v3599_v2 }
 0x44a   : > { %v3234_v12 = vrot.slane %v3233_v32, 2  ;;  %v3241_v47 = vrot.slane %v3240_v58, 2  ;;  %v3091_v14 = vmax.f32 %v2932_v52, 0.0 }
 0x44c   : > { %v3235_v29 = vmax.f32 %v3233_v32, %v3234_v12  ;;  %v3242_v36 = vmax.f32 %v3240_v58, %v3241_v47  ;;  %v3741_v56 = vpop.f32.mrf.mxu1  ;;  %v3092_v12 = vmax.f32 %v3021_v15, 0.0 }
 0x44d   : > { %v3742_v57 = vadd.f32 %v6763_v26, %v3741_v56 }
 0x44e   : > { %v3236_v4 = vrot.slane %v3235_v29, 1  ;;  %v3243_v61 = vrot.slane %v3242_v36, 1 }
 0x44f   : > { %v2933_v55 = vpop.f32.mrf.mxu2  ;;  %v3022_v53 = vpop.f32.mrf.mxu3  ;;  %v3814_v11 = vmax.f32 %v3742_v57, 0.0 }
 0x450   : > { %v6770_v28 = vmax.f32 %v3235_v29, %v3236_v4  ;;  %v2934_v32 = vadd.f32 %v2933_v55, %v6005_v38  ;;  %v3023_v42 = vadd.f32 %v3022_v53, %v6007_v39  ;;  %v3601_v43 = vpop.f32.mrf.mxu0  ;;  %v6774_v58 = vmax.f32 %v3242_v36, %v3243_v61 }
 0x451   : > { %v3602_v47 = vadd.f32 %v6694_v50, %v3601_v43  ;;  %v3843_v51 = vpack.c.bf16 %v3814_v11, %v3813_v24  ;;  %v3646_v4 = vmax.f32 %v3600_v49, 0.0 }
 0x452   : > { %7235 = vst [vmem:[#allocation23_spill] sm:$0xff] %v6774_v58  ;;  %v3093_v2 = vmax.f32 %v2934_v32, 0.0  ;;  %v3094_v56 = vmax.f32 %v3023_v42, 0.0 }
 0x453   : > { %v3647_v57 = vmax.f32 %v3602_v47, 0.0 }
 0x454   : > { %v3245_v55 = vmax.f32 %v3091_v14, %v3093_v2  ;;  %v3252_v53 = vmax.f32 %v3092_v12, %v3094_v56  ;;  %3875 = vmatmul.bf16.gmra.mxu2 %v3843_v51  ;;  %3964 = vmatmul.bf16.gmra.mxu3 %v3843_v51  ;;  %v3744_v52 = vpop.f32.mrf.mxu1 }
 0x455   : > { %v3667_v36 = vpack.c.bf16 %v3647_v57, %v3646_v4  ;;  %v3745_v49 = vadd.f32 %v6763_v26, %v3744_v52 }
 0x456   : > { %v3246_v15 = vrot.slane %v3245_v55, 4  ;;  %v3253_v61 = vrot.slane %v3252_v53, 4 }
 0x457   : > { %v2936_v43 = vpop.f32.mrf.mxu2  ;;  %v3025_v40 = vpop.f32.mrf.mxu3  ;;  %5221 = vmatmul.msk.bf16.gmra.mxu1 %vm646_vm1, %v3667_v36  ;;  %v3815_v4 = vmax.f32 %v3745_v49, 0.0 }
 0x458   : > { %v3247_v41 = vmax.f32 %v3245_v55, %v3246_v15  ;;  %v3254_v63 = vmax.f32 %v3252_v53, %v3253_v61  ;;  %v3604_v24 = vpop.f32.mrf.mxu0  ;;  %v2937_v12 = vadd.f32 %v2936_v43, %v6005_v38  ;;  %v3026_v57 = vadd.f32 %v3025_v40, %v6007_v39 }
 0x459   : > { %v3605_v55 = vadd.f32 %v6694_v50, %v3604_v24 }
 0x45a   : > { %v3248_v11 = vrot.slane %v3247_v41, 2  ;;  %v3255_v32 = vrot.slane %v3254_v63, 2  ;;  %v3095_v43 = vmax.f32 %v2937_v12, 0.0 }
 0x45c   : > { %v3249_v42 = vmax.f32 %v3247_v41, %v3248_v11  ;;  %v3256_v14 = vmax.f32 %v3254_v63, %v3255_v32  ;;  %v3746_v51 = vpop.f32.mrf.mxu1 }
 0x45d   : > { %v3747_v56 = vadd.f32 %v6763_v26, %v3746_v51  ;;  %v3096_v51 = vmax.f32 %v3026_v57, 0.0 }
 0x45e   : > { %v3250_v47 = vrot.slane %v3249_v42, 1  ;;  %v3257_v2 = vrot.slane %v3256_v14, 1 }
 0x45f   : > { %v2938_v53 = vpop.f32.mrf.mxu2  ;;  %v3027_v36 = vpop.f32.mrf.mxu3  ;;  %v3816_v41 = vmax.f32 %v3747_v56, 0.0 }
 0x460   : > { %v6787_v15 = vmax.f32 %v3249_v42, %v3250_v47  ;;  %v6789_v61 = vmax.f32 %v3256_v14, %v3257_v2  ;;  %v2939_v63 = vadd.f32 %v2938_v53, %v6005_v38  ;;  %v3606_v52 = vpop.f32.mrf.mxu0  ;;  %v3028_v11 = vadd.f32 %v3027_v36, %v6007_v39 }
 0x461   : > { %v3607_v32 = vadd.f32 %v6694_v50, %v3606_v52  ;;  %v3844_v42 = vpack.c.bf16 %v3816_v41, %v3815_v4  ;;  %v3648_v14 = vmax.f32 %v3605_v55, 0.0 }
 0x462   : > { %7236 = vst [vmem:[#allocation24_spill] sm:$0xff] %v6789_v61  ;;  %v3097_v49 = vmax.f32 %v2939_v63, 0.0  ;;  %v3098_v47 = vmax.f32 %v3028_v11, 0.0 }
 0x463   : > { %v3649_v2 = vmax.f32 %v3607_v32, 0.0 }
 0x464   : > { %v3259_v56 = vmax.f32 %v3095_v43, %v3097_v49  ;;  %3880 = vmatmul.bf16.gmra.mxu2 %v3844_v42  ;;  %3969 = vmatmul.bf16.gmra.mxu3 %v3844_v42  ;;  %v3266_v12 = vmax.f32 %v3096_v51, %v3098_v47  ;;  %v3749_v36 = vpop.f32.mrf.mxu1 }
 0x465   : > { %v3668_v53 = vpack.c.bf16 %v3649_v2, %v3648_v14  ;;  %v3750_v55 = vadd.f32 %v6763_v26, %v3749_v36 }
 0x466   : > { %v3260_v29 = vrot.slane %v3259_v56, 4  ;;  %v3267_v52 = vrot.slane %v3266_v12, 4 }
 0x467   : > { %v2941_v58 = vpop.f32.mrf.mxu2  ;;  %v3030_v30 = vpop.f32.mrf.mxu3  ;;  %5222 = vmatmul.msk.bf16.gmra.mxu1 %vm646_vm1, %v3668_v53 }
 0x468   : > { %v3261_v40 = vmax.f32 %v3259_v56, %v3260_v29  ;;  %v3609_v24 = vpop.f32.mrf.mxu0  ;;  %v3268_v63 = vmax.f32 %v3266_v12, %v3267_v52  ;;  %v2942_v11 = vadd.f32 %v2941_v58, %v6005_v38  ;;  %v3031_v32 = vadd.f32 %v3030_v30, %v6007_v39 }
 0x469   : > { %v3817_v29 = vmax.f32 %v3750_v55, 0.0  ;;  %v3610_v47 = vadd.f32 %v6694_v50, %v3609_v24 }
 0x46a   : > { %v3262_v4 = vrot.slane %v3261_v40, 2  ;;  %v3269_v57 = vrot.slane %v3268_v63, 2  ;;  %v3099_v30 = vmax.f32 %v2942_v11, 0.0 }
 0x46c   : > { %v3263_v41 = vmax.f32 %v3261_v40, %v3262_v4  ;;  %v3270_v43 = vmax.f32 %v3268_v63, %v3269_v57  ;;  %v3751_v49 = vpop.f32.mrf.mxu1  ;;  %v3100_v63 = vmax.f32 %v3031_v32, 0.0 }
 0x46d   : > { %v3752_v51 = vadd.f32 %v6763_v26, %v3751_v49 }
 0x46e   : > { %v3264_v42 = vrot.slane %v3263_v41, 1  ;;  %v3271_v14 = vrot.slane %v3270_v43, 1 }
 0x46f   : > { %v2943_v2 = vpop.f32.mrf.mxu2  ;;  %v3032_v56 = vpop.f32.mrf.mxu3  ;;  %v3818_v53 = vmax.f32 %v3752_v51, 0.0 }
 0x470   : > { %v6804_v12 = vmax.f32 %v3263_v41, %v3264_v42  ;;  %v2944_v40 = vadd.f32 %v2943_v2, %v6005_v38  ;;  %v3033_v36 = vadd.f32 %v3032_v56, %v6007_v39  ;;  %v3611_v58 = vpop.f32.mrf.mxu0  ;;  %v6808_v52 = vmax.f32 %v3270_v43, %v3271_v14 }
 0x471   : > { %v3612_v4 = vadd.f32 %v6694_v50, %v3611_v58  ;;  %v3845_v49 = vpack.c.bf16 %v3818_v53, %v3817_v29  ;;  %v3650_v42 = vmax.f32 %v3610_v47, 0.0 }
 0x472   : > { %7237 = vst [vmem:[#allocation25_spill] sm:$0xff] %v6808_v52  ;;  %v3101_v24 = vmax.f32 %v2944_v40, 0.0  ;;  %v3102_v55 = vmax.f32 %v3033_v36, 0.0 }
 0x473   : > { %v3651_v51 = vmax.f32 %v3612_v4, 0.0 }
 0x474   : > { %v3273_v2 = vmax.f32 %v3099_v30, %v3101_v24  ;;  %v3280_v56 = vmax.f32 %v3100_v63, %v3102_v55  ;;  %3885 = vmatmul.bf16.gmra.mxu2 %v3845_v49  ;;  %3974 = vmatmul.bf16.gmra.mxu3 %v3845_v49  ;;  %v3754_v11 = vpop.f32.mrf.mxu1 }
 0x475   : > { %v3669_v43 = vpack.c.bf16 %v3651_v51, %v3650_v42  ;;  %v3755_v47 = vadd.f32 %v6763_v26, %v3754_v11 }
 0x476   : > { %v3274_v32 = vrot.slane %v3273_v2, 4  ;;  %v3281_v14 = vrot.slane %v3280_v56, 4 }
 0x477   : > { %v2946_v58 = vpop.f32.mrf.mxu2  ;;  %v3035_v61 = vpop.f32.mrf.mxu3  ;;  %5223 = vmatmul.msk.bf16.gmra.mxu1 %vm646_vm1, %v3669_v43  ;;  %v3819_v42 = vmax.f32 %v3755_v47, 0.0 }
 0x478   : > { %v3275_v37 = vmax.f32 %v3273_v2, %v3274_v32  ;;  %v3282_v57 = vmax.f32 %v3280_v56, %v3281_v14  ;;  %v3614_v29 = vpop.f32.mrf.mxu0  ;;  %v2947_v63 = vadd.f32 %v2946_v58, %v6005_v38  ;;  %v3036_v51 = vadd.f32 %v3035_v61, %v6007_v39 }
 0x479   : > { %v3615_v2 = vadd.f32 %v6694_v50, %v3614_v29 }
 0x47a   : > { %v3276_v53 = vrot.slane %v3275_v37, 2  ;;  %v3283_v40 = vrot.slane %v3282_v57, 2  ;;  %v3103_v58 = vmax.f32 %v2947_v63, 0.0 }
 0x47c   : > { %v3277_v36 = vmax.f32 %v3275_v37, %v3276_v53  ;;  %v3284_v30 = vmax.f32 %v3282_v57, %v3283_v40  ;;  %v3756_v4 = vpop.f32.mrf.mxu1 }
 0x47d   : > { %v3757_v49 = vadd.f32 %v6763_v26, %v3756_v4  ;;  %v3104_v4 = vmax.f32 %v3036_v51, 0.0 }
 0x47e   : > { %v3278_v24 = vrot.slane %v3277_v36, 1  ;;  %v3285_v55 = vrot.slane %v3284_v30, 1 }
 0x47f   : > { %v2948_v56 = vpop.f32.mrf.mxu2  ;;  %v3037_v43 = vpop.f32.mrf.mxu3  ;;  %v3820_v37 = vmax.f32 %v3757_v49, 0.0 }
 0x480   : > { %v6821_v32 = vmax.f32 %v3277_v36, %v3278_v24  ;;  %v6823_v14 = vmax.f32 %v3284_v30, %v3285_v55  ;;  %v2949_v57 = vadd.f32 %v2948_v56, %v6005_v38  ;;  %v3616_v11 = vpop.f32.mrf.mxu0  ;;  %v3038_v53 = vadd.f32 %v3037_v43, %v6007_v39 }
 0x481   : > { %v3617_v40 = vadd.f32 %v6694_v50, %v3616_v11  ;;  %v3846_v47 = vpack.c.bf16 %v3820_v37, %v3819_v42  ;;  %v3652_v30 = vmax.f32 %v3615_v2, 0.0 }
 0x482   : > { %7238 = vst [vmem:[#allocation26_spill] sm:$0xff] %v6823_v14  ;;  %v3105_v36 = vmax.f32 %v2949_v57, 0.0  ;;  %v3106_v24 = vmax.f32 %v3038_v53, 0.0 }
 0x483   : > { %v3653_v55 = vmax.f32 %v3617_v40, 0.0 }
 0x484   : > { %v3287_v49 = vmax.f32 %v3103_v58, %v3105_v36  ;;  %3890 = vmatmul.bf16.gmra.mxu2 %v3846_v47  ;;  %3979 = vmatmul.bf16.gmra.mxu3 %v3846_v47  ;;  %v3294_v63 = vmax.f32 %v3104_v4, %v3106_v24  ;;  %v3759_v43 = vpop.f32.mrf.mxu1 }
 0x485   : > { %v3670_v56 = vpack.c.bf16 %v3653_v55, %v3652_v30  ;;  %v3760_v2 = vadd.f32 %v6763_v26, %v3759_v43 }
 0x486   : > { %v3288_v41 = vrot.slane %v3287_v49, 4  ;;  %v3295_v11 = vrot.slane %v3294_v63, 4 }
 0x487   : > { %v2951_v52 = vpop.f32.mrf.mxu2  ;;  %v3040_v34 = vpop.f32.mrf.mxu3  ;;  %5224 = vmatmul.msk.bf16.gmra.mxu1 %vm646_vm1, %v3670_v56 }
 0x488   : > { %v3289_v61 = vmax.f32 %v3287_v49, %v3288_v41  ;;  %v3619_v29 = vpop.f32.mrf.mxu0  ;;  %v3296_v42 = vmax.f32 %v3294_v63, %v3295_v11  ;;  %v2952_v53 = vadd.f32 %v2951_v52, %v6005_v38  ;;  %v3041_v40 = vadd.f32 %v3040_v34, %v6007_v39 }
 0x489   : > { %v3821_v41 = vmax.f32 %v3760_v2, 0.0  ;;  %v3620_v24 = vadd.f32 %v6694_v50, %v3619_v29 }
 0x48a   : > { %v3290_v37 = vrot.slane %v3289_v61, 2  ;;  %v3297_v51 = vrot.slane %v3296_v42, 2  ;;  %v3107_v34 = vmax.f32 %v2952_v53, 0.0 }
 0x48c   : > { %v3291_v57 = vmax.f32 %v3289_v61, %v3290_v37  ;;  %v3298_v58 = vmax.f32 %v3296_v42, %v3297_v51  ;;  %v3761_v47 = vpop.f32.mrf.mxu1  ;;  %v3108_v42 = vmax.f32 %v3041_v40, 0.0 }
 0x48d   : > { %v3762_v4 = vadd.f32 %v6763_v26, %v3761_v47 }
 0x48e   : > { %v3292_v36 = vrot.slane %v3291_v57, 1  ;;  %v3299_v30 = vrot.slane %v3298_v58, 1 }
 0x48f   : > { %v2953_v55 = vpop.f32.mrf.mxu2  ;;  %v3042_v49 = vpop.f32.mrf.mxu3  ;;  %v3822_v56 = vmax.f32 %v3762_v4, 0.0 }
 0x490   : > { %v6838_v63 = vmax.f32 %v3291_v57, %v3292_v36  ;;  %v2954_v61 = vadd.f32 %v2953_v55, %v6005_v38  ;;  %v3043_v43 = vadd.f32 %v3042_v49, %v6007_v39  ;;  %v3621_v52 = vpop.f32.mrf.mxu0  ;;  %v6842_v11 = vmax.f32 %v3298_v58, %v3299_v30 }
 0x491   : > { %v3622_v37 = vadd.f32 %v6694_v50, %v3621_v52  ;;  %v3847_v29 = vpack.c.bf16 %v3822_v56, %v3821_v41  ;;  %v3654_v36 = vmax.f32 %v3620_v24, 0.0 }
 0x492   : > { %v3109_v2 = vmax.f32 %v2954_v61, 0.0  ;;  %v3110_v47 = vmax.f32 %v3043_v43, 0.0 }
 0x493   : > { %v3655_v4 = vmax.f32 %v3622_v37, 0.0 }
 0x494   : > { %v3301_v55 = vmax.f32 %v3107_v34, %v3109_v2  ;;  %v3308_v49 = vmax.f32 %v3108_v42, %v3110_v47  ;;  %3895 = vmatmul.bf16.gmra.mxu2 %v3847_v29  ;;  %3984 = vmatmul.bf16.gmra.mxu3 %v3847_v29  ;;  %v3764_v53 = vpop.f32.mrf.mxu1 }
 0x495   : > { %v3671_v58 = vpack.c.bf16 %v3655_v4, %v3654_v36  ;;  %v3765_v61 = vadd.f32 %v6763_v26, %v3764_v53 }
 0x496   : > { %v3302_v40 = vrot.slane %v3301_v55, 4  ;;  %v3309_v30 = vrot.slane %v3308_v49, 4 }
 0x497   : > { %v2956_v50 = vpop.f32.mrf.mxu2  ;;  %v3045_v52 = vpop.f32.mrf.mxu3  ;;  %5225 = vmatmul.msk.bf16.gmra.mxu1 %vm646_vm1, %v3671_v58  ;;  %v3823_v47 = vmax.f32 %v3765_v61, 0.0 }
 0x498   : > { %v3303_v14 = vmax.f32 %v3301_v55, %v3302_v40  ;;  %v3310_v51 = vmax.f32 %v3308_v49, %v3309_v30  ;;  %v2957_v34 = vadd.f32 %v2956_v50, %v6005_v38  ;;  %v3046_v36 = vadd.f32 %v3045_v52, %v6007_v39 }
 0x49a   : > { %v3304_v41 = vrot.slane %v3303_v14, 2  ;;  %v3311_v56 = vrot.slane %v3310_v51, 2 }
 0x49c   : > { %v3305_v24 = vmax.f32 %v3303_v14, %v3304_v41  ;;  %v3312_v43 = vmax.f32 %v3310_v51, %v3311_v56  ;;  %v3766_v42 = vpop.f32.mrf.mxu1  ;;  %v3111_v51 = vmax.f32 %v2957_v34, 0.0  ;;  %v3112_v56 = vmax.f32 %v3046_v36, 0.0 }
 0x49d   : > { %v3767_v2 = vadd.f32 %v6763_v26, %v3766_v42 }
 0x49e   : > { %v3306_v37 = vrot.slane %v3305_v24, 1  ;;  %v3313_v29 = vrot.slane %v3312_v43, 1 }
 0x49f   : > { %v2958_v4 = vpop.f32.mrf.mxu2  ;;  %v3047_v55 = vpop.f32.mrf.mxu3  ;;  %v3824_v40 = vmax.f32 %v3767_v2, 0.0 }
 0x4a0   : > { %v6854_v49 = vmax.f32 %v3305_v24, %v3306_v37  ;;  %v6856_v58 = vmax.f32 %v3312_v43, %v3313_v29  ;;  %v2959_v14 = vadd.f32 %v2958_v4, %v6005_v38  ;;  %v3048_v53 = vadd.f32 %v3047_v55, %v6007_v39 }
 0x4a1   : > { %v3848_v41 = vpack.c.bf16 %v3824_v40, %v3823_v47 }
 0x4a2   : > { %7239 = vst [vmem:[#allocation27_spill] sm:$0xff] %v6854_v49  ;;  %v3113_v52 = vmax.f32 %v2959_v14, 0.0  ;;  %v3114_v61 = vmax.f32 %v3048_v53, 0.0 }
 0x4a4   : > { %v3315_v24 = vmax.f32 %v3111_v51, %v3113_v52  ;;  %3900 = vmatmul.bf16.gmra.mxu2 %v3848_v41  ;;  %3989 = vmatmul.bf16.gmra.mxu3 %v3848_v41  ;;  %v3322_v43 = vmax.f32 %v3112_v56, %v3114_v61  ;;  %v3769_v42 = vpop.f32.mrf.mxu1 }
 0x4a5   : > { %v3770_v49 = vadd.f32 %v6763_v26, %v3769_v42 }
 0x4a6   : > { %v3316_v37 = vrot.slane %v3315_v24, 4  ;;  %v3323_v29 = vrot.slane %v3322_v43, 4 }
 0x4a7   : > { %v2961_v34 = vpop.f32.mrf.mxu2  ;;  %v3050_v2 = vpop.f32.mrf.mxu3  ;;  %v3825_v52 = vmax.f32 %v3770_v49, 0.0 }
 0x4a8   : > { %v3317_v4 = vmax.f32 %v3315_v24, %v3316_v37  ;;  %v3324_v55 = vmax.f32 %v3322_v43, %v3323_v29  ;;  %v2962_v36 = vadd.f32 %v2961_v34, %v6005_v38  ;;  %v3051_v40 = vadd.f32 %v3050_v2, %v6007_v39 }
 0x4aa   : > { %v3318_v57 = vrot.slane %v3317_v4, 2  ;;  %v3325_v30 = vrot.slane %v3324_v55, 2  ;;  %v3115_v42 = vmax.f32 %v2962_v36, 0.0  ;;  %v3116_v29 = vmax.f32 %v3051_v40, 0.0  ;;  %v5388_v36 = vld [vmem:[%s7185_s4 + $0x38] sm:$0xff] }
 0x4ab   : > { %v5396_v40 = vld [vmem:[%s7185_s4 + $0x78] sm:$0xff]  ;;  %4619 = vmatpush.bf16.msra.mxu0 %v5388_v36 }
 0x4ac   : > { %v3319_v50 = vmax.f32 %v3317_v4, %v3318_v57  ;;  %v3326_v47 = vmax.f32 %v3324_v55, %v3325_v30  ;;  %v3771_v14 = vpop.f32.mrf.mxu1  ;;  %4633 = vmatpush.bf16.msra.mxu1 %v5396_v40 }
 0x4ad   : > { %v3772_v53 = vadd.f32 %v6763_v26, %v3771_v14 }
 0x4ae   : > { %v3320_v51 = vrot.slane %v3319_v50, 1  ;;  %v3327_v41 = vrot.slane %v3326_v47, 1 }
 0x4af   : > { %v2963_v56 = vpop.f32.mrf.mxu2  ;;  %v3052_v61 = vpop.f32.mrf.mxu3  ;;  %v3826_v43 = vmax.f32 %v3772_v53, 0.0 }
 0x4b0   : > { %v6868_v24 = vmax.f32 %v3319_v50, %v3320_v51  ;;  %v2964_v37 = vadd.f32 %v2963_v56, %v6005_v38  ;;  %v3053_v57 = vadd.f32 %v3052_v61, %v6007_v39  ;;  %v6872_v30 = vmax.f32 %v3326_v47, %v3327_v41 }
 0x4b1   : > { %v3849_v2 = vpack.c.bf16 %v3826_v43, %v3825_v52 }
 0x4b2   : > { %7240 = vst [vmem:[#allocation28_spill] sm:$0xff] %v6868_v24  ;;  %v3117_v4 = vmax.f32 %v2964_v37, 0.0  ;;  %v3118_v55 = vmax.f32 %v3053_v57, 0.0 }
 0x4b3   : > { %7241 = vst [vmem:[#allocation29_spill] sm:$0xff] %v6872_v30 }
 0x4b4   : > { %v3329_v50 = vmax.f32 %v3115_v42, %v3117_v4  ;;  %v3336_v14 = vmax.f32 %v3116_v29, %v3118_v55  ;;  %3905 = vmatmul.bf16.gmra.mxu2 %v3849_v2  ;;  %3994 = vmatmul.bf16.gmra.mxu3 %v3849_v2  ;;  %v3774_v51 = vpop.f32.mrf.mxu1 }
 0x4b5   : > { %v3775_v57 = vadd.f32 %v6763_v26, %v3774_v51 }
 0x4b6   : > { %v3330_v53 = vrot.slane %v3329_v50, 4  ;;  %v3337_v56 = vrot.slane %v3336_v14, 4 }
 0x4b7   : > { %v3866_v47 = vpop.f32.mrf.mxu2  ;;  %v3955_v41 = vpop.f32.mrf.mxu3  ;;  %v3827_v30 = vmax.f32 %v3775_v57, 0.0 }
 0x4b8   : > { %v3331_v52 = vmax.f32 %v3329_v50, %v3330_v53  ;;  %v3338_v61 = vmax.f32 %v3336_v14, %v3337_v56  ;;  %v3867_v2 = vadd.f32 %v3866_v47, %v6005_v38  ;;  %v3956_v3 = vadd.f32 %v3955_v41, %v6007_v39 }
 0x4ba   : > { %v3332_v43 = vrot.slane %v3331_v52, 2  ;;  %v3339_v37 = vrot.slane %v3338_v61, 2  ;;  %v4035_v40 = vmax.f32 %v3867_v2, 0.0 }
 0x4bc   : > { %v3333_v42 = vmax.f32 %v3331_v52, %v3332_v43  ;;  %v3340_v29 = vmax.f32 %v3338_v61, %v3339_v37  ;;  %v3776_v4 = vpop.f32.mrf.mxu1  ;;  %v4036_v37 = vmax.f32 %v3956_v3, 0.0 }
 0x4bd   : > { %v3777_v34 = vadd.f32 %v6763_v26, %v3776_v4 }
 0x4be   : > { %v3334_v55 = vrot.slane %v3333_v42, 1  ;;  %v3341_v49 = vrot.slane %v3340_v29, 1 }
 0x4bf   : > { %v3868_v50 = vpop.f32.mrf.mxu2  ;;  %v3957_v14 = vpop.f32.mrf.mxu3  ;;  %v3828_v36 = vmax.f32 %v3777_v34, 0.0 }
 0x4c0   : > { %v6888_v53 = vmax.f32 %v3333_v42, %v3334_v55  ;;  %v6890_v56 = vmax.f32 %v3340_v29, %v3341_v49  ;;  %v3869_v51 = vadd.f32 %v3868_v50, %v6005_v38  ;;  %v3958_v47 = vadd.f32 %v3957_v14, %v6007_v39 }
 0x4c1   : > { %v3850_v43 = vpack.c.bf16 %v3828_v36, %v3827_v30 }
 0x4c2   : > { %7242 = vst [vmem:[#allocation30_spill] sm:$0xff] %v6888_v53  ;;  %v4037_v41 = vmax.f32 %v3869_v51, 0.0  ;;  %v4038_v57 = vmax.f32 %v3958_v47, 0.0 }
 0x4c3   : > { %7243 = vst [vmem:[#allocation31_spill] sm:$0xff] %v6890_v56 }
 0x4c4   : > { %v4099_v42 = vmax.f32 %v4035_v40, %v4037_v41  ;;  %3910 = vmatmul.bf16.gmra.mxu2 %v3850_v43  ;;  %3999 = vmatmul.bf16.gmra.mxu3 %v3850_v43  ;;  %v4106_v49 = vmax.f32 %v4036_v37, %v4038_v57  ;;  %v3779_v34 = vpop.f32.mrf.mxu1 }
 0x4c5   : > { %v3780_v53 = vadd.f32 %v6763_v26, %v3779_v34 }
 0x4c6   : > { %v4100_v29 = vrot.slane %v4099_v42, 4  ;;  %v4107_v4 = vrot.slane %v4106_v49, 4 }
 0x4c7   : > { %v3871_v2 = vpop.f32.mrf.mxu2  ;;  %v3960_v55 = vpop.f32.mrf.mxu3  ;;  %v3829_v41 = vmax.f32 %v3780_v53, 0.0  ;;  %v7245_v53 = vmax.f32 %v6307_v44, %v6620_v54  ;;  %v5395_v44 = vld [vmem:[%s7185_s4 + $0x70] sm:$0xff] }
 0x4c8   : > { %v4101_v50 = vmax.f32 %v4099_v42, %v4100_v29  ;;  %v4108_v14 = vmax.f32 %v4106_v49, %v4107_v4  ;;  %v3872_v3 = vadd.f32 %v3871_v2, %v6005_v38  ;;  %v3961_v36 = vadd.f32 %v3960_v55, %v6007_v39  ;;  %4634 = vmatpush.bf16.msra.mxu1 %v5395_v44 }
 0x4c9   : > { %v7244_v2 = vmax.f32 %v6305_v62, %v6616_v23  ;;  %v5387_v62 = vld [vmem:[%s7185_s4 + $0x30] sm:$0xff] }
 0x4ca   : > { %v4102_v24 = vrot.slane %v4101_v50, 2  ;;  %v4109_v52 = vrot.slane %v4108_v14, 2  ;;  %v4040_v4 = vmax.f32 %v3961_v36, 0.0  ;;  %4620 = vmatpush.bf16.msra.mxu0 %v5387_v62 }
 0x4cc   : > { %v4103_v61 = vmax.f32 %v4101_v50, %v4102_v24  ;;  %v4110_v30 = vmax.f32 %v4108_v14, %v4109_v52  ;;  %v3781_v51 = vpop.f32.mrf.mxu1  ;;  %v4039_v52 = vmax.f32 %v3872_v3, 0.0 }
 0x4cd   : > { %v3782_v47 = vadd.f32 %v6763_v26, %v3781_v51 }
 0x4ce   : > { %v4104_v40 = vrot.slane %v4103_v61, 1  ;;  %v4111_v43 = vrot.slane %v4110_v30, 1 }
 0x4cf   : > { %v3873_v37 = vpop.f32.mrf.mxu2  ;;  %v3962_v57 = vpop.f32.mrf.mxu3  ;;  %v3830_v49 = vmax.f32 %v3782_v47, 0.0 }
 0x4d0   : > { %v4105_v42 = vmax.f32 %v4103_v61, %v4104_v40  ;;  %v3874_v29 = vadd.f32 %v3873_v37, %v6005_v38  ;;  %v3963_v34 = vadd.f32 %v3962_v57, %v6007_v39  ;;  %v4112_v24 = vmax.f32 %v4110_v30, %v4111_v43 }
 0x4d1   : > { %v3851_v50 = vpack.c.bf16 %v3830_v49, %v3829_v41 }
 0x4d2   : > { %v4323_v55 = vmax.f32 %v7244_v2, %v4105_v42  ;;  %v4041_v14 = vmax.f32 %v3874_v29, 0.0  ;;  %v4042_v51 = vmax.f32 %v3963_v34, 0.0  ;;  %v4324_v56 = vmax.f32 %v7245_v53, %v4112_v24 }
 0x4d4   : > { %v4113_v61 = vmax.f32 %v4039_v52, %v4041_v14  ;;  %v4120_v40 = vmax.f32 %v4040_v4, %v4042_v51  ;;  %3915 = vmatmul.bf16.gmra.mxu2 %v3851_v50  ;;  %4004 = vmatmul.bf16.gmra.mxu3 %v3851_v50  ;;  %v3784_v47 = vpop.f32.mrf.mxu1 }
 0x4d5   : > { %v3785_v41 = vadd.f32 %v6763_v26, %v3784_v47 }
 0x4d6   : > { %v4114_v37 = vrot.slane %v4113_v61, 4  ;;  %v4121_v30 = vrot.slane %v4120_v40, 4 }
 0x4d7   : > { %v3876_v3 = vpop.f32.mrf.mxu2  ;;  %v3965_v36 = vpop.f32.mrf.mxu3  ;;  %v3831_v2 = vmax.f32 %v3785_v41, 0.0 }
 0x4d8   : > { %v4115_v43 = vmax.f32 %v4113_v61, %v4114_v37  ;;  %v4122_v57 = vmax.f32 %v4120_v40, %v4121_v30  ;;  %v3877_v29 = vadd.f32 %v3876_v3, %v6005_v38  ;;  %v3966_v50 = vadd.f32 %v3965_v36, %v6007_v39 }
 0x4d9   : > { %v4355_v37 = vpack.c.bf16 %v4323_v55, %v4323_v55  ;;  %v4356_v30 = vpack.c.bf16 %v4324_v56, %v4324_v56 }
 0x4da   : > { %v4116_v23 = vrot.slane %v4115_v43, 2  ;;  %v4123_v54 = vrot.slane %v4122_v57, 2 }
 0x4db   : > { %v4452_v56 = vunpack.c.l.b16 %v4355_v37 }
 0x4dc   : > { %v4117_v42 = vmax.f32 %v4115_v43, %v4116_v23  ;;  %v4124_v49 = vmax.f32 %v4122_v57, %v4123_v54  ;;  %v3786_v34 = vpop.f32.mrf.mxu1  ;;  %v4043_v43 = vmax.f32 %v3877_v29, 0.0  ;;  %v7246_v57 = vld [vmem:[#allocation14_spill] sm:$0xff]  ;;  %v7248_v23 = vmax.f32 %v6331_v48, %v6637_v25 }
 0x4dd   : > { %v3787_v4 = vadd.f32 %v6763_v26, %v3786_v34  ;;  %v7247_v62 = vmax.f32 %v6329_v45, %v7246_v57 }
 0x4de   : > { %v4118_v24 = vrot.slane %v4117_v42, 1  ;;  %v4125_v52 = vrot.slane %v4124_v49, 1 }
 0x4df   : > { %v3878_v14 = vpop.f32.mrf.mxu2  ;;  %v3967_v51 = vpop.f32.mrf.mxu3  ;;  %v3832_v40 = vmax.f32 %v3787_v4, 0.0  ;;  %v4453_v4 = vunpack.c.l.b16 %v4356_v30 }
 0x4e0   : > { %v4119_v53 = vmax.f32 %v4117_v42, %v4118_v24  ;;  %v4126_v61 = vmax.f32 %v4124_v49, %v4125_v52  ;;  %v3879_v47 = vadd.f32 %v3878_v14, %v6005_v38  ;;  %v3968_v3 = vadd.f32 %v3967_v51, %v6007_v39 }
 0x4e1   : > { %v3852_v54 = vpack.c.bf16 %v3832_v40, %v3831_v2  ;;  %v4044_v42 = vmax.f32 %v3966_v50, 0.0 }
 0x4e2   : > { %v4325_v44 = vmax.f32 %v7247_v62, %v4119_v53  ;;  %v4326_v36 = vmax.f32 %v7248_v23, %v4126_v61  ;;  %v4045_v41 = vmax.f32 %v3879_v47, 0.0  ;;  %v4046_v49 = vmax.f32 %v3968_v3, 0.0 }
 0x4e4   : > { %v4357_v34 = vpack.c.bf16 %v4325_v44, %v4325_v44  ;;  %v4358_v24 = vpack.c.bf16 %v4326_v36, %v4326_v36  ;;  %v4127_v52 = vmax.f32 %v4043_v43, %v4045_v41  ;;  %3920 = vmatmul.bf16.gmra.mxu2 %v3852_v54  ;;  %4009 = vmatmul.bf16.gmra.mxu3 %v3852_v54  ;;  %v3789_v29 = vpop.f32.mrf.mxu1 }
 0x4e5   : > { %v4134_v55 = vmax.f32 %v4044_v42, %v4046_v49  ;;  %v3790_v37 = vadd.f32 %v6763_v26, %v3789_v29 }
 0x4e6   : > { %v4454_v45 = vunpack.c.l.b16 %v4357_v34  ;;  %v4455_v14 = vunpack.c.l.b16 %v4358_v24  ;;  %v4128_v51 = vrot.slane %v4127_v52, 4 }
 0x4e7   : > { %v4135_v53 = vrot.slane %v4134_v55, 4  ;;  %v3881_v48 = vpop.f32.mrf.mxu2  ;;  %v3970_v25 = vpop.f32.mrf.mxu3  ;;  %v3833_v41 = vmax.f32 %v3790_v37, 0.0 }
 0x4e8   : > { %v4485_v2 = vsel %vm4484_vm2, %v4454_v45, %v4452_v56  ;;  %v4498_v50 = vsel %vm4484_vm2, %v4455_v14, %v4453_v4  ;;  %v4129_v61 = vmax.f32 %v4127_v52, %v4128_v51  ;;  %v3882_v30 = vadd.f32 %v3881_v48, %v6005_v38  ;;  %v7249_v45 = vld [vmem:[#allocation15_spill] sm:$0xff] }
 0x4e9   : > { %v4136_v40 = vmax.f32 %v4134_v55, %v4135_v53  ;;  %v3971_v62 = vadd.f32 %v3970_v25, %v6007_v39  ;;  %v7250_v14 = vmax.f32 %v6348_v31, %v7249_v45 }
 0x4ea   : > { %v4130_v47 = vrot.slane %v4129_v61, 2  ;;  %v4047_v29 = vmax.f32 %v3882_v30, 0.0 }
 0x4eb   : > { %v4137_v43 = vrot.slane %v4136_v40, 2  ;;  %v4048_v4 = vmax.f32 %v3971_v62, 0.0 }
 0x4ec   : > { %v4131_v3 = vmax.f32 %v4129_v61, %v4130_v47  ;;  %v3791_v44 = vpop.f32.mrf.mxu1  ;;  %v7251_v61 = vmax.f32 %v6350_v7, %v6658_v13  ;;  %v5386_v13 = vld [vmem:[%s7185_s4 + $0x28] sm:$0xff] }
 0x4ed   : > { %v4138_v57 = vmax.f32 %v4136_v40, %v4137_v43  ;;  %v3792_v36 = vadd.f32 %v6763_v26, %v3791_v44  ;;  %4621 = vmatpush.bf16.msra.mxu0 %v5386_v13 }
 0x4ee   : > { %v4132_v23 = vrot.slane %v4131_v3, 1 }
 0x4ef   : > { %v4139_v54 = vrot.slane %v4138_v57, 1  ;;  %v3883_v42 = vpop.f32.mrf.mxu2  ;;  %v3972_v49 = vpop.f32.mrf.mxu3  ;;  %v3834_v24 = vmax.f32 %v3792_v36, 0.0 }
 0x4f0   : > { %v4133_v34 = vmax.f32 %v4131_v3, %v4132_v23  ;;  %v3884_v52 = vadd.f32 %v3883_v42, %v6005_v38  ;;  %v3973_v56 = vadd.f32 %v3972_v49, %v6007_v39  ;;  %v5394_v49 = vld [vmem:[%s7185_s4 + $0x68] sm:$0xff] }
 0x4f1   : > { %v4140_v55 = vmax.f32 %v4138_v57, %v4139_v54  ;;  %v3853_v53 = vpack.c.bf16 %v3834_v24, %v3833_v41  ;;  %4635 = vmatpush.bf16.msra.mxu1 %v5394_v49 }
 0x4f2   : > { %v4327_v51 = vmax.f32 %v7250_v14, %v4133_v34  ;;  %v4049_v48 = vmax.f32 %v3884_v52, 0.0  ;;  %v4050_v25 = vmax.f32 %v3973_v56, 0.0 }
 0x4f3   : > { %v4328_v40 = vmax.f32 %v7251_v61, %v4140_v55 }
 0x4f4   : > { %v4359_v47 = vpack.c.bf16 %v4327_v51, %v4327_v51  ;;  %v4141_v43 = vmax.f32 %v4047_v29, %v4049_v48  ;;  %v4148_v37 = vmax.f32 %v4048_v4, %v4050_v25  ;;  %3925 = vmatmul.bf16.gmra.mxu2 %v3853_v53  ;;  %4014 = vmatmul.bf16.gmra.mxu3 %v3853_v53  ;;  %v3794_v57 = vpop.f32.mrf.mxu1 }
 0x4f5   : > { %v4360_v3 = vpack.c.bf16 %v4328_v40, %v4328_v40  ;;  %v3795_v52 = vadd.f32 %v6763_v26, %v3794_v57  ;;  %v7253_v57 = vld [vmem:[#allocation16_spill] sm:$0xff] }
 0x4f6   : > { %v4456_v30 = vunpack.c.l.b16 %v4359_v47  ;;  %v4142_v62 = vrot.slane %v4141_v43, 4  ;;  %v4149_v44 = vrot.slane %v4148_v37, 4 }
 0x4f7   : > { %v4457_v31 = vunpack.c.l.b16 %v4360_v3  ;;  %v3886_v23 = vpop.f32.mrf.mxu2  ;;  %v3975_v36 = vpop.f32.mrf.mxu3  ;;  %v3835_v14 = vmax.f32 %v3795_v52, 0.0  ;;  %v7252_v3 = vld [vmem:[#allocation5_spill] sm:$0xff] }
 0x4f8   : > { %v4487_v54 = vsel %vm4486_vm3, %v4456_v30, %v4485_v2  ;;  %v4143_v41 = vmax.f32 %v4141_v43, %v4142_v62  ;;  %v4150_v42 = vmax.f32 %v4148_v37, %v4149_v44  ;;  %v3887_v55 = vadd.f32 %v3886_v23, %v6005_v38  ;;  %v7255_v44 = vld [vmem:[#allocation6_spill] sm:$0xff] }
 0x4f9   : > { %v4499_v7 = vsel %vm4486_vm3, %v4457_v31, %v4498_v50  ;;  %v3976_v51 = vadd.f32 %v3975_v36, %v6007_v39  ;;  %v7254_v30 = vmax.f32 %v7252_v3, %v7253_v57  ;;  %v7256_v31 = vld [vmem:[#allocation17_spill] sm:$0xff] }
 0x4fa   : > { %v4144_v34 = vrot.slane %v4143_v41, 2  ;;  %v4151_v24 = vrot.slane %v4150_v42, 2  ;;  %v4051_v43 = vmax.f32 %v3887_v55, 0.0 }
 0x4fc   : > { %v4145_v56 = vmax.f32 %v4143_v41, %v4144_v34  ;;  %v4152_v2 = vmax.f32 %v4150_v42, %v4151_v24  ;;  %v3796_v29 = vpop.f32.mrf.mxu1  ;;  %v4052_v42 = vmax.f32 %v3976_v51, 0.0 }
 0x4fd   : > { %v3797_v45 = vadd.f32 %v6763_v26, %v3796_v29  ;;  %v7257_v26 = vmax.f32 %v7255_v44, %v7256_v31 }
 0x4fe   : > { %v4146_v50 = vrot.slane %v4145_v56, 1  ;;  %v4153_v4 = vrot.slane %v4152_v2, 1 }
 0x4ff   : > { %v3888_v53 = vpop.f32.mrf.mxu2  ;;  %v3977_v48 = vpop.f32.mrf.mxu3  ;;  %v3836_v40 = vmax.f32 %v3797_v45, 0.0 }
 0x500   : > { %v4147_v25 = vmax.f32 %v4145_v56, %v4146_v50  ;;  %v4154_v61 = vmax.f32 %v4152_v2, %v4153_v4  ;;  %v3889_v47 = vadd.f32 %v3888_v53, %v6005_v38  ;;  %v3978_v37 = vadd.f32 %v3977_v48, %v6007_v39 }
 0x501   : > { %v3854_v41 = vpack.c.bf16 %v3836_v40, %v3835_v14  ;;  %v5466_v40 = vld [vmem:[%s7186_s5 + $0x1] ss:$0 sm:$0xff] }
 0x502   : > { %v4329_v62 = vmax.f32 %v7254_v30, %v4147_v25  ;;  %v4330_v23 = vmax.f32 %v7257_v26, %v4154_v61  ;;  %v4053_v36 = vmax.f32 %v3889_v47, 0.0  ;;  %v4054_v13 = vmax.f32 %v3978_v37, 0.0 }
 0x504   : > { %v4361_v49 = vpack.c.bf16 %v4329_v62, %v4329_v62  ;;  %v4362_v34 = vpack.c.bf16 %v4330_v23, %v4330_v23  ;;  %v4155_v24 = vmax.f32 %v4051_v43, %v4053_v36  ;;  %3930 = vmatmul.bf16.gmra.mxu2 %v3854_v41  ;;  %4019 = vmatmul.bf16.gmra.mxu3 %v3854_v41  ;;  %v3799_v56 = vpop.f32.mrf.mxu1 }
 0x505   : > { %v4162_v52 = vmax.f32 %v4052_v42, %v4054_v13  ;;  %v3800_v47 = vadd.f32 %v5466_v40, %v3799_v56 }
 0x506   : > { %v4458_v2 = vunpack.c.l.b16 %v4361_v49  ;;  %v4459_v55 = vunpack.c.l.b16 %v4362_v34  ;;  %v4156_v29 = vrot.slane %v4155_v24, 4 }
 0x507   : > { %v4163_v50 = vrot.slane %v4162_v52, 4  ;;  %v3891_v4 = vpop.f32.mrf.mxu2  ;;  %v3980_v45 = vpop.f32.mrf.mxu3 }
 0x508   : > { %v4489_v53 = vsel %vm4488_vm4, %v4458_v2, %v4487_v54  ;;  %v4500_v14 = vsel %vm4488_vm4, %v4459_v55, %v4499_v7  ;;  %v4157_v51 = vmax.f32 %v4155_v24, %v4156_v29  ;;  %v3892_v3 = vadd.f32 %v3891_v4, %v6005_v38  ;;  %v7259_v29 = vld [vmem:[#allocation7_spill] sm:$0xff] }
 0x509   : > { %v4164_v48 = vmax.f32 %v4162_v52, %v4163_v50  ;;  %v3981_v57 = vadd.f32 %v3980_v45, %v6007_v39  ;;  %v3837_v7 = vmax.f32 %v3800_v47, 0.0  ;;  %v7258_v24 = vmax.f32 %v6391_v35, %v6697_v33  ;;  %v7260_v50 = vld [vmem:[#allocation18_spill] sm:$0xff] }
 0x50a   : > { %v4158_v25 = vrot.slane %v4157_v51, 2  ;;  %v4055_v49 = vmax.f32 %v3892_v3, 0.0  ;;  %v7261_v4 = vmax.f32 %v7259_v29, %v7260_v50 }
 0x50b   : > { %v4165_v61 = vrot.slane %v4164_v48, 2  ;;  %v4056_v34 = vmax.f32 %v3981_v57, 0.0 }
 0x50c   : > { %v4159_v43 = vmax.f32 %v4157_v51, %v4158_v25  ;;  %v3801_v30 = vpop.f32.mrf.mxu1 }
 0x50d   : > { %v4166_v37 = vmax.f32 %v4164_v48, %v4165_v61  ;;  %v3802_v54 = vadd.f32 %v5466_v40, %v3801_v30  ;;  %v5385_v30 = vld [vmem:[%s7185_s4 + $0x20] sm:$0xff] }
 0x50e   : > { %v4160_v62 = vrot.slane %v4159_v43, 1  ;;  %4622 = vmatpush.bf16.msra.mxu0 %v5385_v30 }
 0x50f   : > { %v4167_v44 = vrot.slane %v4166_v37, 1  ;;  %v3893_v31 = vpop.f32.mrf.mxu2  ;;  %v3982_v26 = vpop.f32.mrf.mxu3  ;;  %v3838_v41 = vmax.f32 %v3802_v54, 0.0 }
 0x510   : > { %v4161_v23 = vmax.f32 %v4159_v43, %v4160_v62  ;;  %v3894_v36 = vadd.f32 %v3893_v31, %v6005_v38  ;;  %v3983_v42 = vadd.f32 %v3982_v26, %v6007_v39  ;;  %v5393_v62 = vld [vmem:[%s7185_s4 + $0x60] sm:$0xff] }
 0x511   : > { %v4168_v13 = vmax.f32 %v4166_v37, %v4167_v44  ;;  %v3855_v56 = vpack.c.bf16 %v3838_v41, %v3837_v7  ;;  %4636 = vmatpush.bf16.msra.mxu1 %v5393_v62 }
 0x512   : > { %v4331_v52 = vmax.f32 %v7258_v24, %v4161_v23  ;;  %v4057_v2 = vmax.f32 %v3894_v36, 0.0  ;;  %v4058_v55 = vmax.f32 %v3983_v42, 0.0 }
 0x513   : > { %v4332_v45 = vmax.f32 %v7261_v4, %v4168_v13 }
 0x514   : > { %v4363_v51 = vpack.c.bf16 %v4331_v52, %v4331_v52  ;;  %v4169_v48 = vmax.f32 %v4055_v49, %v4057_v2  ;;  %v4176_v25 = vmax.f32 %v4056_v34, %v4058_v55  ;;  %3935 = vmatmul.bf16.gmra.mxu2 %v3855_v56  ;;  %4024 = vmatmul.bf16.gmra.mxu3 %v3855_v56  ;;  %v3804_v47 = vpop.f32.mrf.mxu1 }
 0x515   : > { %v4364_v61 = vpack.c.bf16 %v4332_v45, %v4332_v45  ;;  %v3805_v41 = vadd.f32 %v5466_v40, %v3804_v47  ;;  %v7264_v47 = vld [vmem:[#allocation19_spill] sm:$0xff] }
 0x516   : > { %v4460_v43 = vunpack.c.l.b16 %v4363_v51  ;;  %v4170_v37 = vrot.slane %v4169_v48, 4  ;;  %v4177_v3 = vrot.slane %v4176_v25, 4 }
 0x517   : > { %v4461_v35 = vunpack.c.l.b16 %v4364_v61  ;;  %v3896_v33 = vpop.f32.mrf.mxu2  ;;  %v3985_v57 = vpop.f32.mrf.mxu3  ;;  %v3839_v56 = vmax.f32 %v3805_v41, 0.0  ;;  %v7263_v61 = vld [vmem:[#allocation8_spill] sm:$0xff] }
 0x518   : > { %v4491_v54 = vsel %vm4490_vm5, %v4460_v43, %v4489_v53  ;;  %v4171_v44 = vmax.f32 %v4169_v48, %v4170_v37  ;;  %v4178_v7 = vmax.f32 %v4176_v25, %v4177_v3  ;;  %v3897_v13 = vadd.f32 %v3896_v33, %v6005_v38 }
 0x519   : > { %v4501_v31 = vsel %vm4490_vm5, %v4461_v35, %v4500_v14  ;;  %v3986_v53 = vadd.f32 %v3985_v57, %v6007_v39  ;;  %v7262_v48 = vmax.f32 %v6410_v8, %v6714_v16 }
 0x51a   : > { %v4172_v26 = vrot.slane %v4171_v44, 2  ;;  %v4179_v23 = vrot.slane %v4178_v7, 2  ;;  %v4059_v45 = vmax.f32 %v3897_v13, 0.0 }
 0x51b   : > { %v4060_v35 = vmax.f32 %v3986_v53, 0.0 }
 0x51c   : > { %v4173_v36 = vmax.f32 %v4171_v44, %v4172_v26  ;;  %v4180_v42 = vmax.f32 %v4178_v7, %v4179_v23  ;;  %v3806_v49 = vpop.f32.mrf.mxu1 }
 0x51d   : > { %v3807_v52 = vadd.f32 %v5466_v40, %v3806_v49  ;;  %v7265_v40 = vmax.f32 %v7263_v61, %v7264_v47 }
 0x51e   : > { %v4174_v34 = vrot.slane %v4173_v36, 1  ;;  %v4181_v24 = vrot.slane %v4180_v42, 1 }
 0x51f   : > { %v3898_v2 = vpop.f32.mrf.mxu2  ;;  %v3987_v55 = vpop.f32.mrf.mxu3  ;;  %v3840_v50 = vmax.f32 %v3807_v52, 0.0 }
 0x520   : > { %v4175_v29 = vmax.f32 %v4173_v36, %v4174_v34  ;;  %v4182_v14 = vmax.f32 %v4180_v42, %v4181_v24  ;;  %v3899_v4 = vadd.f32 %v3898_v2, %v6005_v38  ;;  %v3988_v51 = vadd.f32 %v3987_v55, %v6007_v39 }
 0x521   : > { %v3856_v37 = vpack.c.bf16 %v3840_v50, %v3839_v56 }
 0x522   : > { %v4333_v25 = vmax.f32 %v7262_v48, %v4175_v29  ;;  %v4334_v43 = vmax.f32 %v7265_v40, %v4182_v14  ;;  %v4061_v3 = vmax.f32 %v3899_v4, 0.0  ;;  %v4062_v33 = vmax.f32 %v3988_v51, 0.0 }
 0x523   : > { %v7266_v48 = vmax.f32 %v6429_v46, %v6731_v1  ;;  %v5392_v46 = vld [vmem:[%s7185_s4 + $0x58] sm:$0xff] }
 0x524   : > { %v4365_v57 = vpack.c.bf16 %v4333_v25, %v4333_v25  ;;  %v4366_v30 = vpack.c.bf16 %v4334_v43, %v4334_v43  ;;  %v4183_v62 = vmax.f32 %v4059_v45, %v4061_v3  ;;  %3940 = vmatmul.bf16.gmra.mxu2 %v3856_v37  ;;  %4029 = vmatmul.bf16.gmra.mxu3 %v3856_v37  ;;  %v7267_v43 = vld [vmem:[#allocation20_spill] sm:$0xff] }
 0x525   : > { %v4190_v44 = vmax.f32 %v4060_v35, %v4062_v33  ;;  %v7268_v37 = vmax.f32 %v6431_v59, %v7267_v43  ;;  %4637 = vmatpush.bf16.msra.mxu1 %v5392_v46 }
 0x526   : > { %v4462_v7 = vunpack.c.l.b16 %v4365_v57  ;;  %v4463_v26 = vunpack.c.l.b16 %v4366_v30  ;;  %v4184_v23 = vrot.slane %v4183_v62, 4 }
 0x527   : > { %v4191_v8 = vrot.slane %v4190_v44, 4  ;;  %v3901_v16 = vpop.f32.mrf.mxu2  ;;  %v3990_v41 = vpop.f32.mrf.mxu3 }
 0x528   : > { %v4493_v36 = vsel %vm4492_vm6, %v4462_v7, %v4491_v54  ;;  %v4502_v42 = vsel %vm4492_vm6, %v4463_v26, %v4501_v31  ;;  %v4185_v13 = vmax.f32 %v4183_v62, %v4184_v23  ;;  %v3902_v53 = vadd.f32 %v3901_v16, %v6005_v38  ;;  %v5384_v26 = vld [vmem:[%s7185_s4 + $0x18] sm:$0xff] }
 0x529   : > { %v4192_v49 = vmax.f32 %v4190_v44, %v4191_v8  ;;  %v3991_v55 = vadd.f32 %v3990_v41, %v6007_v39  ;;  %4623 = vmatpush.bf16.msra.mxu0 %v5384_v26 }
 0x52a   : > { %v4186_v34 = vrot.slane %v4185_v13, 2  ;;  %v4063_v51 = vmax.f32 %v3902_v53, 0.0 }
 0x52b   : > { %v4193_v24 = vrot.slane %v4192_v49, 2  ;;  %v4064_v61 = vmax.f32 %v3991_v55, 0.0 }
 0x52c   : > { %v4187_v52 = vmax.f32 %v4185_v13, %v4186_v34 }
 0x52d   : > { %v4194_v56 = vmax.f32 %v4192_v49, %v4193_v24 }
 0x52e   : > { %v4188_v2 = vrot.slane %v4187_v52, 1 }
 0x52f   : > { %v4195_v29 = vrot.slane %v4194_v56, 1  ;;  %v3903_v14 = vpop.f32.mrf.mxu2  ;;  %v3992_v50 = vpop.f32.mrf.mxu3 }
 0x530   : > { %v4189_v4 = vmax.f32 %v4187_v52, %v4188_v2  ;;  %v3904_v45 = vadd.f32 %v3903_v14, %v6005_v38  ;;  %v3993_v54 = vadd.f32 %v3992_v50, %v6007_v39 }
 0x531   : > { %v4196_v31 = vmax.f32 %v4194_v56, %v4195_v29 }
 0x532   : > { %v4335_v25 = vmax.f32 %v7266_v48, %v4189_v4  ;;  %v4065_v47 = vmax.f32 %v3904_v45, 0.0  ;;  %v4066_v40 = vmax.f32 %v3993_v54, 0.0 }
 0x533   : > { %v4336_v3 = vmax.f32 %v7268_v37, %v4196_v31  ;;  %v7269_v31 = vld [vmem:[#allocation21_spill] sm:$0xff] }
 0x534   : > { %v4367_v35 = vpack.c.bf16 %v4335_v25, %v4335_v25  ;;  %v4197_v33 = vmax.f32 %v4063_v51, %v4065_v47  ;;  %v4204_v57 = vmax.f32 %v4064_v61, %v4066_v40  ;;  %v7270_v51 = vmax.f32 %v6448_v0, %v7269_v31  ;;  %v7271_v25 = vld [vmem:[#allocation9_spill] sm:$0xff]  ;;  %v7272_v61 = vld [vmem:[#allocation22_spill] sm:$0xff] }
 0x535   : > { %v4368_v30 = vpack.c.bf16 %v4336_v3, %v4336_v3  ;;  %v7273_v47 = vmax.f32 %v7271_v25, %v7272_v61 }
 0x536   : > { %v4464_v62 = vunpack.c.l.b16 %v4367_v35  ;;  %v4198_v44 = vrot.slane %v4197_v33, 4  ;;  %v4205_v7 = vrot.slane %v4204_v57, 4 }
 0x537   : > { %v4465_v1 = vunpack.c.l.b16 %v4368_v30  ;;  %v3906_v23 = vpop.f32.mrf.mxu2  ;;  %v3995_v59 = vpop.f32.mrf.mxu3 }
 0x538   : > { %v4199_v8 = vmax.f32 %v4197_v33, %v4198_v44  ;;  %v4206_v16 = vmax.f32 %v4204_v57, %v4205_v7  ;;  %v4495_v41 = vsel %vm4494_vm7, %v4464_v62, %v4493_v36  ;;  %v3907_v56 = vadd.f32 %v3906_v23, %v6005_v38 }
 0x539   : > { %v4503_v13 = vsel %vm4494_vm7, %v4465_v1, %v4502_v42  ;;  %v3996_v53 = vadd.f32 %v3995_v59, %v6007_v39 }
 0x53a   : > { %v4200_v49 = vrot.slane %v4199_v8, 2  ;;  %v4207_v34 = vrot.slane %v4206_v16, 2  ;;  %v4067_v54 = vmax.f32 %v3907_v56, 0.0 }
 0x53b   : > { %v4068_v42 = vmax.f32 %v3996_v53, 0.0 }
 0x53c   : > { %v4201_v24 = vmax.f32 %v4199_v8, %v4200_v49  ;;  %v4208_v52 = vmax.f32 %v4206_v16, %v4207_v34 }
 0x53e   : > { %v4202_v2 = vrot.slane %v4201_v24, 1  ;;  %v4209_v55 = vrot.slane %v4208_v52, 1 }
 0x53f   : > { %v3908_v29 = vpop.f32.mrf.mxu2  ;;  %v3997_v14 = vpop.f32.mrf.mxu3 }
 0x540   : > { %v4203_v50 = vmax.f32 %v4201_v24, %v4202_v2  ;;  %v4210_v4 = vmax.f32 %v4208_v52, %v4209_v55  ;;  %v3909_v45 = vadd.f32 %v3908_v29, %v6005_v38  ;;  %v3998_v36 = vadd.f32 %v3997_v14, %v6007_v39 }
 0x542   : > { %v4337_v48 = vmax.f32 %v7270_v51, %v4203_v50  ;;  %v4338_v40 = vmax.f32 %v7273_v47, %v4210_v4  ;;  %v4069_v43 = vmax.f32 %v3909_v45, 0.0  ;;  %v4070_v37 = vmax.f32 %v3998_v36, 0.0 }
 0x543   : > { %v7274_v45 = vmax.f32 %v6467_v18, %v6770_v28  ;;  %v5391_v18 = vld [vmem:[%s7185_s4 + $0x50] sm:$0xff] }
 0x544   : > { %v4369_v3 = vpack.c.bf16 %v4337_v48, %v4337_v48  ;;  %v4370_v35 = vpack.c.bf16 %v4338_v40, %v4338_v40  ;;  %v4211_v33 = vmax.f32 %v4067_v54, %v4069_v43  ;;  %v4218_v57 = vmax.f32 %v4068_v42, %v4070_v37  ;;  %v7275_v54 = vld [vmem:[#allocation10_spill] sm:$0xff]  ;;  %v7276_v42 = vld [vmem:[#allocation23_spill] sm:$0xff]  ;;  %4638 = vmatpush.bf16.msra.mxu1 %v5391_v18 }
 0x545   : > { %v7277_v31 = vmax.f32 %v7275_v54, %v7276_v42 }
 0x546   : > { %v4466_v30 = vunpack.c.l.b16 %v4369_v3  ;;  %v4467_v62 = vunpack.c.l.b16 %v4370_v35  ;;  %v4212_v44 = vrot.slane %v4211_v33, 4  ;;  %v4219_v7 = vrot.slane %v4218_v57, 4 }
 0x547   : > { %v3911_v26 = vpop.f32.mrf.mxu2  ;;  %v4000_v46 = vpop.f32.mrf.mxu3 }
 0x548   : > { %v4213_v1 = vmax.f32 %v4211_v33, %v4212_v44  ;;  %v4220_v0 = vmax.f32 %v4218_v57, %v4219_v7  ;;  %v7026_v23 = vsel %vm4496_vm8, %v4466_v30, %v4495_v41  ;;  %v7029_v59 = vsel %vm4496_vm8, %v4467_v62, %v4503_v13  ;;  %v5383_v57 = vld [vmem:[%s7185_s4 + $0x10] sm:$0xff] }
 0x549   : > { %v3912_v24 = vadd.f32 %v3911_v26, %v6005_v38  ;;  %v4001_v52 = vadd.f32 %v4000_v46, %v6007_v39  ;;  %4624 = vmatpush.bf16.msra.mxu0 %v5383_v57 }
 0x54a   : > { %v4214_v8 = vrot.slane %v4213_v1, 2  ;;  %v4221_v16 = vrot.slane %v4220_v0, 2 }
 0x54b   : > { %v4071_v13 = vmax.f32 %v3912_v24, 0.0  ;;  %v4072_v4 = vmax.f32 %v4001_v52, 0.0 }
 0x54c   : > { %v4215_v49 = vmax.f32 %v4213_v1, %v4214_v8  ;;  %v4222_v34 = vmax.f32 %v4220_v0, %v4221_v16 }
 0x54e   : > { %v4216_v56 = vrot.slane %v4215_v49, 1  ;;  %v4223_v53 = vrot.slane %v4222_v34, 1 }
 0x54f   : > { %v3913_v2 = vpop.f32.mrf.mxu2  ;;  %v4002_v55 = vpop.f32.mrf.mxu3 }
 0x550   : > { %v4217_v29 = vmax.f32 %v4215_v49, %v4216_v56  ;;  %v4224_v14 = vmax.f32 %v4222_v34, %v4223_v53  ;;  %v3914_v41 = vadd.f32 %v3913_v2, %v6005_v38  ;;  %v4003_v50 = vadd.f32 %v4002_v55, %v6007_v39 }
 0x551   : > { %v7278_v55 = vmax.f32 %v6486_v20, %v6787_v15 }
 0x552   : > { %v4339_v36 = vmax.f32 %v7274_v45, %v4217_v29  ;;  %v4340_v51 = vmax.f32 %v7277_v31, %v4224_v14  ;;  %v4073_v48 = vmax.f32 %v3914_v41, 0.0  ;;  %v4074_v25 = vmax.f32 %v4003_v50, 0.0  ;;  %v7279_v14 = vld [vmem:[#allocation11_spill] sm:$0xff]  ;;  %v7280_v41 = vld [vmem:[#allocation24_spill] sm:$0xff] }
 0x553   : > { %v7281_v50 = vmax.f32 %v7279_v14, %v7280_v41 }
 0x554   : > { %v4225_v61 = vmax.f32 %v4071_v13, %v4073_v48  ;;  %v4232_v47 = vmax.f32 %v4072_v4, %v4074_v25  ;;  %v4371_v52 = vpack.c.bf16 %v4339_v36, %v4339_v36  ;;  %v4372_v56 = vpack.c.bf16 %v4340_v51, %v4340_v51 }
 0x556   : > { %v4226_v40 = vrot.slane %v4225_v61, 4  ;;  %v4233_v43 = vrot.slane %v4232_v47, 4  ;;  %v4468_v25 = vunpack.c.l.b16 %v4371_v52 }
 0x557   : > { %v3916_v37 = vpop.f32.mrf.mxu2  ;;  %v4005_v3 = vpop.f32.mrf.mxu3 }
 0x558   : > { %v4227_v35 = vmax.f32 %v4225_v61, %v4226_v40  ;;  %v4234_v33 = vmax.f32 %v4232_v47, %v4233_v43  ;;  %v3917_v7 = vadd.f32 %v3916_v37, %v6005_v38  ;;  %v4006_v26 = vadd.f32 %v4005_v3, %v6007_v39 }
 0x559   : > { %v4469_v61 = vunpack.c.l.b16 %v4372_v56  ;;  %v7283_v56 = vld [vmem:[#allocation12_spill] sm:$0xff] }
 0x55a   : > { %v4228_v28 = vrot.slane %v4227_v35, 2  ;;  %v4235_v30 = vrot.slane %v4234_v33, 2  ;;  %v4075_v53 = vmax.f32 %v3917_v7, 0.0  ;;  %v4076_v2 = vmax.f32 %v4006_v26, 0.0 }
 0x55c   : > { %v4229_v62 = vmax.f32 %v4227_v35, %v4228_v28  ;;  %v4236_v44 = vmax.f32 %v4234_v33, %v4235_v30 }
 0x55e   : > { %v4230_v46 = vrot.slane %v4229_v62, 1  ;;  %v4237_v1 = vrot.slane %v4236_v44, 1 }
 0x55f   : > { %v3918_v0 = vpop.f32.mrf.mxu2  ;;  %v4007_v8 = vpop.f32.mrf.mxu3 }
 0x560   : > { %v4231_v16 = vmax.f32 %v4229_v62, %v4230_v46  ;;  %v4238_v49 = vmax.f32 %v4236_v44, %v4237_v1  ;;  %v3919_v34 = vadd.f32 %v3918_v0, %v6005_v38  ;;  %v4008_v24 = vadd.f32 %v4007_v8, %v6007_v39 }
 0x562   : > { %v4341_v29 = vmax.f32 %v7278_v55, %v4231_v16  ;;  %v4342_v13 = vmax.f32 %v7281_v50, %v4238_v49  ;;  %v4077_v4 = vmax.f32 %v3919_v34, 0.0  ;;  %v4078_v45 = vmax.f32 %v4008_v24, 0.0 }
 0x563   : > { %v7282_v24 = vmax.f32 %v6510_v21, %v6804_v12 }
 0x564   : > { %v4373_v54 = vpack.c.bf16 %v4341_v29, %v4341_v29  ;;  %v4374_v42 = vpack.c.bf16 %v4342_v13, %v4342_v13  ;;  %v4239_v31 = vmax.f32 %v4075_v53, %v4077_v4  ;;  %v4246_v48 = vmax.f32 %v4076_v2, %v4078_v45  ;;  %v7284_v53 = vld [vmem:[#allocation25_spill] sm:$0xff] }
 0x565   : > { %v7285_v2 = vmax.f32 %v7283_v56, %v7284_v53 }
 0x566   : > { %v4470_v36 = vunpack.c.l.b16 %v4373_v54  ;;  %v4471_v51 = vunpack.c.l.b16 %v4374_v42  ;;  %v4240_v47 = vrot.slane %v4239_v31, 4  ;;  %v4247_v40 = vrot.slane %v4246_v48, 4 }
 0x567   : > { %v3921_v43 = vpop.f32.mrf.mxu2  ;;  %v4010_v37 = vpop.f32.mrf.mxu3 }
 0x568   : > { %v4505_v20 = vsel %vm4484_vm2, %v4470_v36, %v4468_v25  ;;  %v4512_v15 = vsel %vm4484_vm2, %v4471_v51, %v4469_v61  ;;  %v4241_v3 = vmax.f32 %v4239_v31, %v4240_v47  ;;  %v4248_v35 = vmax.f32 %v4246_v48, %v4247_v40  ;;  %v5382_v51 = vld [vmem:[%s7185_s4 + $0x8] sm:$0xff] }
 0x569   : > { %v3922_v30 = vadd.f32 %v3921_v43, %v6005_v38  ;;  %v4011_v62 = vadd.f32 %v4010_v37, %v6007_v39  ;;  %v5390_v47 = vld [vmem:[%s7185_s4 + $0x48] sm:$0xff]  ;;  %4625 = vmatpush.bf16.msra.mxu0 %v5382_v51 }
 0x56a   : > { %v4242_v33 = vrot.slane %v4241_v3, 2  ;;  %v4249_v57 = vrot.slane %v4248_v35, 2  ;;  %4639 = vmatpush.bf16.msra.mxu1 %v5390_v47 }
 0x56b   : > { %v4079_v49 = vmax.f32 %v3922_v30, 0.0  ;;  %v4080_v34 = vmax.f32 %v4011_v62, 0.0 }
 0x56c   : > { %v4243_v18 = vmax.f32 %v4241_v3, %v4242_v33  ;;  %v4250_v28 = vmax.f32 %v4248_v35, %v4249_v57 }
 0x56e   : > { %v4244_v44 = vrot.slane %v4243_v18, 1  ;;  %v4251_v7 = vrot.slane %v4250_v28, 1 }
 0x56f   : > { %v3923_v26 = vpop.f32.mrf.mxu2  ;;  %v4012_v46 = vpop.f32.mrf.mxu3 }
 0x570   : > { %v4245_v1 = vmax.f32 %v4243_v18, %v4244_v44  ;;  %v4252_v0 = vmax.f32 %v4250_v28, %v4251_v7  ;;  %v3924_v8 = vadd.f32 %v3923_v26, %v6005_v38  ;;  %v4013_v16 = vadd.f32 %v4012_v46, %v6007_v39 }
 0x571   : > { %v7286_v46 = vmax.f32 %v6529_v22, %v6821_v32 }
 0x572   : > { %v4343_v52 = vmax.f32 %v7282_v24, %v4245_v1  ;;  %v4344_v55 = vmax.f32 %v7285_v2, %v4252_v0  ;;  %v4081_v29 = vmax.f32 %v3924_v8, 0.0  ;;  %v4082_v14 = vmax.f32 %v4013_v16, 0.0  ;;  %v7287_v0 = vld [vmem:[#allocation26_spill] sm:$0xff] }
 0x573   : > { %v7288_v8 = vmax.f32 %v6531_v5, %v7287_v0 }
 0x574   : > { %v4375_v41 = vpack.c.bf16 %v4343_v52, %v4343_v52  ;;  %v4376_v50 = vpack.c.bf16 %v4344_v55, %v4344_v55  ;;  %v4253_v13 = vmax.f32 %v4079_v49, %v4081_v29  ;;  %v4260_v4 = vmax.f32 %v4080_v34, %v4082_v14 }
 0x576   : > { %v4472_v45 = vunpack.c.l.b16 %v4375_v41  ;;  %v4473_v54 = vunpack.c.l.b16 %v4376_v50  ;;  %v4254_v42 = vrot.slane %v4253_v13, 4  ;;  %v4261_v31 = vrot.slane %v4260_v4, 4 }
 0x577   : > { %v3926_v48 = vpop.f32.mrf.mxu2  ;;  %v4015_v25 = vpop.f32.mrf.mxu3 }
 0x578   : > { %v4506_v61 = vsel %vm4486_vm3, %v4472_v45, %v4505_v20  ;;  %v4513_v21 = vsel %vm4486_vm3, %v4473_v54, %v4512_v15  ;;  %v4255_v12 = vmax.f32 %v4253_v13, %v4254_v42  ;;  %v4262_v36 = vmax.f32 %v4260_v4, %v4261_v31 }
 0x579   : > { %v3927_v20 = vadd.f32 %v3926_v48, %v6005_v38  ;;  %v4016_v15 = vadd.f32 %v4015_v25, %v6007_v39 }
 0x57a   : > { %v4256_v40 = vrot.slane %v4255_v12, 2  ;;  %v4263_v43 = vrot.slane %v4262_v36, 2 }
 0x57b   : > { %v4083_v7 = vmax.f32 %v3927_v20, 0.0  ;;  %v4084_v26 = vmax.f32 %v4016_v15, 0.0  ;;  %v7290_v15 = vmax.f32 %v6550_v6, %v6842_v11 }
 0x57c   : > { %v4257_v37 = vmax.f32 %v4255_v12, %v4256_v40  ;;  %v4264_v3 = vmax.f32 %v4262_v36, %v4263_v43 }
 0x57e   : > { %v4258_v35 = vrot.slane %v4257_v37, 1  ;;  %v4265_v33 = vrot.slane %v4264_v3, 1 }
 0x57f   : > { %v3928_v57 = vpop.f32.mrf.mxu2  ;;  %v4017_v18 = vpop.f32.mrf.mxu3 }
 0x580   : > { %v4259_v28 = vmax.f32 %v4257_v37, %v4258_v35  ;;  %v4266_v30 = vmax.f32 %v4264_v3, %v4265_v33  ;;  %v3929_v62 = vadd.f32 %v3928_v57, %v6005_v38  ;;  %v4018_v44 = vadd.f32 %v4017_v18, %v6007_v39 }
 0x581   : > { %v7289_v3 = vmax.f32 %v6547_v10, %v6838_v63  ;;  %v5389_v10 = vld [vmem:[%s7185_s4 + $0x40] sm:$0xff] }
 0x582   : > { %v4345_v1 = vmax.f32 %v7286_v46, %v4259_v28  ;;  %v4346_v16 = vmax.f32 %v7288_v8, %v4266_v30  ;;  %v4085_v49 = vmax.f32 %v3929_v62, 0.0  ;;  %v4086_v34 = vmax.f32 %v4018_v44, 0.0  ;;  %4640 = vmatpush.bf16.msra.mxu1 %v5389_v10 }
 0x584   : > { %v4377_v24 = vpack.c.bf16 %v4345_v1, %v4345_v1  ;;  %v4378_v52 = vpack.c.bf16 %v4346_v16, %v4346_v16  ;;  %v4267_v56 = vmax.f32 %v4083_v7, %v4085_v49  ;;  %v4274_v53 = vmax.f32 %v4084_v26, %v4086_v34  ;;  %v5381_v1 = vld [vmem:[%s7185_s4] sm:$0xff] }
 0x585   : > { %4626 = vmatpush.bf16.msra.mxu0 %v5381_v1 }
 0x586   : > { %v4474_v2 = vunpack.c.l.b16 %v4377_v24  ;;  %v4475_v55 = vunpack.c.l.b16 %v4378_v52  ;;  %v4268_v29 = vrot.slane %v4267_v56, 4  ;;  %v4275_v14 = vrot.slane %v4274_v53, 4 }
 0x587   : > { %v3931_v41 = vpop.f32.mrf.mxu2  ;;  %v4020_v50 = vpop.f32.mrf.mxu3 }
 0x588   : > { %v4507_v13 = vsel %vm4488_vm4, %v4474_v2, %v4506_v61  ;;  %v4514_v22 = vsel %vm4488_vm4, %v4475_v55, %v4513_v21  ;;  %v4269_v32 = vmax.f32 %v4267_v56, %v4268_v29  ;;  %v4276_v4 = vmax.f32 %v4274_v53, %v4275_v14 }
 0x589   : > { %v3932_v31 = vadd.f32 %v3931_v41, %v6005_v38  ;;  %v4021_v48 = vadd.f32 %v4020_v50, %v6007_v39 }
 0x58a   : > { %v4270_v5 = vrot.slane %v4269_v32, 2  ;;  %v4277_v45 = vrot.slane %v4276_v4, 2 }
 0x58b   : > { %v4087_v43 = vmax.f32 %v3932_v31, 0.0  ;;  %v4088_v37 = vmax.f32 %v4021_v48, 0.0 }
 0x58c   : > { %v4271_v54 = vmax.f32 %v4269_v32, %v4270_v5  ;;  %v4278_v42 = vmax.f32 %v4276_v4, %v4277_v45  ;;  %v7291_v5 = vld [vmem:[#allocation27_spill] sm:$0xff] }
 0x58d   : > { %v7292_v45 = vmax.f32 %v6571_v9, %v7291_v5 }
 0x58e   : > { %v4272_v25 = vrot.slane %v4271_v54, 1  ;;  %v4279_v12 = vrot.slane %v4278_v42, 1 }
 0x58f   : > { %v3933_v36 = vpop.f32.mrf.mxu2  ;;  %v4022_v51 = vpop.f32.mrf.mxu3 }
 0x590   : > { %v4273_v47 = vmax.f32 %v4271_v54, %v4272_v25  ;;  %v4280_v40 = vmax.f32 %v4278_v42, %v4279_v12  ;;  %v3934_v61 = vadd.f32 %v3933_v36, %v6005_v38  ;;  %v4023_v21 = vadd.f32 %v4022_v51, %v6007_v39 }
 0x591   : > { %v7293_v42 = vmax.f32 %v6573_v27, %v6856_v58 }
 0x592   : > { %v4347_v20 = vmax.f32 %v7289_v3, %v4273_v47  ;;  %v4348_v35 = vmax.f32 %v7290_v15, %v4280_v40  ;;  %v4089_v33 = vmax.f32 %v3934_v61, 0.0  ;;  %v4090_v57 = vmax.f32 %v4023_v21, 0.0 }
 0x594   : > { %v4379_v18 = vpack.c.bf16 %v4347_v20, %v4347_v20  ;;  %v4380_v28 = vpack.c.bf16 %v4348_v35, %v4348_v35  ;;  %v4281_v30 = vmax.f32 %v4087_v43, %v4089_v33  ;;  %v4288_v62 = vmax.f32 %v4088_v37, %v4090_v57 }
 0x596   : > { %v4476_v44 = vunpack.c.l.b16 %v4379_v18  ;;  %v4477_v7 = vunpack.c.l.b16 %v4380_v28  ;;  %v4282_v26 = vrot.slane %v4281_v30, 4  ;;  %v4289_v46 = vrot.slane %v4288_v62, 4 }
 0x597   : > { %v3936_v6 = vpop.f32.mrf.mxu2  ;;  %v4025_v63 = vpop.f32.mrf.mxu3 }
 0x598   : > { %v4508_v11 = vsel %vm4490_vm5, %v4476_v44, %v4507_v13  ;;  %v4515_v0 = vsel %vm4490_vm5, %v4477_v7, %v4514_v22  ;;  %v4283_v8 = vmax.f32 %v4281_v30, %v4282_v26  ;;  %v4290_v16 = vmax.f32 %v4288_v62, %v4289_v46 }
 0x599   : > { %v3937_v56 = vadd.f32 %v3936_v6, %v6005_v38  ;;  %v4026_v53 = vadd.f32 %v4025_v63, %v6007_v39 }
 0x59a   : > { %v4284_v49 = vrot.slane %v4283_v8, 2  ;;  %v4291_v34 = vrot.slane %v4290_v16, 2 }
 0x59b   : > { %v4091_v32 = vmax.f32 %v3937_v56, 0.0  ;;  %v4092_v4 = vmax.f32 %v4026_v53, 0.0 }
 0x59c   : > { %v4285_v24 = vmax.f32 %v4283_v8, %v4284_v49  ;;  %v4292_v52 = vmax.f32 %v4290_v16, %v4291_v34  ;;  %v7296_v16 = vld [vmem:[#allocation13_spill] sm:$0xff] }
 0x59d   : > { %v7297_v49 = vld [vmem:[#allocation29_spill] sm:$0xff] }
 0x59e   : > { %v4286_v2 = vrot.slane %v4285_v24, 1  ;;  %v4293_v55 = vrot.slane %v4292_v52, 1  ;;  %v7298_v34 = vmax.f32 %v7296_v16, %v7297_v49 }
 0x59f   : > { %v3938_v29 = vpop.f32.mrf.mxu2  ;;  %v4027_v14 = vpop.f32.mrf.mxu3 }
 0x5a0   : > { %v4287_v41 = vmax.f32 %v4285_v24, %v4286_v2  ;;  %v4294_v50 = vmax.f32 %v4292_v52, %v4293_v55  ;;  %v3939_v13 = vadd.f32 %v3938_v29, %v6005_v38  ;;  %v4028_v22 = vadd.f32 %v4027_v14, %v6007_v39 }
 0x5a2   : > { %v4349_v54 = vmax.f32 %v7292_v45, %v4287_v41  ;;  %v4350_v31 = vmax.f32 %v7293_v42, %v4294_v50  ;;  %v4093_v48 = vmax.f32 %v3939_v13, 0.0  ;;  %v4094_v25 = vmax.f32 %v4028_v22, 0.0 }
 0x5a4   : > { %v4381_v12 = vpack.c.bf16 %v4349_v54, %v4349_v54  ;;  %v4382_v36 = vpack.c.bf16 %v4350_v31, %v4350_v31  ;;  %v4295_v51 = vmax.f32 %v4091_v32, %v4093_v48  ;;  %v4302_v47 = vmax.f32 %v4092_v4, %v4094_v25  ;;  %v7299_v25 = vld [vmem:[#allocation30_spill] sm:$0xff] }
 0x5a6   : > { %v4478_v40 = vunpack.c.l.b16 %v4381_v12  ;;  %v4479_v61 = vunpack.c.l.b16 %v4382_v36  ;;  %v4296_v21 = vrot.slane %v4295_v51, 4  ;;  %v4303_v43 = vrot.slane %v4302_v47, 4 }
 0x5a7   : > { %v3941_v37 = vpop.f32.mrf.mxu2  ;;  %v4030_v3 = vpop.f32.mrf.mxu3  ;;  %v7300_v12 = vmax.f32 %v6604_v17, %v7299_v25  ;;  %v5457_v17 = vld [vmem:[%s7186_s5 + $0x3] ss:$0 sm:$0xff] }
 0x5a8   : > { %v4509_v20 = vsel %vm4492_vm6, %v4478_v40, %v4508_v11  ;;  %v4516_v9 = vsel %vm4492_vm6, %v4479_v61, %v4515_v0  ;;  %v4297_v15 = vmax.f32 %v4295_v51, %v4296_v21  ;;  %v4304_v35 = vmax.f32 %v4302_v47, %v4303_v43  ;;  %v7294_v11 = vld [vmem:[#allocation28_spill] sm:$0xff]  ;;  %v7301_v51 = vld [vmem:[#allocation31_spill] sm:$0xff] }
 0x5a9   : > { %v3942_v18 = vadd.f32 %v3941_v37, %v6005_v38  ;;  %v4031_v28 = vadd.f32 %v4030_v3, %v6007_v39  ;;  %v7295_v0 = vmax.f32 %v6589_v60, %v7294_v11  ;;  %v7302_v47 = vmax.f32 %v6606_v19, %v7301_v51 }
 0x5aa   : > { %v4298_v27 = vrot.slane %v4297_v15, 2  ;;  %v4305_v58 = vrot.slane %v4304_v35, 2 }
 0x5ab   : > { %v4095_v6 = vmax.f32 %v3942_v18, 0.0  ;;  %v4096_v63 = vmax.f32 %v4031_v28, 0.0 }
 0x5ac   : > { %v4299_v33 = vmax.f32 %v4297_v15, %v4298_v27  ;;  %v4306_v57 = vmax.f32 %v4304_v35, %v4305_v58 }
 0x5ae   : > { %v4300_v30 = vrot.slane %v4299_v33, 1  ;;  %v4307_v62 = vrot.slane %v4306_v57, 1 }
 0x5af   : > { %v3943_v44 = vpop.f32.mrf.mxu2  ;;  %v4032_v7 = vpop.f32.mrf.mxu3 }
 0x5b0   : > { %v4301_v26 = vmax.f32 %v4299_v33, %v4300_v30  ;;  %v4308_v46 = vmax.f32 %v4306_v57, %v4307_v62  ;;  %v3944_v1 = vadd.f32 %v3943_v44, %v6005_v38  ;;  %v4033_v10 = vadd.f32 %v4032_v7, %v6007_v39 }
 0x5b2   : > { %v4351_v8 = vmax.f32 %v7295_v0, %v4301_v26  ;;  %v4352_v24 = vmax.f32 %v7298_v34, %v4308_v46  ;;  %v4097_v52 = vmax.f32 %v3944_v1, 0.0  ;;  %v4098_v56 = vmax.f32 %v4033_v10, 0.0 }
 0x5b4   : > { %v4383_v53 = vpack.c.bf16 %v4351_v8, %v4351_v8  ;;  %v4384_v2 = vpack.c.bf16 %v4352_v24, %v4352_v24  ;;  %v4309_v55 = vmax.f32 %v4095_v6, %v4097_v52  ;;  %v4316_v29 = vmax.f32 %v4096_v63, %v4098_v56 }
 0x5b6   : > { %v4480_v14 = vunpack.c.l.b16 %v4383_v53  ;;  %v4481_v38 = vunpack.c.l.b16 %v4384_v2  ;;  %v4310_v41 = vrot.slane %v4309_v55, 4  ;;  %v4317_v39 = vrot.slane %v4316_v29, 4 }
 0x5b8   : > { %v4311_v50 = vmax.f32 %v4309_v55, %v4310_v41  ;;  %v4318_v13 = vmax.f32 %v4316_v29, %v4317_v39  ;;  %v4510_v22 = vsel %vm4494_vm7, %v4480_v14, %v4509_v20  ;;  %v4517_v60 = vsel %vm4494_vm7, %v4481_v38, %v4516_v9 }
 0x5ba   : > { %v4312_v32 = vrot.slane %v4311_v50, 2  ;;  %v4319_v4 = vrot.slane %v4318_v13, 2 }
 0x5bc   : > { %v4313_v5 = vmax.f32 %v4311_v50, %v4312_v32  ;;  %v4320_v45 = vmax.f32 %v4318_v13, %v4319_v4 }
 0x5be   : > { %v4314_v54 = vrot.slane %v4313_v5, 1  ;;  %v4321_v42 = vrot.slane %v4320_v45, 1 }
 0x5c0   : > { %v4315_v31 = vmax.f32 %v4313_v5, %v4314_v54  ;;  %v4322_v48 = vmax.f32 %v4320_v45, %v4321_v42 }
 0x5c2   : > { %v4353_v36 = vmax.f32 %v7300_v12, %v4315_v31  ;;  %v4354_v40 = vmax.f32 %v7302_v47, %v4322_v48 }
 0x5c4   : > { %v4385_v61 = vpack.c.bf16 %v4353_v36, %v4353_v36  ;;  %v4386_v21 = vpack.c.bf16 %v4354_v40, %v4354_v40 }
 0x5c6   : > { %v4482_v43 = vunpack.c.l.b16 %v4385_v61  ;;  %v4483_v37 = vunpack.c.l.b16 %v4386_v21 }
 0x5c8   : > { %v4511_v3 = vsel %vm4496_vm8, %v4482_v43, %v4510_v22  ;;  %v4518_v20 = vsel %vm4496_vm8, %v4483_v37, %v4517_v60 }
 0x5c9   : > { %v4519_v9 = vpack.c.b16 %v4511_v3, %v7026_v23  ;;  %v4520_v15 = vpack.c.b16 %v4518_v20, %v7029_v59 }
 0x5cb   : > { %4627 = vmatmul.bf16.vlgmr.msra.gmra.mxu0 %v4519_v9  ;;  %4641 = vmatmul.bf16.vlgmr.msra.gmra.mxu1 %v4520_v15 }
 0x648   : > { %v4628_v19 = vpop.f32.mrf.mxu0  ;;  %v4642_v35 = vpop.f32.mrf.mxu1 }
 0x649   : > { %v4629_v27 = vadd.f32 %v5457_v17, %v4628_v19 }
 0x64b   : > { %v4643_v58 = vadd.f32 %v4642_v35, %v4629_v27 }
 0x64d   : > { %4647 = vst [vmem:[%s271_s16] sm:$0xff] %v4643_v58 }
 0x650   : > { %v4630_v23 = vpop.f32.mrf.mxu0  ;;  %v4644_v33 = vpop.f32.mrf.mxu1 }
 0x651   : > { %v4631_v59 = vadd.f32 %v5457_v17, %v4630_v23 }
 0x653   : > { %v4645_v57 = vadd.f32 %v4644_v33, %v4631_v59 }
 0x655   : > { %4648 = vst [vmem:[%s271_s16 + $0x8] sm:$0xff] %v4645_v57 }
 0x656   : > { %5494 = shalt.err (!%p5491_p5)
}
 0x657   : > { %s5547_s12 = smov 128   ;;  %s5548_s16 = smov 8  }
 0x658   : > { %5398 = dma.vmem_to_hbm [thread:$0]  (%p5624_p4), %s4665_s27, 256, %s4667_s28, %s4650_s30, %s5547_s12, %s5547_s12, %s5548_s16  }
 0x659 PF: > { %p5404_p6 = scmp.ge.s32.totalorder %s5545_s26, 2  ;;  %s4681_s18 = sand.u32 1, %s5525_s21  }
 0x65a   : > { %s4682_s19 = scalar_lea.sflag [#allocation3], %s4681_s18 }
 0x65b   : > { %p5401_p7 = pnand %p5404_p6, %p5631_p8 }
 0x65d   : > { %p5402_p9 = pneg %p5401_p7 }
 0x65f   : > { %5520 = dma.done.wait (%p5402_p9), %s4682_s19, 256  }
 0x660   : > { %5522 = vsyncadd (%p5402_p9), %s4682_s19, 4294967040  ;;  %s19_s26 = sadd.s32 1, %s5545_s26   ;;  %s7303_s21 = smov %s5529_s22 }
 0x661   : > { %p16_p10 = scmp.ge.s32.totalorder %s19_s26, 4   ;;  %s7304_s22 = smov %s5533_s23 }
 0x662   : > { %s7305_s23 = smov %s5637_s10  ;;  %s7306_s24 = smov %s5541_s25 }
 0x663   : > { %s7307_s25 = smov %s7309_s29  ;;  %18 = sbr.rel (!%p16_p10) target bundleno = 4 (0x4), region = 80 }
 0x668   :  { %4688 = vsyncpa [#allocation3], 1 }
 0x669   :  { %4690 = vsyncpa [#allocation3 + $0x1], 1 }

</bundles_post_ra>
